<compile_context>
chip_gen: v6e
topology: v6e:2x2x1
jax: 0.10.0
libtpu: 0.0.40
codegen_flags: <defaults>
</compile_context>

<pallas_src>
import functools
import math

import jax
import jax.numpy as jnp
from jax.experimental import pallas as pl
from jax.experimental.pallas import tpu as pltpu

# MXU input dtype (f32 accumulation everywhere). LayerNorm / softmax stay f32.
_MXU_DTYPE = jnp.bfloat16
_LN_EPS = 1e-5


def _vmem_budget():
    """Chip-aware VMEM budget (bytes): ~3/4 of physical, conservatively capped."""
    try:
        phys = int(pltpu.get_tpu_info().vmem_capacity_bytes)
    except Exception:
        phys = 64 * 1024 * 1024          # conservative fallback (safe on v7x too)
    return min(phys * 3 // 4, 96 * 1024 * 1024)


_VMEM_BUDGET = _vmem_budget()


# ----------------------------------------------------------------------------
# Tile-size helper: largest tile <= target that divides `dim` and is a multiple
# of `mult` (the (8,128) layout requirement); falls back to the full dim.
# ----------------------------------------------------------------------------
def _pick_tile(dim, target, mult):
    if dim <= target:
        return dim
    t = (target // mult) * mult
    while t >= mult:
        if dim % t == 0:
            return t
        t -= mult
    # TODO(synk): ragged dims fall back to a full-size block (fine at small sizes).
    return dim


def _ln(x, gamma, beta, eps):
    mu = jnp.mean(x, axis=-1, keepdims=True)
    var = jnp.mean((x - mu) ** 2, axis=-1, keepdims=True)
    return (x - mu) * jax.lax.rsqrt(var + eps) * gamma + beta


# ----------------------------------------------------------------------------
# Pallas kernels
# ----------------------------------------------------------------------------
def _linear_kernel(*refs, relu, has_residual, ln_in, ln_out, eps):
    x_ref, w_ref, b_ref = refs[:3]
    i = 3
    if ln_in:
        gi_ref, bi_ref = refs[i:i + 2]; i += 2
    if has_residual:
        res_ref = refs[i]; i += 1
    if ln_out:
        go_ref, bo_ref = refs[i:i + 2]; i += 2
    o_ref = refs[i]

    k = pl.program_id(2)

    @pl.when(k == 0)
    def _init():
        o_ref[...] = jnp.zeros_like(o_ref)

    x = x_ref[...]
    if ln_in:                     # tk == K: the full feature row is in this block
        x = _ln(x, gi_ref[...], bi_ref[...], eps)
    # Accumulate directly into the resident f32 output block (no acc scratch).
    o_ref[...] += jnp.dot(x.astype(_MXU_DTYPE), w_ref[...],
                          preferred_element_type=jnp.float32)

    @pl.when(k == pl.num_programs(2) - 1)
    def _finalize():
        y = o_ref[...] + b_ref[...]
        if relu:
            y = jnp.maximum(y, 0.0)
        if has_residual:
            y = y + res_ref[...]
        if ln_out:                # tn == N: the full output row is in this block
            y = _ln(y, go_ref[...], bo_ref[...], eps)
        o_ref[...] = y


def _ff_kernel(x_ref, g_ref, bln_ref, w1_ref, b1_ref, w2_ref, b2_ref, o_ref, xn_ref,
               *, pre_norm, post_norm, eps):
    # Fused FeedForward (+ LayerNorm + residual): accumulate relu(x@W1+b1)@W2 over the
    # hidden tiles directly into the resident output block. The (tm, th) hidden
    # activation never touches HBM; the normalized input is cached in VMEM at j==0.
    j = pl.program_id(1)

    @pl.when(j == 0)
    def _init():
        o_ref[...] = jnp.zeros_like(o_ref)
        if pre_norm:
            xn_ref[...] = _ln(x_ref[...], g_ref[...], bln_ref[...], eps)

    xin = xn_ref[...] if pre_norm else x_ref[...]
    h = jnp.dot(xin.astype(_MXU_DTYPE), w1_ref[...], preferred_element_type=jnp.float32)
    h = jnp.maximum(h + b1_ref[...], 0.0)
    o_ref[...] += jnp.dot(h.astype(_MXU_DTYPE), w2_ref[...],
                          preferred_element_type=jnp.float32)

    @pl.when(j == pl.num_programs(1) - 1)
    def _finalize():
        y = o_ref[...] + b2_ref[...] + x_ref[...]      # residual = original x
        if post_norm:
            y = _ln(y, g_ref[...], bln_ref[...], eps)
        o_ref[...] = y


def _attn_kernel(*refs, num_heads, fuse_out, post_norm, eps):
    q_ref, k_ref, v_ref = refs[:3]
    i = 3
    if fuse_out:
        wo_ref, bo_ref, res_ref = refs[i:i + 3]; i += 3
        if post_norm:
            g_ref, bln_ref = refs[i:i + 2]; i += 2
    o_ref, p_ref = refs[i:i + 2]

    tq, d = q_ref.shape[1], q_ref.shape[2]
    s = k_ref.shape[1]
    dh = d // num_heads

    # 1/sqrt(d_head) is folded into the query projection weights at init.
    # Cast to bf16 BEFORE the head-split relayouts: halves the XLU-shuffled bytes.
    q = q_ref[0].astype(_MXU_DTYPE).reshape(tq, num_heads, dh)
    k = k_ref[0].astype(_MXU_DTYPE).reshape(s, num_heads, dh)
    v = v_ref[0].astype(_MXU_DTYPE).reshape(s, num_heads, dh)
    qh = jnp.transpose(q, (1, 0, 2))                   # (H, tq, Dh)
    kh = jnp.transpose(k, (1, 0, 2))                   # (H, S,  Dh)
    vh = jnp.transpose(v, (1, 0, 2))                   # (H, S,  Dh)

    scores = jnp.einsum("htd,hsd->hts", qh, kh,
                        preferred_element_type=jnp.float32)     # (H, tq, S) f32
    m = jnp.max(scores, axis=-1, keepdims=True)
    e = jnp.exp(scores - m)
    probs = e / jnp.sum(e, axis=-1, keepdims=True)               # f32 softmax
    p_ref[0] = probs                                             # module returns probs

    ctx = jnp.einsum("hts,hsd->htd", probs.astype(_MXU_DTYPE), vh,
                     preferred_element_type=jnp.float32)         # (H, tq, Dh) f32

    if fuse_out:
        # Fused output projection + residual (+post-norm LN): ctx never hits HBM.
        ctxb = jnp.transpose(ctx.astype(_MXU_DTYPE), (1, 0, 2)).reshape(tq, d)
        y = jnp.dot(ctxb, wo_ref[...], preferred_element_type=jnp.float32)
        y = y + bo_ref[...] + res_ref[0]
        if post_norm:
            y = _ln(y, g_ref[...], bln_ref[...], eps)
        o_ref[0] = y
    else:
        o_ref[0] = jnp.transpose(ctx, (1, 0, 2)).reshape(tq, d)


# ----------------------------------------------------------------------------
# Pallas wrappers
# ----------------------------------------------------------------------------
def linear(x2d, w, b, *, relu=False, residual=None, ln_in=None, ln_out=None,
           eps=_LN_EPS, tm=256, tn=256, tk=1024):
    """x2d: (M, K) f32, w: (K, N) bf16 pre-transposed, b: (N,) f32.
    Optional fused input LayerNorm (forces tk=K), residual (M, N), output LayerNorm
    (forces tn=N, applied after bias/ReLU/residual)."""
    M, K = x2d.shape
    N = w.shape[1]
    tm = _pick_tile(M, tm, 8)
    tk = K if ln_in is not None else _pick_tile(K, tk, 128)
    tn = N if ln_out is not None else _pick_tile(N, tn, 128)
    grid = (M // tm, N // tn, K // tk)

    in_specs = [
        pl.BlockSpec((tm, tk), lambda i, j, k: (i, k)),
        pl.BlockSpec((tk, tn), lambda i, j, k: (k, j)),
        pl.BlockSpec((1, tn), lambda i, j, k: (0, j)),
    ]
    args = [x2d, w, b.reshape(1, N)]
    if ln_in is not None:
        in_specs += [pl.BlockSpec((1, K), lambda i, j, k: (0, 0))] * 2
        args += [ln_in["gamma"].reshape(1, K), ln_in["beta"].reshape(1, K)]
    if residual is not None:
        in_specs.append(pl.BlockSpec((tm, tn), lambda i, j, k: (i, j)))
        args.append(residual)
    if ln_out is not None:
        in_specs += [pl.BlockSpec((1, N), lambda i, j, k: (0, 0))] * 2
        args += [ln_out["gamma"].reshape(1, N), ln_out["beta"].reshape(1, N)]

    bytes_accessed = 4 * M * K + 2 * K * N + 4 * M * N
    if residual is not None:
        bytes_accessed += 4 * M * N

    return pl.pallas_call(
        functools.partial(_linear_kernel, relu=relu,
                          has_residual=residual is not None,
                          ln_in=ln_in is not None, ln_out=ln_out is not None, eps=eps),
        grid=grid,
        out_shape=jax.ShapeDtypeStruct((M, N), jnp.float32),
        in_specs=in_specs,
        out_specs=pl.BlockSpec((tm, tn), lambda i, j, k: (i, j)),
        compiler_params=pltpu.CompilerParams(
            dimension_semantics=("parallel", "parallel", "arbitrary"),
            vmem_limit_bytes=_VMEM_BUDGET),
        cost_estimate=pl.CostEstimate(
            flops=2 * M * N * K, transcendentals=0, bytes_accessed=bytes_accessed),
    )(*args)


def ff_forward(p, ln, x, *, is_post_norm, eps=_LN_EPS):
    """Fused FeedForward block: pre-norm -> x + FF(LN(x)); post-norm -> LN(x + FF(x))."""
    B, S, D = x.shape
    M = B * S
    H = p["linear_1"]["w"].shape[1]          # 4 * D
    tm = _pick_tile(M, 256, 8)
    th = _pick_tile(H, 512, 128)

    # Double-buffered block footprint of the fused (untiled-D) kernel.
    fused_bytes = 2 * (2 * tm * D * 4                 # x block + out block (f32)
                       + D * th * 2 + th * D * 2      # W1 + W2 tiles (bf16)
                       + th * 4 + 3 * D * 4)          # b1, b2, gamma, beta
    fused_bytes += tm * D * 4 + tm * th * 4           # xn scratch + hidden working set

    if fused_bytes > _VMEM_BUDGET:
        # TODO(synk): a D-tiled fused FF kernel would avoid this two-pass fallback for
        # very large d_model; the fallback still fuses LN into the adjacent matmul.
        x2 = x.reshape(M, D)
        h = linear(x2, p["linear_1"]["w"], p["linear_1"]["b"], relu=True,
                   ln_in=None if is_post_norm else ln)
        out = linear(h, p["linear_2"]["w"], p["linear_2"]["b"], residual=x2,
                     ln_out=ln if is_post_norm else None)
        return out.reshape(B, S, D)

    grid = (M // tm, H // th)
    out = pl.pallas_call(
        functools.partial(_ff_kernel, pre_norm=not is_post_norm,
                          post_norm=is_post_norm, eps=eps),
        grid=grid,
        out_shape=jax.ShapeDtypeStruct((M, D), jnp.float32),
        in_specs=[
            pl.BlockSpec((tm, D), lambda i, j: (i, 0)),   # x (also the residual)
            pl.BlockSpec((1, D), lambda i, j: (0, 0)),    # gamma
            pl.BlockSpec((1, D), lambda i, j: (0, 0)),    # beta
            pl.BlockSpec((D, th), lambda i, j: (0, j)),   # W1 tile (bf16)
            pl.BlockSpec((1, th), lambda i, j: (0, j)),   # b1 tile
            pl.BlockSpec((th, D), lambda i, j: (j, 0)),   # W2 tile (bf16)
            pl.BlockSpec((1, D), lambda i, j: (0, 0)),    # b2
        ],
        out_specs=pl.BlockSpec((tm, D), lambda i, j: (i, 0)),
        scratch_shapes=[pltpu.VMEM((tm, D), jnp.float32)],   # normalized-x cache
        compiler_params=pltpu.CompilerParams(
            dimension_semantics=("parallel", "arbitrary"),
            vmem_limit_bytes=_VMEM_BUDGET),
        cost_estimate=pl.CostEstimate(
            flops=4 * M * D * H, transcendentals=0,
            bytes_accessed=4 * 2 * M * D + 2 * 2 * D * H),
    )(x.reshape(M, D), ln["gamma"].reshape(1, D), ln["beta"].reshape(1, D),
      p["linear_1"]["w"], p["linear_1"]["b"].reshape(1, H),
      p["linear_2"]["w"], p["linear_2"]["b"].reshape(1, D))
    return out.reshape(B, S, D)


def attention(q_arr, k_arr, v_arr, *, num_heads, d_model, t, s, offs,
              wo=None, bo=None, residual=None, ln_out=None, eps=_LN_EPS):
    """Attention over (batch, query-tile) grid. q/k/v may point at packed projection
    outputs; `offs` are block offsets (units of d_model) along the last axis. If `wo`
    is given, the output projection + residual (+post-norm LN) is fused in-kernel."""
    fuse_out = wo is not None
    post_norm = ln_out is not None
    B = q_arr.shape[0]
    dh = d_model // num_heads
    qo, ko, vo = offs

    # Pick the largest query tile whose double-buffered working set fits the budget.
    def footprint(tq_):
        blk = (tq_ * d_model * 4 + 2 * s * d_model * 4        # q, k, v blocks
               + tq_ * d_model * 4                             # out block
               + num_heads * tq_ * s * 4)                      # probs block
        if fuse_out:
            blk += d_model * d_model * 2 + tq_ * d_model * 4 + 3 * d_model * 4
        work = 3 * num_heads * tq_ * s * 4 + 2 * (tq_ + 2 * s) * d_model
        return 2 * blk + work

    target = 256
    tq = _pick_tile(t, target, 8)
    while target > 8 and footprint(tq) > _VMEM_BUDGET:
        target //= 2
        tq = _pick_tile(t, target, 8)
    grid = (B, t // tq)

    in_specs = [
        pl.BlockSpec((1, tq, d_model), lambda b, qi, o=qo: (b, qi, o)),
        pl.BlockSpec((1, s, d_model), lambda b, qi, o=ko: (b, 0, o)),
        pl.BlockSpec((1, s, d_model), lambda b, qi, o=vo: (b, 0, o)),
    ]
    args = [q_arr, k_arr, v_arr]
    if fuse_out:
        in_specs += [
            pl.BlockSpec((d_model, d_model), lambda b, qi: (0, 0)),
            pl.BlockSpec((1, d_model), lambda b, qi: (0, 0)),
            pl.BlockSpec((1, tq, d_model), lambda b, qi: (b, qi, 0)),
        ]
        args += [wo, bo.reshape(1, d_model), residual]
        if post_norm:
            in_specs += [pl.BlockSpec((1, d_model), lambda b, qi: (0, 0))] * 2
            args += [ln_out["gamma"].reshape(1, d_model),
                     ln_out["beta"].reshape(1, d_model)]

    flops = 4 * B * num_heads * t * s * dh
    if fuse_out:
        flops += 2 * B * t * d_model * d_model
    bytes_accessed = 4 * (2 * B * t * d_model + 2 * B * s * d_model
                          + B * num_heads * t * s) + 2 * d_model * d_model

    # TODO(synk): module API returns the full (B,H,T,S) probability tensor (f32 to match
    # the reference contract), which precludes flash-style S-tiling of the softmax.
    out, probs = pl.pallas_call(
        functools.partial(_attn_kernel, num_heads=num_heads, fuse_out=fuse_out,
                          post_norm=post_norm, eps=eps),
        grid=grid,
        out_shape=(jax.ShapeDtypeStruct((B, t, d_model), jnp.float32),
                   jax.ShapeDtypeStruct((B, num_heads, t, s), jnp.float32)),
        in_specs=in_specs,
        out_specs=(pl.BlockSpec((1, tq, d_model), lambda b, qi: (b, qi, 0)),
                   pl.BlockSpec((1, num_heads, tq, s), lambda b, qi: (b, 0, qi, 0))),
        compiler_params=pltpu.CompilerParams(
            dimension_semantics=("parallel", "parallel"),
            vmem_limit_bytes=_VMEM_BUDGET),
        cost_estimate=pl.CostEstimate(flops=flops, transcendentals=B * num_heads * t * s,
                                      bytes_accessed=bytes_accessed),
    )(*args)
    return out, probs


# ----------------------------------------------------------------------------
# Module-level forward (thin JAX glue around the Pallas kernels)
# ----------------------------------------------------------------------------
def mha_forward(p, q_in, kv_in, num_heads, *, residual, self_attn, ln, is_post_norm,
                eps=_LN_EPS):
    b, t, d = q_in.shape
    s = kv_in.shape[1]
    ln_in = None if is_post_norm else ln      # pre-norm: LN fused into the projection
    ln_out = ln if is_post_norm else None     # post-norm: LN fused after residual add
    lane_packed = (d % 128 == 0)   # packed column-block slicing via BlockSpec needs 128-aligned D

    if self_attn:
        # Fused Q/K/V projection (scale pre-folded into the Q columns), input LN fused.
        qkv = linear(q_in.reshape(b * t, d), p["qkv"]["w"], p["qkv"]["b"], ln_in=ln_in)
        qkv = qkv.reshape(b, t, 3 * d)
        if lane_packed:
            q_arr = k_arr = v_arr = qkv
            offs = (0, 1, 2)
        else:
            q_arr, k_arr, v_arr = qkv[..., :d], qkv[..., d:2 * d], qkv[..., 2 * d:]
            offs = (0, 0, 0)
    else:
        q_arr = linear(q_in.reshape(b * t, d), p["query"]["w"], p["query"]["b"],
                       ln_in=ln_in).reshape(b, t, d)
        kv = linear(kv_in.reshape(b * s, d), p["kv"]["w"], p["kv"]["b"]).reshape(b, s, 2 * d)
        if lane_packed:
            k_arr = v_arr = kv
            offs = (0, 0, 1)
        else:
            k_arr, v_arr = kv[..., :d], kv[..., d:]
            offs = (0, 0, 0)

    # Fuse the output projection + residual (+post-norm) into the attention kernel when
    # the double-buffered bf16 W_o comfortably fits in VMEM (skip for huge d_model).
    fuse_out = (2 * d * d * 2) <= (_VMEM_BUDGET // 4)
    if fuse_out:
        out, score = attention(q_arr, k_arr, v_arr, num_heads=num_heads, d_model=d,
                               t=t, s=s, offs=offs, wo=p["out"]["w"], bo=p["out"]["b"],
                               residual=residual, ln_out=ln_out, eps=eps)
    else:
        ctx, score = attention(q_arr, k_arr, v_arr, num_heads=num_heads, d_model=d,
                               t=t, s=s, offs=offs)
        out = linear(ctx.reshape(b * t, d), p["out"]["w"], p["out"]["b"],
                     residual=residual.reshape(b * t, d), ln_out=ln_out).reshape(b, t, d)
    return out, score


def layer_forward(params, x, x_e=None, *, is_post_norm, is_cross,
                  mha_heads, mhca_heads):
    # TODO(synk): dropout treated as identity (eval mode).
    def attn_block(h, p_attn, p_norm, heads, kv=None):
        return mha_forward(p_attn, h, h if kv is None else kv, heads,
                           residual=h, self_attn=(kv is None),
                           ln=p_norm, is_post_norm=is_post_norm)

    def ff_block(h, p_ff, p_norm):
        return ff_forward(p_ff, p_norm, h, is_post_norm=is_post_norm)

    # --- self attention + feed forward ---
    x, score = attn_block(x, params["mha"], params["mha_norm"], mha_heads)
    x = ff_block(x, params["ff"], params["ff_norm"])

    if x_e is not None and is_cross:
        # --- cross attention + cross feed forward ---
        x, cscore = attn_block(x, params["mhca"], params["mhca_norm"], mhca_heads, kv=x_e)
        x = ff_block(x, params["cff"], params["cff_norm"])
        return x, score, cscore
    return x, score, None


# ----------------------------------------------------------------------------
# Deterministic parameter initialization (mirrors nn.Linear / nn.LayerNorm),
# with weights pre-cast to bf16 and the attention scale folded into Wq/bq.
# ----------------------------------------------------------------------------
def _init_linear_f32(key, in_f, out_f):
    k1, k2 = jax.random.split(key)
    bound = 1.0 / math.sqrt(in_f)
    w = jax.random.uniform(k1, (in_f, out_f), jnp.float32, -bound, bound)  # (in, out)
    b = jax.random.uniform(k2, (out_f,), jnp.float32, -bound, bound)
    return {"w": w, "b": b}


def _cast_w(p):
    return {"w": p["w"].astype(_MXU_DTYPE), "b": p["b"]}


def init_mha(key, d_model, num_heads, fuse_qkv):
    ks = jax.random.split(key, 4)
    q = _init_linear_f32(ks[0], d_model, d_model)
    k = _init_linear_f32(ks[1], d_model, d_model)
    v = _init_linear_f32(ks[2], d_model, d_model)
    out = _init_linear_f32(ks[3], d_model, d_model)
    # Fold 1/sqrt(d_head) into the query projection (in f32, before the bf16 cast).
    scale = 1.0 / math.sqrt(d_model // num_heads)
    q = {"w": q["w"] * scale, "b": q["b"] * scale}
    if fuse_qkv:      # self-attention: Q, K, V share the same input -> one fused matmul
        qkv = {"w": jnp.concatenate([q["w"], k["w"], v["w"]], axis=1),
               "b": jnp.concatenate([q["b"], k["b"], v["b"]])}
        return {"qkv": _cast_w(qkv), "out": _cast_w(out)}
    # cross-attention: K and V share the same input (x_e) -> fused K/V matmul
    kv = {"w": jnp.concatenate([k["w"], v["w"]], axis=1),
          "b": jnp.concatenate([k["b"], v["b"]])}
    return {"query": _cast_w(q), "kv": _cast_w(kv), "out": _cast_w(out)}


def init_ff(key, d_model):
    k1, k2 = jax.random.split(key)
    return {"linear_1": _cast_w(_init_linear_f32(k1, d_model, d_model * 4)),
            "linear_2": _cast_w(_init_linear_f32(k2, d_model * 4, d_model))}


def init_layernorm(d_model):
    return {"gamma": jnp.ones((d_model,), jnp.float32),
            "beta": jnp.zeros((d_model,), jnp.float32)}


def init_layer(key, d_model, is_cross, mha_heads, mhca_heads):
    ks = jax.random.split(key, 4)
    params = {
        "mha": init_mha(ks[0], d_model, mha_heads, fuse_qkv=True),
        "mha_norm": init_layernorm(d_model),
        "ff": init_ff(ks[1], d_model),
        "ff_norm": init_layernorm(d_model),
    }
    if is_cross:
        params["mhca"] = init_mha(ks[2], d_model, mhca_heads, fuse_qkv=False)
        params["mhca_norm"] = init_layernorm(d_model)
        params["cff"] = init_ff(ks[3], d_model)
        params["cff_norm"] = init_layernorm(d_model)
    return params


# ----------------------------------------------------------------------------
if __name__ == "__main__":
    d_model = 128          # 128-aligned -> lane-dense blocks & packed QKV BlockSpec path
    mha_heads = 4
    mhca_heads = 4
    is_cross = True
    B, T, S_enc = 2, 8, 8

    root = jax.random.PRNGKey(0)
    k_params, k_x, k_xe = jax.random.split(root, 3)
    params = init_layer(k_params, d_model, is_cross, mha_heads, mhca_heads)

    x = jax.random.normal(k_x, (B, T, d_model), jnp.float32)
    x_e = jax.random.normal(k_xe, (B, S_enc, d_model), jnp.float32)

    for is_post_norm in (False, True):      # exercise both pre-norm and post-norm paths
        fwd = jax.jit(functools.partial(layer_forward, is_post_norm=is_post_norm,
                                        is_cross=is_cross, mha_heads=mha_heads,
                                        mhca_heads=mhca_heads))
        out, score, cscore = fwd(params, x, x_e)
        jax.block_until_ready((out, score, cscore))

        assert out.shape == (B, T, d_model)
        assert score.shape == (B, mha_heads, T, T)
        assert cscore.shape == (B, mhca_heads, T, S_enc)
        assert bool(jnp.all(jnp.isfinite(out)))

    print("KERNEL_OK")
</pallas_src>

<mosaic_0001>
module attributes {stable_mosaic.version = 11 : i64} {
  func.func @_linear_kernel(%arg0: i32, %arg1: i32, %arg2: i32, %arg3: memref<16x128xf32, #tpu.memory_space<vmem>>, %arg4: memref<128x256xbf16, #tpu.memory_space<vmem>>, %arg5: memref<1x256xf32, #tpu.memory_space<vmem>>, %arg6: memref<16x256xf32, #tpu.memory_space<vmem>>) attributes {dimension_semantics = [#tpu.dimension_semantics<parallel>, #tpu.dimension_semantics<parallel>, #tpu.dimension_semantics<arbitrary>], iteration_bounds = array<i64: 1, 1, 1>, scalar_prefetch = 0 : i64, scratch_operands = 0 : i64, tpu.core_type = #tpu.core_type<tc>, window_params = [{transform_indices = @transform_0, window_bounds = array<i64: 16, 128>}, {transform_indices = @transform_1, window_bounds = array<i64: 128, 256>}, {transform_indices = @transform_2, window_bounds = array<i64: 1, 256>}, {transform_indices = @transform_3, window_bounds = array<i64: 16, 256>}]} {
    %c0_i32 = arith.constant 0 : i32
    %0 = arith.cmpi eq, %arg2, %c0_i32 : i32
    %1 = arith.extui %0 : i1 to i32
    %c0_i32_0 = arith.constant 0 : i32
    %2 = arith.cmpi ne, %1, %c0_i32_0 : i32
    scf.if %2 {
      %cst_10 = arith.constant 0.000000e+00 : f32
      %13 = vector.broadcast %cst_10 : f32 to vector<16x256xf32>
      %c0_11 = arith.constant 0 : index
      %c0_12 = arith.constant 0 : index
      %14 = vector.load %arg6[%c0_11, %c0_12] : memref<16x256xf32, #tpu.memory_space<vmem>>, vector<16x256xf32>
      tpu.vector_store %arg6[%c0_11, %c0_12], %13 {strides = array<i32>} : memref<16x256xf32, #tpu.memory_space<vmem>>, vector<16x256xf32>,
    } else {
    }
    %c0 = arith.constant 0 : index
    %c0_1 = arith.constant 0 : index
    %3 = vector.load %arg3[%c0, %c0_1] : memref<16x128xf32, #tpu.memory_space<vmem>>, vector<16x128xf32>
    %c0_2 = arith.constant 0 : index
    %c0_3 = arith.constant 0 : index
    %4 = vector.load %arg6[%c0_2, %c0_3] : memref<16x256xf32, #tpu.memory_space<vmem>>, vector<16x256xf32>
    %5 = arith.truncf %3 : vector<16x128xf32> to vector<16x128xbf16>
    %c0_4 = arith.constant 0 : index
    %c0_5 = arith.constant 0 : index
    %6 = vector.load %arg4[%c0_4, %c0_5] : memref<128x256xbf16, #tpu.memory_space<vmem>>, vector<128x256xbf16>
    %cst = arith.constant dense<0.000000e+00> : vector<16x256xf32>
    %7 = tpu.matmul %5, %6, %cst {dimension_numbers = #tpu.dot_dimension_numbers<[1], [0], [0], [1], [0, 0, 1, 1], [], []>} : vector<16x128xbf16>, vector<128x256xbf16>, vector<16x256xf32> -> vector<16x256xf32>
    %8 = arith.addf %4, %7 : vector<16x256xf32>
    %c0_6 = arith.constant 0 : index
    %c0_7 = arith.constant 0 : index
    %9 = vector.load %arg6[%c0_6, %c0_7] : memref<16x256xf32, #tpu.memory_space<vmem>>, vector<16x256xf32>
    tpu.vector_store %arg6[%c0_6, %c0_7], %8 {strides = array<i32>} : memref<16x256xf32, #tpu.memory_space<vmem>>, vector<16x256xf32>,
    %c0_i32_8 = arith.constant 0 : i32
    %10 = arith.cmpi eq, %arg2, %c0_i32_8 : i32
    %11 = arith.extui %10 : i1 to i32
    %c0_i32_9 = arith.constant 0 : i32
    %12 = arith.cmpi ne, %11, %c0_i32_9 : i32
    scf.if %12 {
      %c0_10 = arith.constant 0 : index
      %c0_11 = arith.constant 0 : index
      %13 = vector.load %arg6[%c0_10, %c0_11] : memref<16x256xf32, #tpu.memory_space<vmem>>, vector<16x256xf32>
      %c0_12 = arith.constant 0 : index
      %c0_13 = arith.constant 0 : index
      %14 = vector.load %arg5[%c0_12, %c0_13] : memref<1x256xf32, #tpu.memory_space<vmem>>, vector<1x256xf32>
      %15 = vector.broadcast %14 : vector<1x256xf32> to vector<16x256xf32>
      %16 = arith.addf %13, %15 : vector<16x256xf32>
      %c0_14 = arith.constant 0 : index
      %c0_15 = arith.constant 0 : index
      %17 = vector.load %arg6[%c0_14, %c0_15] : memref<16x256xf32, #tpu.memory_space<vmem>>, vector<16x256xf32>
      tpu.vector_store %arg6[%c0_14, %c0_15], %16 {strides = array<i32>} : memref<16x256xf32, #tpu.memory_space<vmem>>, vector<16x256xf32>,
    } else {
    }
    return
  }
  func.func @transform_0(%arg0: i32, %arg1: i32, %arg2: i32) -> (i32, i32) {
    %c0_i32 = arith.constant 0 : i32
    return %arg0, %arg2 : i32, i32
  }
  func.func @transform_1(%arg0: i32, %arg1: i32, %arg2: i32) -> (i32, i32) {
    %c0_i32 = arith.constant 0 : i32
    return %arg2, %arg1 : i32, i32
  }
  func.func @transform_2(%arg0: i32, %arg1: i32, %arg2: i32) -> (i32, i32) {
    %c0_i32 = arith.constant 0 : i32
    %c0_i32_0 = arith.constant 0 : i32
    return %c0_i32, %arg1 : i32, i32
  }
  func.func @transform_3(%arg0: i32, %arg1: i32, %arg2: i32) -> (i32, i32) {
    %c0_i32 = arith.constant 0 : i32
    return %arg0, %arg1 : i32, i32
  }
}

module attributes {stable_mosaic.version = 11 : i64} {
  func.func @_attn_kernel(%arg0: i32, %arg1: i32, %arg2: memref<1x8x128xf32, #tpu.memory_space<vmem>>, %arg3: memref<1x8x128xf32, #tpu.memory_space<vmem>>, %arg4: memref<1x8x128xf32, #tpu.memory_space<vmem>>, %arg5: memref<128x128xbf16, #tpu.memory_space<vmem>>, %arg6: memref<1x128xf32, #tpu.memory_space<vmem>>, %arg7: memref<1x8x128xf32, #tpu.memory_space<vmem>>, %arg8: memref<1x8x128xf32, #tpu.memory_space<vmem>>, %arg9: memref<1x4x8x8xf32, #tpu.memory_space<vmem>>) attributes {dimension_semantics = [#tpu.dimension_semantics<parallel>, #tpu.dimension_semantics<parallel>], iteration_bounds = array<i64: 2, 1>, scalar_prefetch = 0 : i64, scratch_operands = 0 : i64, tpu.core_type = #tpu.core_type<tc>, window_params = [{transform_indices = @transform_0, window_bounds = array<i64: 1, 8, 128>}, {transform_indices = @transform_1, window_bounds = array<i64: 1, 8, 128>}, {transform_indices = @transform_2, window_bounds = array<i64: 1, 8, 128>}, {pipeline_mode = #tpu.pipeline_mode<synchronous>, transform_indices = @transform_3, window_bounds = array<i64: 128, 128>}, {pipeline_mode = #tpu.pipeline_mode<synchronous>, transform_indices = @transform_4, window_bounds = array<i64: 1, 128>}, {transform_indices = @transform_5, window_bounds = array<i64: 1, 8, 128>}, {transform_indices = @transform_6, window_bounds = array<i64: 1, 8, 128>}, {transform_indices = @transform_7, window_bounds = array<i64: 1, 4, 8, 8>}]} {
    %c0 = arith.constant 0 : index
    %c0_0 = arith.constant 0 : index
    %c0_1 = arith.constant 0 : index
    %0 = vector.load %arg2[%c0, %c0_0, %c0_1] : memref<1x8x128xf32, #tpu.memory_space<vmem>>, vector<1x8x128xf32>
    %1 = vector.shape_cast %0 : vector<1x8x128xf32> to vector<8x128xf32>
    %2 = arith.truncf %1 : vector<8x128xf32> to vector<8x128xbf16>
    %3 = vector.shape_cast %2 : vector<8x128xbf16> to vector<8x4x32xbf16>
    %c0_2 = arith.constant 0 : index
    %c0_3 = arith.constant 0 : index
    %c0_4 = arith.constant 0 : index
    %4 = vector.load %arg3[%c0_2, %c0_3, %c0_4] : memref<1x8x128xf32, #tpu.memory_space<vmem>>, vector<1x8x128xf32>
    %5 = vector.shape_cast %4 : vector<1x8x128xf32> to vector<8x128xf32>
    %6 = arith.truncf %5 : vector<8x128xf32> to vector<8x128xbf16>
    %7 = vector.shape_cast %6 : vector<8x128xbf16> to vector<8x4x32xbf16>
    %c0_5 = arith.constant 0 : index
    %c0_6 = arith.constant 0 : index
    %c0_7 = arith.constant 0 : index
    %8 = vector.load %arg4[%c0_5, %c0_6, %c0_7] : memref<1x8x128xf32, #tpu.memory_space<vmem>>, vector<1x8x128xf32>
    %9 = vector.shape_cast %8 : vector<1x8x128xf32> to vector<8x128xf32>
    %10 = arith.truncf %9 : vector<8x128xf32> to vector<8x128xbf16>
    %11 = vector.shape_cast %10 : vector<8x128xbf16> to vector<8x4x32xbf16>
    %12 = tpu.transpose %3, [1, 0, 2] : vector<8x4x32xbf16> -> vector<4x8x32xbf16>
    %13 = tpu.transpose %7, [1, 0, 2] : vector<8x4x32xbf16> -> vector<4x8x32xbf16>
    %14 = tpu.transpose %11, [1, 0, 2] : vector<8x4x32xbf16> -> vector<4x8x32xbf16>
    "tpu.trace_start"() <{level = 10 : i32, message = "htd,hsd->hts"}> : () -> ()
    %cst = arith.constant dense<0.000000e+00> : vector<4x8x8xf32>
    %15 = tpu.matmul %12, %13, %cst {dimension_numbers = #tpu.dot_dimension_numbers<[2], [2], [1], [1], [0, 0, 0, 1, 1, 1], [0], [0]>} : vector<4x8x32xbf16>, vector<4x8x32xbf16>, vector<4x8x8xf32> -> vector<4x8x8xf32>
    "tpu.trace_stop"() : () -> ()
    %cst_8 = arith.constant dense<0xFF800000> : vector<4x8xf32>
    %16 = vector.multi_reduction <maximumf>, %15, %cst_8 [2] : vector<4x8x8xf32> to vector<4x8xf32>
    %17 = vector.shape_cast %16 : vector<4x8xf32> to vector<4x8x1xf32>
    %18 = vector.broadcast %17 : vector<4x8x1xf32> to vector<4x8x8xf32>
    %19 = arith.subf %15, %18 : vector<4x8x8xf32>
    %20 = math.exp %19 : vector<4x8x8xf32>
    %cst_9 = arith.constant dense<0.000000e+00> : vector<4x8xf32>
    %21 = vector.multi_reduction <add>, %20, %cst_9 [2] : vector<4x8x8xf32> to vector<4x8xf32>
    %22 = vector.shape_cast %21 : vector<4x8xf32> to vector<4x8x1xf32>
    %23 = vector.broadcast %22 : vector<4x8x1xf32> to vector<4x8x8xf32>
    %24 = arith.divf %20, %23 : vector<4x8x8xf32>
    %c0_10 = arith.constant 0 : index
    %c0_11 = arith.constant 0 : index
    %c0_12 = arith.constant 0 : index
    %c0_13 = arith.constant 0 : index
    %25 = vector.load %arg9[%c0_10, %c0_11, %c0_12, %c0_13] : memref<1x4x8x8xf32, #tpu.memory_space<vmem>>, vector<1x4x8x8xf32>
    %26 = vector.shape_cast %25 : vector<1x4x8x8xf32> to vector<4x8x8xf32>
    %27 = vector.shape_cast %24 : vector<4x8x8xf32> to vector<1x4x8x8xf32>
    tpu.vector_store %arg9[%c0_10, %c0_11, %c0_12, %c0_13], %27 {strides = array<i32>} : memref<1x4x8x8xf32, #tpu.memory_space<vmem>>, vector<1x4x8x8xf32>,
    %28 = arith.truncf %24 : vector<4x8x8xf32> to vector<4x8x8xbf16>
    "tpu.trace_start"() <{level = 10 : i32, message = "hts,hsd->htd"}> : () -> ()
    %cst_14 = arith.constant dense<0.000000e+00> : vector<4x8x32xf32>
    %29 = tpu.matmul %28, %14, %cst_14 {dimension_numbers = #tpu.dot_dimension_numbers<[2], [1], [1], [2], [0, 0, 0, 1, 1, 2], [0], [0]>} : vector<4x8x8xbf16>, vector<4x8x32xbf16>, vector<4x8x32xf32> -> vector<4x8x32xf32>
    "tpu.trace_stop"() : () -> ()
    %30 = arith.truncf %29 : vector<4x8x32xf32> to vector<4x8x32xbf16>
    %31 = tpu.transpose %30, [1, 0, 2] : vector<4x8x32xbf16> -> vector<8x4x32xbf16>
    %32 = vector.shape_cast %31 : vector<8x4x32xbf16> to vector<8x128xbf16>
    %c0_15 = arith.constant 0 : index
    %c0_16 = arith.constant 0 : index
    %33 = vector.load %arg5[%c0_15, %c0_16] : memref<128x128xbf16, #tpu.memory_space<vmem>>, vector<128x128xbf16>
    %cst_17 = arith.constant dense<0.000000e+00> : vector<8x128xf32>
    %34 = tpu.matmul %32, %33, %cst_17 {dimension_numbers = #tpu.dot_dimension_numbers<[1], [0], [0], [1], [0, 0, 1, 1], [], []>} : vector<8x128xbf16>, vector<128x128xbf16>, vector<8x128xf32> -> vector<8x128xf32>
    %c0_18 = arith.constant 0 : index
    %c0_19 = arith.constant 0 : index
    %35 = vector.load %arg6[%c0_18, %c0_19] : memref<1x128xf32, #tpu.memory_space<vmem>>, vector<1x128xf32>
    %36 = vector.broadcast %35 : vector<1x128xf32> to vector<8x128xf32>
    %37 = arith.addf %34, %36 : vector<8x128xf32>
    %c0_20 = arith.constant 0 : index
    %c0_21 = arith.constant 0 : index
    %c0_22 = arith.constant 0 : index
    %38 = vector.load %arg7[%c0_20, %c0_21, %c0_22] : memref<1x8x128xf32, #tpu.memory_space<vmem>>, vector<1x8x128xf32>
    %39 = vector.shape_cast %38 : vector<1x8x128xf32> to vector<8x128xf32>
    %40 = arith.addf %37, %39 : vector<8x128xf32>
    %c0_23 = arith.constant 0 : index
    %c0_24 = arith.constant 0 : index
    %c0_25 = arith.constant 0 : index
    %41 = vector.load %arg8[%c0_23, %c0_24, %c0_25] : memref<1x8x128xf32, #tpu.memory_space<vmem>>, vector<1x8x128xf32>
    %42 = vector.shape_cast %41 : vector<1x8x128xf32> to vector<8x128xf32>
    %43 = vector.shape_cast %40 : vector<8x128xf32> to vector<1x8x128xf32>
    tpu.vector_store %arg8[%c0_23, %c0_24, %c0_25], %43 {strides = array<i32>} : memref<1x8x128xf32, #tpu.memory_space<vmem>>, vector<1x8x128xf32>,
    return
  }
  func.func @transform_0(%arg0: i32, %arg1: i32) -> (i32, i32, i32) {
    %c0_i32 = arith.constant 0 : i32
    %c0_i32_0 = arith.constant 0 : i32
    return %arg0, %arg1, %c0_i32 : i32, i32, i32
  }
  func.func @transform_1(%arg0: i32, %arg1: i32) -> (i32, i32, i32) {
    %c0_i32 = arith.constant 0 : i32
    %c1_i32 = arith.constant 1 : i32
    %c0_i32_0 = arith.constant 0 : i32
    return %arg0, %c0_i32, %c1_i32 : i32, i32, i32
  }
  func.func @transform_2(%arg0: i32, %arg1: i32) -> (i32, i32, i32) {
    %c0_i32 = arith.constant 0 : i32
    %c2_i32 = arith.constant 2 : i32
    %c0_i32_0 = arith.constant 0 : i32
    return %arg0, %c0_i32, %c2_i32 : i32, i32, i32
  }
  func.func @transform_3(%arg0: i32, %arg1: i32) -> (i32, i32) {
    %c0_i32 = arith.constant 0 : i32
    %c0_i32_0 = arith.constant 0 : i32
    %c0_i32_1 = arith.constant 0 : i32
    return %c0_i32, %c0_i32_0 : i32, i32
  }
  func.func @transform_4(%arg0: i32, %arg1: i32) -> (i32, i32) {
    %c0_i32 = arith.constant 0 : i32
    %c0_i32_0 = arith.constant 0 : i32
    %c0_i32_1 = arith.constant 0 : i32
    return %c0_i32, %c0_i32_0 : i32, i32
  }
  func.func @transform_5(%arg0: i32, %arg1: i32) -> (i32, i32, i32) {
    %c0_i32 = arith.constant 0 : i32
    %c0_i32_0 = arith.constant 0 : i32
    return %arg0, %arg1, %c0_i32 : i32, i32, i32
  }
  func.func @transform_6(%arg0: i32, %arg1: i32) -> (i32, i32, i32) {
    %c0_i32 = arith.constant 0 : i32
    %c0_i32_0 = arith.constant 0 : i32
    return %arg0, %arg1, %c0_i32 : i32, i32, i32
  }
  func.func @transform_7(%arg0: i32, %arg1: i32) -> (i32, i32, i32, i32) {
    %c0_i32 = arith.constant 0 : i32
    %c0_i32_0 = arith.constant 0 : i32
    %c0_i32_1 = arith.constant 0 : i32
    return %arg0, %c0_i32, %arg1, %c0_i32_0 : i32, i32, i32, i32
  }
}

module attributes {stable_mosaic.version = 11 : i64} {
  func.func @_linear_kernel(%arg0: i32, %arg1: i32, %arg2: i32, %arg3: memref<16x128xf32, #tpu.memory_space<vmem>>, %arg4: memref<128x128xbf16, #tpu.memory_space<vmem>>, %arg5: memref<1x128xf32, #tpu.memory_space<vmem>>, %arg6: memref<1x128xf32, #tpu.memory_space<vmem>>, %arg7: memref<1x128xf32, #tpu.memory_space<vmem>>, %arg8: memref<16x128xf32, #tpu.memory_space<vmem>>) attributes {dimension_semantics = [#tpu.dimension_semantics<parallel>, #tpu.dimension_semantics<parallel>, #tpu.dimension_semantics<arbitrary>], iteration_bounds = array<i64: 1, 3, 1>, scalar_prefetch = 0 : i64, scratch_operands = 0 : i64, tpu.core_type = #tpu.core_type<tc>, window_params = [{transform_indices = @transform_0, window_bounds = array<i64: 16, 128>}, {transform_indices = @transform_1, window_bounds = array<i64: 128, 128>}, {transform_indices = @transform_2, window_bounds = array<i64: 1, 128>}, {pipeline_mode = #tpu.pipeline_mode<synchronous>, transform_indices = @transform_3, window_bounds = array<i64: 1, 128>}, {pipeline_mode = #tpu.pipeline_mode<synchronous>, transform_indices = @transform_4, window_bounds = array<i64: 1, 128>}, {transform_indices = @transform_5, window_bounds = array<i64: 16, 128>}]} {
    %c0_i32 = arith.constant 0 : i32
    %0 = arith.cmpi eq, %arg2, %c0_i32 : i32
    %1 = arith.extui %0 : i1 to i32
    %c0_i32_0 = arith.constant 0 : i32
    %2 = arith.cmpi ne, %1, %c0_i32_0 : i32
    scf.if %2 {
      %cst_19 = arith.constant 0.000000e+00 : f32
      %37 = vector.broadcast %cst_19 : f32 to vector<16x128xf32>
      %c0_20 = arith.constant 0 : index
      %c0_21 = arith.constant 0 : index
      %38 = vector.load %arg8[%c0_20, %c0_21] : memref<16x128xf32, #tpu.memory_space<vmem>>, vector<16x128xf32>
      tpu.vector_store %arg8[%c0_20, %c0_21], %37 {strides = array<i32>} : memref<16x128xf32, #tpu.memory_space<vmem>>, vector<16x128xf32>,
    } else {
    }
    %c0 = arith.constant 0 : index
    %c0_1 = arith.constant 0 : index
    %3 = vector.load %arg3[%c0, %c0_1] : memref<16x128xf32, #tpu.memory_space<vmem>>, vector<16x128xf32>
    %c0_2 = arith.constant 0 : index
    %c0_3 = arith.constant 0 : index
    %4 = vector.load %arg6[%c0_2, %c0_3] : memref<1x128xf32, #tpu.memory_space<vmem>>, vector<1x128xf32>
    %c0_4 = arith.constant 0 : index
    %c0_5 = arith.constant 0 : index
    %5 = vector.load %arg7[%c0_4, %c0_5] : memref<1x128xf32, #tpu.memory_space<vmem>>, vector<1x128xf32>
    %cst = arith.constant dense<0.000000e+00> : vector<16xf32>
    %6 = vector.multi_reduction <add>, %3, %cst [1] : vector<16x128xf32> to vector<16xf32>
    %7 = vector.shape_cast %6 : vector<16xf32> to vector<16x1xf32>
    %cst_6 = arith.constant 1.280000e+02 : f32
    %8 = vector.broadcast %cst_6 : f32 to vector<16x1xf32>
    %9 = arith.divf %7, %8 : vector<16x1xf32>
    %10 = vector.broadcast %9 : vector<16x1xf32> to vector<16x128xf32>
    %11 = arith.subf %3, %10 : vector<16x128xf32>
    %12 = arith.mulf %11, %11 : vector<16x128xf32>
    %cst_7 = arith.constant dense<0.000000e+00> : vector<16xf32>
    %13 = vector.multi_reduction <add>, %12, %cst_7 [1] : vector<16x128xf32> to vector<16xf32>
    %14 = vector.shape_cast %13 : vector<16xf32> to vector<16x1xf32>
    %cst_8 = arith.constant 1.280000e+02 : f32
    %15 = vector.broadcast %cst_8 : f32 to vector<16x1xf32>
    %16 = arith.divf %14, %15 : vector<16x1xf32>
    %17 = vector.broadcast %9 : vector<16x1xf32> to vector<16x128xf32>
    %18 = arith.subf %3, %17 : vector<16x128xf32>
    %cst_9 = arith.constant 9.99999974E-6 : f32
    %19 = vector.broadcast %cst_9 : f32 to vector<16x1xf32>
    %20 = arith.addf %16, %19 : vector<16x1xf32>
    %21 = math.rsqrt %20 : vector<16x1xf32>
    %22 = vector.broadcast %21 : vector<16x1xf32> to vector<16x128xf32>
    %23 = arith.mulf %18, %22 : vector<16x128xf32>
    %24 = vector.broadcast %4 : vector<1x128xf32> to vector<16x128xf32>
    %25 = arith.mulf %23, %24 : vector<16x128xf32>
    %26 = vector.broadcast %5 : vector<1x128xf32> to vector<16x128xf32>
    %27 = arith.addf %25, %26 : vector<16x128xf32>
    %c0_10 = arith.constant 0 : index
    %c0_11 = arith.constant 0 : index
    %28 = vector.load %arg8[%c0_10, %c0_11] : memref<16x128xf32, #tpu.memory_space<vmem>>, vector<16x128xf32>
    %29 = arith.truncf %27 : vector<16x128xf32> to vector<16x128xbf16>
    %c0_12 = arith.constant 0 : index
    %c0_13 = arith.constant 0 : index
    %30 = vector.load %arg4[%c0_12, %c0_13] : memref<128x128xbf16, #tpu.memory_space<vmem>>, vector<128x128xbf16>
    %cst_14 = arith.constant dense<0.000000e+00> : vector<16x128xf32>
    %31 = tpu.matmul %29, %30, %cst_14 {dimension_numbers = #tpu.dot_dimension_numbers<[1], [0], [0], [1], [0, 0, 1, 1], [], []>} : vector<16x128xbf16>, vector<128x128xbf16>, vector<16x128xf32> -> vector<16x128xf32>
    %32 = arith.addf %28, %31 : vector<16x128xf32>
    %c0_15 = arith.constant 0 : index
    %c0_16 = arith.constant 0 : index
    %33 = vector.load %arg8[%c0_15, %c0_16] : memref<16x128xf32, #tpu.memory_space<vmem>>, vector<16x128xf32>
    tpu.vector_store %arg8[%c0_15, %c0_16], %32 {strides = array<i32>} : memref<16x128xf32, #tpu.memory_space<vmem>>, vector<16x128xf32>,
    %c0_i32_17 = arith.constant 0 : i32
    %34 = arith.cmpi eq, %arg2, %c0_i32_17 : i32
    %35 = arith.extui %34 : i1 to i32
    %c0_i32_18 = arith.constant 0 : i32
    %36 = arith.cmpi ne, %35, %c0_i32_18 : i32
    scf.if %36 {
      %c0_19 = arith.constant 0 : index
      %c0_20 = arith.constant 0 : index
      %37 = vector.load %arg8[%c0_19, %c0_20] : memref<16x128xf32, #tpu.memory_space<vmem>>, vector<16x128xf32>
      %c0_21 = arith.constant 0 : index
      %c0_22 = arith.constant 0 : index
      %38 = vector.load %arg5[%c0_21, %c0_22] : memref<1x128xf32, #tpu.memory_space<vmem>>, vector<1x128xf32>
      %39 = vector.broadcast %38 : vector<1x128xf32> to vector<16x128xf32>
      %40 = arith.addf %37, %39 : vector<16x128xf32>
      %c0_23 = arith.constant 0 : index
      %c0_24 = arith.constant 0 : index
      %41 = vector.load %arg8[%c0_23, %c0_24] : memref<16x128xf32, #tpu.memory_space<vmem>>, vector<16x128xf32>
      tpu.vector_store %arg8[%c0_23, %c0_24], %40 {strides = array<i32>} : memref<16x128xf32, #tpu.memory_space<vmem>>, vector<16x128xf32>,
    } else {
    }
    return
  }
  func.func @transform_0(%arg0: i32, %arg1: i32, %arg2: i32) -> (i32, i32) {
    %c0_i32 = arith.constant 0 : i32
    return %arg0, %arg2 : i32, i32
  }
  func.func @transform_1(%arg0: i32, %arg1: i32, %arg2: i32) -> (i32, i32) {
    %c0_i32 = arith.constant 0 : i32
    return %arg2, %arg1 : i32, i32
  }
  func.func @transform_2(%arg0: i32, %arg1: i32, %arg2: i32) -> (i32, i32) {
    %c0_i32 = arith.constant 0 : i32
    %c0_i32_0 = arith.constant 0 : i32
    return %c0_i32, %arg1 : i32, i32
  }
  func.func @transform_3(%arg0: i32, %arg1: i32, %arg2: i32) -> (i32, i32) {
    %c0_i32 = arith.constant 0 : i32
    %c0_i32_0 = arith.constant 0 : i32
    %c0_i32_1 = arith.constant 0 : i32
    return %c0_i32, %c0_i32_0 : i32, i32
  }
  func.func @transform_4(%arg0: i32, %arg1: i32, %arg2: i32) -> (i32, i32) {
    %c0_i32 = arith.constant 0 : i32
    %c0_i32_0 = arith.constant 0 : i32
    %c0_i32_1 = arith.constant 0 : i32
    return %c0_i32, %c0_i32_0 : i32, i32
  }
  func.func @transform_5(%arg0: i32, %arg1: i32, %arg2: i32) -> (i32, i32) {
    %c0_i32 = arith.constant 0 : i32
    return %arg0, %arg1 : i32, i32
  }
}

module attributes {stable_mosaic.version = 11 : i64} {
  func.func @_ff_kernel(%arg0: i32, %arg1: i32, %arg2: memref<16x128xf32, #tpu.memory_space<vmem>>, %arg3: memref<1x128xf32, #tpu.memory_space<vmem>>, %arg4: memref<1x128xf32, #tpu.memory_space<vmem>>, %arg5: memref<128x512xbf16, #tpu.memory_space<vmem>>, %arg6: memref<1x512xf32, #tpu.memory_space<vmem>>, %arg7: memref<512x128xbf16, #tpu.memory_space<vmem>>, %arg8: memref<1x128xf32, #tpu.memory_space<vmem>>, %arg9: memref<16x128xf32, #tpu.memory_space<vmem>>, %arg10: memref<16x128xf32, #tpu.memory_space<vmem>>) attributes {dimension_semantics = [#tpu.dimension_semantics<parallel>, #tpu.dimension_semantics<arbitrary>], iteration_bounds = array<i64: 1, 1>, scalar_prefetch = 0 : i64, scratch_operands = 1 : i64, tpu.core_type = #tpu.core_type<tc>, window_params = [{transform_indices = @transform_0, window_bounds = array<i64: 16, 128>}, {pipeline_mode = #tpu.pipeline_mode<synchronous>, transform_indices = @transform_1, window_bounds = array<i64: 1, 128>}, {pipeline_mode = #tpu.pipeline_mode<synchronous>, transform_indices = @transform_2, window_bounds = array<i64: 1, 128>}, {transform_indices = @transform_3, window_bounds = array<i64: 128, 512>}, {transform_indices = @transform_4, window_bounds = array<i64: 1, 512>}, {transform_indices = @transform_5, window_bounds = array<i64: 512, 128>}, {pipeline_mode = #tpu.pipeline_mode<synchronous>, transform_indices = @transform_6, window_bounds = array<i64: 1, 128>}, {transform_indices = @transform_7, window_bounds = array<i64: 16, 128>}]} {
    %c0_i32 = arith.constant 0 : i32
    %0 = arith.cmpi eq, %arg1, %c0_i32 : i32
    %1 = arith.extui %0 : i1 to i32
    %c0_i32_0 = arith.constant 0 : i32
    %2 = arith.cmpi ne, %1, %c0_i32_0 : i32
    scf.if %2 {
      %cst_16 = arith.constant 0.000000e+00 : f32
      %21 = vector.broadcast %cst_16 : f32 to vector<16x128xf32>
      %c0_17 = arith.constant 0 : index
      %c0_18 = arith.constant 0 : index
      %22 = vector.load %arg9[%c0_17, %c0_18] : memref<16x128xf32, #tpu.memory_space<vmem>>, vector<16x128xf32>
      tpu.vector_store %arg9[%c0_17, %c0_18], %21 {strides = array<i32>} : memref<16x128xf32, #tpu.memory_space<vmem>>, vector<16x128xf32>,
      %c0_19 = arith.constant 0 : index
      %c0_20 = arith.constant 0 : index
      %23 = vector.load %arg2[%c0_19, %c0_20] : memref<16x128xf32, #tpu.memory_space<vmem>>, vector<16x128xf32>
      %c0_21 = arith.constant 0 : index
      %c0_22 = arith.constant 0 : index
      %24 = vector.load %arg3[%c0_21, %c0_22] : memref<1x128xf32, #tpu.memory_space<vmem>>, vector<1x128xf32>
      %c0_23 = arith.constant 0 : index
      %c0_24 = arith.constant 0 : index
      %25 = vector.load %arg4[%c0_23, %c0_24] : memref<1x128xf32, #tpu.memory_space<vmem>>, vector<1x128xf32>
      %cst_25 = arith.constant dense<0.000000e+00> : vector<16xf32>
      %26 = vector.multi_reduction <add>, %23, %cst_25 [1] : vector<16x128xf32> to vector<16xf32>
      %27 = vector.shape_cast %26 : vector<16xf32> to vector<16x1xf32>
      %cst_26 = arith.constant 1.280000e+02 : f32
      %28 = vector.broadcast %cst_26 : f32 to vector<16x1xf32>
      %29 = arith.divf %27, %28 : vector<16x1xf32>
      %30 = vector.broadcast %29 : vector<16x1xf32> to vector<16x128xf32>
      %31 = arith.subf %23, %30 : vector<16x128xf32>
      %32 = arith.mulf %31, %31 : vector<16x128xf32>
      %cst_27 = arith.constant dense<0.000000e+00> : vector<16xf32>
      %33 = vector.multi_reduction <add>, %32, %cst_27 [1] : vector<16x128xf32> to vector<16xf32>
      %34 = vector.shape_cast %33 : vector<16xf32> to vector<16x1xf32>
      %cst_28 = arith.constant 1.280000e+02 : f32
      %35 = vector.broadcast %cst_28 : f32 to vector<16x1xf32>
      %36 = arith.divf %34, %35 : vector<16x1xf32>
      %37 = vector.broadcast %29 : vector<16x1xf32> to vector<16x128xf32>
      %38 = arith.subf %23, %37 : vector<16x128xf32>
      %cst_29 = arith.constant 9.99999974E-6 : f32
      %39 = vector.broadcast %cst_29 : f32 to vector<16x1xf32>
      %40 = arith.addf %36, %39 : vector<16x1xf32>
      %41 = math.rsqrt %40 : vector<16x1xf32>
      %42 = vector.broadcast %41 : vector<16x1xf32> to vector<16x128xf32>
      %43 = arith.mulf %38, %42 : vector<16x128xf32>
      %44 = vector.broadcast %24 : vector<1x128xf32> to vector<16x128xf32>
      %45 = arith.mulf %43, %44 : vector<16x128xf32>
      %46 = vector.broadcast %25 : vector<1x128xf32> to vector<16x128xf32>
      %47 = arith.addf %45, %46 : vector<16x128xf32>
      %c0_30 = arith.constant 0 : index
      %c0_31 = arith.constant 0 : index
      %48 = vector.load %arg10[%c0_30, %c0_31] : memref<16x128xf32, #tpu.memory_space<vmem>>, vector<16x128xf32>
      tpu.vector_store %arg10[%c0_30, %c0_31], %47 {strides = array<i32>} : memref<16x128xf32, #tpu.memory_space<vmem>>, vector<16x128xf32>,
    } else {
    }
    %c0 = arith.constant 0 : index
    %c0_1 = arith.constant 0 : index
    %3 = vector.load %arg10[%c0, %c0_1] : memref<16x128xf32, #tpu.memory_space<vmem>>, vector<16x128xf32>
    %4 = arith.truncf %3 : vector<16x128xf32> to vector<16x128xbf16>
    %c0_2 = arith.constant 0 : index
    %c0_3 = arith.constant 0 : index
    %5 = vector.load %arg5[%c0_2, %c0_3] : memref<128x512xbf16, #tpu.memory_space<vmem>>, vector<128x512xbf16>
    %cst = arith.constant dense<0.000000e+00> : vector<16x512xf32>
    %6 = tpu.matmul %4, %5, %cst {dimension_numbers = #tpu.dot_dimension_numbers<[1], [0], [0], [1], [0, 0, 1, 1], [], []>} : vector<16x128xbf16>, vector<128x512xbf16>, vector<16x512xf32> -> vector<16x512xf32>
    %c0_4 = arith.constant 0 : index
    %c0_5 = arith.constant 0 : index
    %7 = vector.load %arg6[%c0_4, %c0_5] : memref<1x512xf32, #tpu.memory_space<vmem>>, vector<1x512xf32>
    %8 = vector.broadcast %7 : vector<1x512xf32> to vector<16x512xf32>
    %9 = arith.addf %6, %8 : vector<16x512xf32>
    %cst_6 = arith.constant 0.000000e+00 : f32
    %10 = vector.broadcast %cst_6 : f32 to vector<16x512xf32>
    %11 = arith.maximumf %9, %10 : vector<16x512xf32>
    %c0_7 = arith.constant 0 : index
    %c0_8 = arith.constant 0 : index
    %12 = vector.load %arg9[%c0_7, %c0_8] : memref<16x128xf32, #tpu.memory_space<vmem>>, vector<16x128xf32>
    %13 = arith.truncf %11 : vector<16x512xf32> to vector<16x512xbf16>
    %c0_9 = arith.constant 0 : index
    %c0_10 = arith.constant 0 : index
    %14 = vector.load %arg7[%c0_9, %c0_10] : memref<512x128xbf16, #tpu.memory_space<vmem>>, vector<512x128xbf16>
    %cst_11 = arith.constant dense<0.000000e+00> : vector<16x128xf32>
    %15 = tpu.matmul %13, %14, %cst_11 {dimension_numbers = #tpu.dot_dimension_numbers<[1], [0], [0], [1], [0, 0, 1, 1], [], []>} : vector<16x512xbf16>, vector<512x128xbf16>, vector<16x128xf32> -> vector<16x128xf32>
    %16 = arith.addf %12, %15 : vector<16x128xf32>
    %c0_12 = arith.constant 0 : index
    %c0_13 = arith.constant 0 : index
    %17 = vector.load %arg9[%c0_12, %c0_13] : memref<16x128xf32, #tpu.memory_space<vmem>>, vector<16x128xf32>
    tpu.vector_store %arg9[%c0_12, %c0_13], %16 {strides = array<i32>} : memref<16x128xf32, #tpu.memory_space<vmem>>, vector<16x128xf32>,
    %c0_i32_14 = arith.constant 0 : i32
    %18 = arith.cmpi eq, %arg1, %c0_i32_14 : i32
    %19 = arith.extui %18 : i1 to i32
    %c0_i32_15 = arith.constant 0 : i32
    %20 = arith.cmpi ne, %19, %c0_i32_15 : i32
    scf.if %20 {
      %c0_16 = arith.constant 0 : index
      %c0_17 = arith.constant 0 : index
      %21 = vector.load %arg9[%c0_16, %c0_17] : memref<16x128xf32, #tpu.memory_space<vmem>>, vector<16x128xf32>
      %c0_18 = arith.constant 0 : index
      %c0_19 = arith.constant 0 : index
      %22 = vector.load %arg8[%c0_18, %c0_19] : memref<1x128xf32, #tpu.memory_space<vmem>>, vector<1x128xf32>
      %23 = vector.broadcast %22 : vector<1x128xf32> to vector<16x128xf32>
      %24 = arith.addf %21, %23 : vector<16x128xf32>
      %c0_20 = arith.constant 0 : index
      %c0_21 = arith.constant 0 : index
      %25 = vector.load %arg2[%c0_20, %c0_21] : memref<16x128xf32, #tpu.memory_space<vmem>>, vector<16x128xf32>
      %26 = arith.addf %24, %25 : vector<16x128xf32>
      %c0_22 = arith.constant 0 : index
      %c0_23 = arith.constant 0 : index
      %27 = vector.load %arg9[%c0_22, %c0_23] : memref<16x128xf32, #tpu.memory_space<vmem>>, vector<16x128xf32>
      tpu.vector_store %arg9[%c0_22, %c0_23], %26 {strides = array<i32>} : memref<16x128xf32, #tpu.memory_space<vmem>>, vector<16x128xf32>,
    } else {
    }
    return
  }
  func.func @transform_0(%arg0: i32, %arg1: i32) -> (i32, i32) {
    %c0_i32 = arith.constant 0 : i32
    %c0_i32_0 = arith.constant 0 : i32
    return %arg0, %c0_i32 : i32, i32
  }
  func.func @transform_1(%arg0: i32, %arg1: i32) -> (i32, i32) {
    %c0_i32 = arith.constant 0 : i32
    %c0_i32_0 = arith.constant 0 : i32
    %c0_i32_1 = arith.constant 0 : i32
    return %c0_i32, %c0_i32_0 : i32, i32
  }
  func.func @transform_2(%arg0: i32, %arg1: i32) -> (i32, i32) {
    %c0_i32 = arith.constant 0 : i32
    %c0_i32_0 = arith.constant 0 : i32
    %c0_i32_1 = arith.constant 0 : i32
    return %c0_i32, %c0_i32_0 : i32, i32
  }
  func.func @transform_3(%arg0: i32, %arg1: i32) -> (i32, i32) {
    %c0_i32 = arith.constant 0 : i32
    %c0_i32_0 = arith.constant 0 : i32
    return %c0_i32, %arg1 : i32, i32
  }
  func.func @transform_4(%arg0: i32, %arg1: i32) -> (i32, i32) {
    %c0_i32 = arith.constant 0 : i32
    %c0_i32_0 = arith.constant 0 : i32
    return %c0_i32, %arg1 : i32, i32
  }
  func.func @transform_5(%arg0: i32, %arg1: i32) -> (i32, i32) {
    %c0_i32 = arith.constant 0 : i32
    %c0_i32_0 = arith.constant 0 : i32
    return %arg1, %c0_i32 : i32, i32
  }
  func.func @transform_6(%arg0: i32, %arg1: i32) -> (i32, i32) {
    %c0_i32 = arith.constant 0 : i32
    %c0_i32_0 = arith.constant 0 : i32
    %c0_i32_1 = arith.constant 0 : i32
    return %c0_i32, %c0_i32_0 : i32, i32
  }
  func.func @transform_7(%arg0: i32, %arg1: i32) -> (i32, i32) {
    %c0_i32 = arith.constant 0 : i32
    %c0_i32_0 = arith.constant 0 : i32
    return %arg0, %c0_i32 : i32, i32
  }
}

module attributes {stable_mosaic.version = 11 : i64} {
  func.func @_linear_kernel(%arg0: i32, %arg1: i32, %arg2: i32, %arg3: memref<16x128xf32, #tpu.memory_space<vmem>>, %arg4: memref<128x128xbf16, #tpu.memory_space<vmem>>, %arg5: memref<1x128xf32, #tpu.memory_space<vmem>>, %arg6: memref<1x128xf32, #tpu.memory_space<vmem>>, %arg7: memref<1x128xf32, #tpu.memory_space<vmem>>, %arg8: memref<16x128xf32, #tpu.memory_space<vmem>>) attributes {dimension_semantics = [#tpu.dimension_semantics<parallel>, #tpu.dimension_semantics<parallel>, #tpu.dimension_semantics<arbitrary>], iteration_bounds = array<i64: 1, 1, 1>, scalar_prefetch = 0 : i64, scratch_operands = 0 : i64, tpu.core_type = #tpu.core_type<tc>, window_params = [{transform_indices = @transform_0, window_bounds = array<i64: 16, 128>}, {transform_indices = @transform_1, window_bounds = array<i64: 128, 128>}, {transform_indices = @transform_2, window_bounds = array<i64: 1, 128>}, {pipeline_mode = #tpu.pipeline_mode<synchronous>, transform_indices = @transform_3, window_bounds = array<i64: 1, 128>}, {pipeline_mode = #tpu.pipeline_mode<synchronous>, transform_indices = @transform_4, window_bounds = array<i64: 1, 128>}, {transform_indices = @transform_5, window_bounds = array<i64: 16, 128>}]} {
    %c0_i32 = arith.constant 0 : i32
    %0 = arith.cmpi eq, %arg2, %c0_i32 : i32
    %1 = arith.extui %0 : i1 to i32
    %c0_i32_0 = arith.constant 0 : i32
    %2 = arith.cmpi ne, %1, %c0_i32_0 : i32
    scf.if %2 {
      %cst_19 = arith.constant 0.000000e+00 : f32
      %37 = vector.broadcast %cst_19 : f32 to vector<16x128xf32>
      %c0_20 = arith.constant 0 : index
      %c0_21 = arith.constant 0 : index
      %38 = vector.load %arg8[%c0_20, %c0_21] : memref<16x128xf32, #tpu.memory_space<vmem>>, vector<16x128xf32>
      tpu.vector_store %arg8[%c0_20, %c0_21], %37 {strides = array<i32>} : memref<16x128xf32, #tpu.memory_space<vmem>>, vector<16x128xf32>,
    } else {
    }
    %c0 = arith.constant 0 : index
    %c0_1 = arith.constant 0 : index
    %3 = vector.load %arg3[%c0, %c0_1] : memref<16x128xf32, #tpu.memory_space<vmem>>, vector<16x128xf32>
    %c0_2 = arith.constant 0 : index
    %c0_3 = arith.constant 0 : index
    %4 = vector.load %arg6[%c0_2, %c0_3] : memref<1x128xf32, #tpu.memory_space<vmem>>, vector<1x128xf32>
    %c0_4 = arith.constant 0 : index
    %c0_5 = arith.constant 0 : index
    %5 = vector.load %arg7[%c0_4, %c0_5] : memref<1x128xf32, #tpu.memory_space<vmem>>, vector<1x128xf32>
    %cst = arith.constant dense<0.000000e+00> : vector<16xf32>
    %6 = vector.multi_reduction <add>, %3, %cst [1] : vector<16x128xf32> to vector<16xf32>
    %7 = vector.shape_cast %6 : vector<16xf32> to vector<16x1xf32>
    %cst_6 = arith.constant 1.280000e+02 : f32
    %8 = vector.broadcast %cst_6 : f32 to vector<16x1xf32>
    %9 = arith.divf %7, %8 : vector<16x1xf32>
    %10 = vector.broadcast %9 : vector<16x1xf32> to vector<16x128xf32>
    %11 = arith.subf %3, %10 : vector<16x128xf32>
    %12 = arith.mulf %11, %11 : vector<16x128xf32>
    %cst_7 = arith.constant dense<0.000000e+00> : vector<16xf32>
    %13 = vector.multi_reduction <add>, %12, %cst_7 [1] : vector<16x128xf32> to vector<16xf32>
    %14 = vector.shape_cast %13 : vector<16xf32> to vector<16x1xf32>
    %cst_8 = arith.constant 1.280000e+02 : f32
    %15 = vector.broadcast %cst_8 : f32 to vector<16x1xf32>
    %16 = arith.divf %14, %15 : vector<16x1xf32>
    %17 = vector.broadcast %9 : vector<16x1xf32> to vector<16x128xf32>
    %18 = arith.subf %3, %17 : vector<16x128xf32>
    %cst_9 = arith.constant 9.99999974E-6 : f32
    %19 = vector.broadcast %cst_9 : f32 to vector<16x1xf32>
    %20 = arith.addf %16, %19 : vector<16x1xf32>
    %21 = math.rsqrt %20 : vector<16x1xf32>
    %22 = vector.broadcast %21 : vector<16x1xf32> to vector<16x128xf32>
    %23 = arith.mulf %18, %22 : vector<16x128xf32>
    %24 = vector.broadcast %4 : vector<1x128xf32> to vector<16x128xf32>
    %25 = arith.mulf %23, %24 : vector<16x128xf32>
    %26 = vector.broadcast %5 : vector<1x128xf32> to vector<16x128xf32>
    %27 = arith.addf %25, %26 : vector<16x128xf32>
    %c0_10 = arith.constant 0 : index
    %c0_11 = arith.constant 0 : index
    %28 = vector.load %arg8[%c0_10, %c0_11] : memref<16x128xf32, #tpu.memory_space<vmem>>, vector<16x128xf32>
    %29 = arith.truncf %27 : vector<16x128xf32> to vector<16x128xbf16>
    %c0_12 = arith.constant 0 : index
    %c0_13 = arith.constant 0 : index
    %30 = vector.load %arg4[%c0_12, %c0_13] : memref<128x128xbf16, #tpu.memory_space<vmem>>, vector<128x128xbf16>
    %cst_14 = arith.constant dense<0.000000e+00> : vector<16x128xf32>
    %31 = tpu.matmul %29, %30, %cst_14 {dimension_numbers = #tpu.dot_dimension_numbers<[1], [0], [0], [1], [0, 0, 1, 1], [], []>} : vector<16x128xbf16>, vector<128x128xbf16>, vector<16x128xf32> -> vector<16x128xf32>
    %32 = arith.addf %28, %31 : vector<16x128xf32>
    %c0_15 = arith.constant 0 : index
    %c0_16 = arith.constant 0 : index
    %33 = vector.load %arg8[%c0_15, %c0_16] : memref<16x128xf32, #tpu.memory_space<vmem>>, vector<16x128xf32>
    tpu.vector_store %arg8[%c0_15, %c0_16], %32 {strides = array<i32>} : memref<16x128xf32, #tpu.memory_space<vmem>>, vector<16x128xf32>,
    %c0_i32_17 = arith.constant 0 : i32
    %34 = arith.cmpi eq, %arg2, %c0_i32_17 : i32
    %35 = arith.extui %34 : i1 to i32
    %c0_i32_18 = arith.constant 0 : i32
    %36 = arith.cmpi ne, %35, %c0_i32_18 : i32
    scf.if %36 {
      %c0_19 = arith.constant 0 : index
      %c0_20 = arith.constant 0 : index
      %37 = vector.load %arg8[%c0_19, %c0_20] : memref<16x128xf32, #tpu.memory_space<vmem>>, vector<16x128xf32>
      %c0_21 = arith.constant 0 : index
      %c0_22 = arith.constant 0 : index
      %38 = vector.load %arg5[%c0_21, %c0_22] : memref<1x128xf32, #tpu.memory_space<vmem>>, vector<1x128xf32>
      %39 = vector.broadcast %38 : vector<1x128xf32> to vector<16x128xf32>
      %40 = arith.addf %37, %39 : vector<16x128xf32>
      %c0_23 = arith.constant 0 : index
      %c0_24 = arith.constant 0 : index
      %41 = vector.load %arg8[%c0_23, %c0_24] : memref<16x128xf32, #tpu.memory_space<vmem>>, vector<16x128xf32>
      tpu.vector_store %arg8[%c0_23, %c0_24], %40 {strides = array<i32>} : memref<16x128xf32, #tpu.memory_space<vmem>>, vector<16x128xf32>,
    } else {
    }
    return
  }
  func.func @transform_0(%arg0: i32, %arg1: i32, %arg2: i32) -> (i32, i32) {
    %c0_i32 = arith.constant 0 : i32
    return %arg0, %arg2 : i32, i32
  }
  func.func @transform_1(%arg0: i32, %arg1: i32, %arg2: i32) -> (i32, i32) {
    %c0_i32 = arith.constant 0 : i32
    return %arg2, %arg1 : i32, i32
  }
  func.func @transform_2(%arg0: i32, %arg1: i32, %arg2: i32) -> (i32, i32) {
    %c0_i32 = arith.constant 0 : i32
    %c0_i32_0 = arith.constant 0 : i32
    return %c0_i32, %arg1 : i32, i32
  }
  func.func @transform_3(%arg0: i32, %arg1: i32, %arg2: i32) -> (i32, i32) {
    %c0_i32 = arith.constant 0 : i32
    %c0_i32_0 = arith.constant 0 : i32
    %c0_i32_1 = arith.constant 0 : i32
    return %c0_i32, %c0_i32_0 : i32, i32
  }
  func.func @transform_4(%arg0: i32, %arg1: i32, %arg2: i32) -> (i32, i32) {
    %c0_i32 = arith.constant 0 : i32
    %c0_i32_0 = arith.constant 0 : i32
    %c0_i32_1 = arith.constant 0 : i32
    return %c0_i32, %c0_i32_0 : i32, i32
  }
  func.func @transform_5(%arg0: i32, %arg1: i32, %arg2: i32) -> (i32, i32) {
    %c0_i32 = arith.constant 0 : i32
    return %arg0, %arg1 : i32, i32
  }
}

module attributes {stable_mosaic.version = 11 : i64} {
  func.func @_attn_kernel(%arg0: i32, %arg1: i32, %arg2: memref<1x8x128xf32, #tpu.memory_space<vmem>>, %arg3: memref<1x8x128xf32, #tpu.memory_space<vmem>>, %arg4: memref<1x8x128xf32, #tpu.memory_space<vmem>>, %arg5: memref<128x128xbf16, #tpu.memory_space<vmem>>, %arg6: memref<1x128xf32, #tpu.memory_space<vmem>>, %arg7: memref<1x8x128xf32, #tpu.memory_space<vmem>>, %arg8: memref<1x8x128xf32, #tpu.memory_space<vmem>>, %arg9: memref<1x4x8x8xf32, #tpu.memory_space<vmem>>) attributes {dimension_semantics = [#tpu.dimension_semantics<parallel>, #tpu.dimension_semantics<parallel>], iteration_bounds = array<i64: 2, 1>, scalar_prefetch = 0 : i64, scratch_operands = 0 : i64, tpu.core_type = #tpu.core_type<tc>, window_params = [{transform_indices = @transform_0, window_bounds = array<i64: 1, 8, 128>}, {transform_indices = @transform_1, window_bounds = array<i64: 1, 8, 128>}, {transform_indices = @transform_2, window_bounds = array<i64: 1, 8, 128>}, {pipeline_mode = #tpu.pipeline_mode<synchronous>, transform_indices = @transform_3, window_bounds = array<i64: 128, 128>}, {pipeline_mode = #tpu.pipeline_mode<synchronous>, transform_indices = @transform_4, window_bounds = array<i64: 1, 128>}, {transform_indices = @transform_5, window_bounds = array<i64: 1, 8, 128>}, {transform_indices = @transform_6, window_bounds = array<i64: 1, 8, 128>}, {transform_indices = @transform_7, window_bounds = array<i64: 1, 4, 8, 8>}]} {
    %c0 = arith.constant 0 : index
    %c0_0 = arith.constant 0 : index
    %c0_1 = arith.constant 0 : index
    %0 = vector.load %arg2[%c0, %c0_0, %c0_1] : memref<1x8x128xf32, #tpu.memory_space<vmem>>, vector<1x8x128xf32>
    %1 = vector.shape_cast %0 : vector<1x8x128xf32> to vector<8x128xf32>
    %2 = arith.truncf %1 : vector<8x128xf32> to vector<8x128xbf16>
    %3 = vector.shape_cast %2 : vector<8x128xbf16> to vector<8x4x32xbf16>
    %c0_2 = arith.constant 0 : index
    %c0_3 = arith.constant 0 : index
    %c0_4 = arith.constant 0 : index
    %4 = vector.load %arg3[%c0_2, %c0_3, %c0_4] : memref<1x8x128xf32, #tpu.memory_space<vmem>>, vector<1x8x128xf32>
    %5 = vector.shape_cast %4 : vector<1x8x128xf32> to vector<8x128xf32>
    %6 = arith.truncf %5 : vector<8x128xf32> to vector<8x128xbf16>
    %7 = vector.shape_cast %6 : vector<8x128xbf16> to vector<8x4x32xbf16>
    %c0_5 = arith.constant 0 : index
    %c0_6 = arith.constant 0 : index
    %c0_7 = arith.constant 0 : index
    %8 = vector.load %arg4[%c0_5, %c0_6, %c0_7] : memref<1x8x128xf32, #tpu.memory_space<vmem>>, vector<1x8x128xf32>
    %9 = vector.shape_cast %8 : vector<1x8x128xf32> to vector<8x128xf32>
    %10 = arith.truncf %9 : vector<8x128xf32> to vector<8x128xbf16>
    %11 = vector.shape_cast %10 : vector<8x128xbf16> to vector<8x4x32xbf16>
    %12 = tpu.transpose %3, [1, 0, 2] : vector<8x4x32xbf16> -> vector<4x8x32xbf16>
    %13 = tpu.transpose %7, [1, 0, 2] : vector<8x4x32xbf16> -> vector<4x8x32xbf16>
    %14 = tpu.transpose %11, [1, 0, 2] : vector<8x4x32xbf16> -> vector<4x8x32xbf16>
    "tpu.trace_start"() <{level = 10 : i32, message = "htd,hsd->hts"}> : () -> ()
    %cst = arith.constant dense<0.000000e+00> : vector<4x8x8xf32>
    %15 = tpu.matmul %12, %13, %cst {dimension_numbers = #tpu.dot_dimension_numbers<[2], [2], [1], [1], [0, 0, 0, 1, 1, 1], [0], [0]>} : vector<4x8x32xbf16>, vector<4x8x32xbf16>, vector<4x8x8xf32> -> vector<4x8x8xf32>
    "tpu.trace_stop"() : () -> ()
    %cst_8 = arith.constant dense<0xFF800000> : vector<4x8xf32>
    %16 = vector.multi_reduction <maximumf>, %15, %cst_8 [2] : vector<4x8x8xf32> to vector<4x8xf32>
    %17 = vector.shape_cast %16 : vector<4x8xf32> to vector<4x8x1xf32>
    %18 = vector.broadcast %17 : vector<4x8x1xf32> to vector<4x8x8xf32>
    %19 = arith.subf %15, %18 : vector<4x8x8xf32>
    %20 = math.exp %19 : vector<4x8x8xf32>
    %cst_9 = arith.constant dense<0.000000e+00> : vector<4x8xf32>
    %21 = vector.multi_reduction <add>, %20, %cst_9 [2] : vector<4x8x8xf32> to vector<4x8xf32>
    %22 = vector.shape_cast %21 : vector<4x8xf32> to vector<4x8x1xf32>
    %23 = vector.broadcast %22 : vector<4x8x1xf32> to vector<4x8x8xf32>
    %24 = arith.divf %20, %23 : vector<4x8x8xf32>
    %c0_10 = arith.constant 0 : index
    %c0_11 = arith.constant 0 : index
    %c0_12 = arith.constant 0 : index
    %c0_13 = arith.constant 0 : index
    %25 = vector.load %arg9[%c0_10, %c0_11, %c0_12, %c0_13] : memref<1x4x8x8xf32, #tpu.memory_space<vmem>>, vector<1x4x8x8xf32>
    %26 = vector.shape_cast %25 : vector<1x4x8x8xf32> to vector<4x8x8xf32>
    %27 = vector.shape_cast %24 : vector<4x8x8xf32> to vector<1x4x8x8xf32>
    tpu.vector_store %arg9[%c0_10, %c0_11, %c0_12, %c0_13], %27 {strides = array<i32>} : memref<1x4x8x8xf32, #tpu.memory_space<vmem>>, vector<1x4x8x8xf32>,
    %28 = arith.truncf %24 : vector<4x8x8xf32> to vector<4x8x8xbf16>
    "tpu.trace_start"() <{level = 10 : i32, message = "hts,hsd->htd"}> : () -> ()
    %cst_14 = arith.constant dense<0.000000e+00> : vector<4x8x32xf32>
    %29 = tpu.matmul %28, %14, %cst_14 {dimension_numbers = #tpu.dot_dimension_numbers<[2], [1], [1], [2], [0, 0, 0, 1, 1, 2], [0], [0]>} : vector<4x8x8xbf16>, vector<4x8x32xbf16>, vector<4x8x32xf32> -> vector<4x8x32xf32>
    "tpu.trace_stop"() : () -> ()
    %30 = arith.truncf %29 : vector<4x8x32xf32> to vector<4x8x32xbf16>
    %31 = tpu.transpose %30, [1, 0, 2] : vector<4x8x32xbf16> -> vector<8x4x32xbf16>
    %32 = vector.shape_cast %31 : vector<8x4x32xbf16> to vector<8x128xbf16>
    %c0_15 = arith.constant 0 : index
    %c0_16 = arith.constant 0 : index
    %33 = vector.load %arg5[%c0_15, %c0_16] : memref<128x128xbf16, #tpu.memory_space<vmem>>, vector<128x128xbf16>
    %cst_17 = arith.constant dense<0.000000e+00> : vector<8x128xf32>
    %34 = tpu.matmul %32, %33, %cst_17 {dimension_numbers = #tpu.dot_dimension_numbers<[1], [0], [0], [1], [0, 0, 1, 1], [], []>} : vector<8x128xbf16>, vector<128x128xbf16>, vector<8x128xf32> -> vector<8x128xf32>
    %c0_18 = arith.constant 0 : index
    %c0_19 = arith.constant 0 : index
    %35 = vector.load %arg6[%c0_18, %c0_19] : memref<1x128xf32, #tpu.memory_space<vmem>>, vector<1x128xf32>
    %36 = vector.broadcast %35 : vector<1x128xf32> to vector<8x128xf32>
    %37 = arith.addf %34, %36 : vector<8x128xf32>
    %c0_20 = arith.constant 0 : index
    %c0_21 = arith.constant 0 : index
    %c0_22 = arith.constant 0 : index
    %38 = vector.load %arg7[%c0_20, %c0_21, %c0_22] : memref<1x8x128xf32, #tpu.memory_space<vmem>>, vector<1x8x128xf32>
    %39 = vector.shape_cast %38 : vector<1x8x128xf32> to vector<8x128xf32>
    %40 = arith.addf %37, %39 : vector<8x128xf32>
    %c0_23 = arith.constant 0 : index
    %c0_24 = arith.constant 0 : index
    %c0_25 = arith.constant 0 : index
    %41 = vector.load %arg8[%c0_23, %c0_24, %c0_25] : memref<1x8x128xf32, #tpu.memory_space<vmem>>, vector<1x8x128xf32>
    %42 = vector.shape_cast %41 : vector<1x8x128xf32> to vector<8x128xf32>
    %43 = vector.shape_cast %40 : vector<8x128xf32> to vector<1x8x128xf32>
    tpu.vector_store %arg8[%c0_23, %c0_24, %c0_25], %43 {strides = array<i32>} : memref<1x8x128xf32, #tpu.memory_space<vmem>>, vector<1x8x128xf32>,
    return
  }
  func.func @transform_0(%arg0: i32, %arg1: i32) -> (i32, i32, i32) {
    %c0_i32 = arith.constant 0 : i32
    %c0_i32_0 = arith.constant 0 : i32
    return %arg0, %arg1, %c0_i32 : i32, i32, i32
  }
  func.func @transform_1(%arg0: i32, %arg1: i32) -> (i32, i32, i32) {
    %c0_i32 = arith.constant 0 : i32
    %c0_i32_0 = arith.constant 0 : i32
    %c0_i32_1 = arith.constant 0 : i32
    return %arg0, %c0_i32, %c0_i32_0 : i32, i32, i32
  }
  func.func @transform_2(%arg0: i32, %arg1: i32) -> (i32, i32, i32) {
    %c0_i32 = arith.constant 0 : i32
    %c1_i32 = arith.constant 1 : i32
    %c0_i32_0 = arith.constant 0 : i32
    return %arg0, %c0_i32, %c1_i32 : i32, i32, i32
  }
  func.func @transform_3(%arg0: i32, %arg1: i32) -> (i32, i32) {
    %c0_i32 = arith.constant 0 : i32
    %c0_i32_0 = arith.constant 0 : i32
    %c0_i32_1 = arith.constant 0 : i32
    return %c0_i32, %c0_i32_0 : i32, i32
  }
  func.func @transform_4(%arg0: i32, %arg1: i32) -> (i32, i32) {
    %c0_i32 = arith.constant 0 : i32
    %c0_i32_0 = arith.constant 0 : i32
    %c0_i32_1 = arith.constant 0 : i32
    return %c0_i32, %c0_i32_0 : i32, i32
  }
  func.func @transform_5(%arg0: i32, %arg1: i32) -> (i32, i32, i32) {
    %c0_i32 = arith.constant 0 : i32
    %c0_i32_0 = arith.constant 0 : i32
    return %arg0, %arg1, %c0_i32 : i32, i32, i32
  }
  func.func @transform_6(%arg0: i32, %arg1: i32) -> (i32, i32, i32) {
    %c0_i32 = arith.constant 0 : i32
    %c0_i32_0 = arith.constant 0 : i32
    return %arg0, %arg1, %c0_i32 : i32, i32, i32
  }
  func.func @transform_7(%arg0: i32, %arg1: i32) -> (i32, i32, i32, i32) {
    %c0_i32 = arith.constant 0 : i32
    %c0_i32_0 = arith.constant 0 : i32
    %c0_i32_1 = arith.constant 0 : i32
    return %arg0, %c0_i32, %arg1, %c0_i32_0 : i32, i32, i32, i32
  }
}

module attributes {stable_mosaic.version = 11 : i64} {
  func.func @_ff_kernel(%arg0: i32, %arg1: i32, %arg2: memref<16x128xf32, #tpu.memory_space<vmem>>, %arg3: memref<1x128xf32, #tpu.memory_space<vmem>>, %arg4: memref<1x128xf32, #tpu.memory_space<vmem>>, %arg5: memref<128x512xbf16, #tpu.memory_space<vmem>>, %arg6: memref<1x512xf32, #tpu.memory_space<vmem>>, %arg7: memref<512x128xbf16, #tpu.memory_space<vmem>>, %arg8: memref<1x128xf32, #tpu.memory_space<vmem>>, %arg9: memref<16x128xf32, #tpu.memory_space<vmem>>, %arg10: memref<16x128xf32, #tpu.memory_space<vmem>>) attributes {dimension_semantics = [#tpu.dimension_semantics<parallel>, #tpu.dimension_semantics<arbitrary>], iteration_bounds = array<i64: 1, 1>, scalar_prefetch = 0 : i64, scratch_operands = 1 : i64, tpu.core_type = #tpu.core_type<tc>, window_params = [{transform_indices = @transform_0, window_bounds = array<i64: 16, 128>}, {pipeline_mode = #tpu.pipeline_mode<synchronous>, transform_indices = @transform_1, window_bounds = array<i64: 1, 128>}, {pipeline_mode = #tpu.pipeline_mode<synchronous>, transform_indices = @transform_2, window_bounds = array<i64: 1, 128>}, {transform_indices = @transform_3, window_bounds = array<i64: 128, 512>}, {transform_indices = @transform_4, window_bounds = array<i64: 1, 512>}, {transform_indices = @transform_5, window_bounds = array<i64: 512, 128>}, {pipeline_mode = #tpu.pipeline_mode<synchronous>, transform_indices = @transform_6, window_bounds = array<i64: 1, 128>}, {transform_indices = @transform_7, window_bounds = array<i64: 16, 128>}]} {
    %c0_i32 = arith.constant 0 : i32
    %0 = arith.cmpi eq, %arg1, %c0_i32 : i32
    %1 = arith.extui %0 : i1 to i32
    %c0_i32_0 = arith.constant 0 : i32
    %2 = arith.cmpi ne, %1, %c0_i32_0 : i32
    scf.if %2 {
      %cst_16 = arith.constant 0.000000e+00 : f32
      %21 = vector.broadcast %cst_16 : f32 to vector<16x128xf32>
      %c0_17 = arith.constant 0 : index
      %c0_18 = arith.constant 0 : index
      %22 = vector.load %arg9[%c0_17, %c0_18] : memref<16x128xf32, #tpu.memory_space<vmem>>, vector<16x128xf32>
      tpu.vector_store %arg9[%c0_17, %c0_18], %21 {strides = array<i32>} : memref<16x128xf32, #tpu.memory_space<vmem>>, vector<16x128xf32>,
      %c0_19 = arith.constant 0 : index
      %c0_20 = arith.constant 0 : index
      %23 = vector.load %arg2[%c0_19, %c0_20] : memref<16x128xf32, #tpu.memory_space<vmem>>, vector<16x128xf32>
      %c0_21 = arith.constant 0 : index
      %c0_22 = arith.constant 0 : index
      %24 = vector.load %arg3[%c0_21, %c0_22] : memref<1x128xf32, #tpu.memory_space<vmem>>, vector<1x128xf32>
      %c0_23 = arith.constant 0 : index
      %c0_24 = arith.constant 0 : index
      %25 = vector.load %arg4[%c0_23, %c0_24] : memref<1x128xf32, #tpu.memory_space<vmem>>, vector<1x128xf32>
      %cst_25 = arith.constant dense<0.000000e+00> : vector<16xf32>
      %26 = vector.multi_reduction <add>, %23, %cst_25 [1] : vector<16x128xf32> to vector<16xf32>
      %27 = vector.shape_cast %26 : vector<16xf32> to vector<16x1xf32>
      %cst_26 = arith.constant 1.280000e+02 : f32
      %28 = vector.broadcast %cst_26 : f32 to vector<16x1xf32>
      %29 = arith.divf %27, %28 : vector<16x1xf32>
      %30 = vector.broadcast %29 : vector<16x1xf32> to vector<16x128xf32>
      %31 = arith.subf %23, %30 : vector<16x128xf32>
      %32 = arith.mulf %31, %31 : vector<16x128xf32>
      %cst_27 = arith.constant dense<0.000000e+00> : vector<16xf32>
      %33 = vector.multi_reduction <add>, %32, %cst_27 [1] : vector<16x128xf32> to vector<16xf32>
      %34 = vector.shape_cast %33 : vector<16xf32> to vector<16x1xf32>
      %cst_28 = arith.constant 1.280000e+02 : f32
      %35 = vector.broadcast %cst_28 : f32 to vector<16x1xf32>
      %36 = arith.divf %34, %35 : vector<16x1xf32>
      %37 = vector.broadcast %29 : vector<16x1xf32> to vector<16x128xf32>
      %38 = arith.subf %23, %37 : vector<16x128xf32>
      %cst_29 = arith.constant 9.99999974E-6 : f32
      %39 = vector.broadcast %cst_29 : f32 to vector<16x1xf32>
      %40 = arith.addf %36, %39 : vector<16x1xf32>
      %41 = math.rsqrt %40 : vector<16x1xf32>
      %42 = vector.broadcast %41 : vector<16x1xf32> to vector<16x128xf32>
      %43 = arith.mulf %38, %42 : vector<16x128xf32>
      %44 = vector.broadcast %24 : vector<1x128xf32> to vector<16x128xf32>
      %45 = arith.mulf %43, %44 : vector<16x128xf32>
      %46 = vector.broadcast %25 : vector<1x128xf32> to vector<16x128xf32>
      %47 = arith.addf %45, %46 : vector<16x128xf32>
      %c0_30 = arith.constant 0 : index
      %c0_31 = arith.constant 0 : index
      %48 = vector.load %arg10[%c0_30, %c0_31] : memref<16x128xf32, #tpu.memory_space<vmem>>, vector<16x128xf32>
      tpu.vector_store %arg10[%c0_30, %c0_31], %47 {strides = array<i32>} : memref<16x128xf32, #tpu.memory_space<vmem>>, vector<16x128xf32>,
    } else {
    }
    %c0 = arith.constant 0 : index
    %c0_1 = arith.constant 0 : index
    %3 = vector.load %arg10[%c0, %c0_1] : memref<16x128xf32, #tpu.memory_space<vmem>>, vector<16x128xf32>
    %4 = arith.truncf %3 : vector<16x128xf32> to vector<16x128xbf16>
    %c0_2 = arith.constant 0 : index
    %c0_3 = arith.constant 0 : index
    %5 = vector.load %arg5[%c0_2, %c0_3] : memref<128x512xbf16, #tpu.memory_space<vmem>>, vector<128x512xbf16>
    %cst = arith.constant dense<0.000000e+00> : vector<16x512xf32>
    %6 = tpu.matmul %4, %5, %cst {dimension_numbers = #tpu.dot_dimension_numbers<[1], [0], [0], [1], [0, 0, 1, 1], [], []>} : vector<16x128xbf16>, vector<128x512xbf16>, vector<16x512xf32> -> vector<16x512xf32>
    %c0_4 = arith.constant 0 : index
    %c0_5 = arith.constant 0 : index
    %7 = vector.load %arg6[%c0_4, %c0_5] : memref<1x512xf32, #tpu.memory_space<vmem>>, vector<1x512xf32>
    %8 = vector.broadcast %7 : vector<1x512xf32> to vector<16x512xf32>
    %9 = arith.addf %6, %8 : vector<16x512xf32>
    %cst_6 = arith.constant 0.000000e+00 : f32
    %10 = vector.broadcast %cst_6 : f32 to vector<16x512xf32>
    %11 = arith.maximumf %9, %10 : vector<16x512xf32>
    %c0_7 = arith.constant 0 : index
    %c0_8 = arith.constant 0 : index
    %12 = vector.load %arg9[%c0_7, %c0_8] : memref<16x128xf32, #tpu.memory_space<vmem>>, vector<16x128xf32>
    %13 = arith.truncf %11 : vector<16x512xf32> to vector<16x512xbf16>
    %c0_9 = arith.constant 0 : index
    %c0_10 = arith.constant 0 : index
    %14 = vector.load %arg7[%c0_9, %c0_10] : memref<512x128xbf16, #tpu.memory_space<vmem>>, vector<512x128xbf16>
    %cst_11 = arith.constant dense<0.000000e+00> : vector<16x128xf32>
    %15 = tpu.matmul %13, %14, %cst_11 {dimension_numbers = #tpu.dot_dimension_numbers<[1], [0], [0], [1], [0, 0, 1, 1], [], []>} : vector<16x512xbf16>, vector<512x128xbf16>, vector<16x128xf32> -> vector<16x128xf32>
    %16 = arith.addf %12, %15 : vector<16x128xf32>
    %c0_12 = arith.constant 0 : index
    %c0_13 = arith.constant 0 : index
    %17 = vector.load %arg9[%c0_12, %c0_13] : memref<16x128xf32, #tpu.memory_space<vmem>>, vector<16x128xf32>
    tpu.vector_store %arg9[%c0_12, %c0_13], %16 {strides = array<i32>} : memref<16x128xf32, #tpu.memory_space<vmem>>, vector<16x128xf32>,
    %c0_i32_14 = arith.constant 0 : i32
    %18 = arith.cmpi eq, %arg1, %c0_i32_14 : i32
    %19 = arith.extui %18 : i1 to i32
    %c0_i32_15 = arith.constant 0 : i32
    %20 = arith.cmpi ne, %19, %c0_i32_15 : i32
    scf.if %20 {
      %c0_16 = arith.constant 0 : index
      %c0_17 = arith.constant 0 : index
      %21 = vector.load %arg9[%c0_16, %c0_17] : memref<16x128xf32, #tpu.memory_space<vmem>>, vector<16x128xf32>
      %c0_18 = arith.constant 0 : index
      %c0_19 = arith.constant 0 : index
      %22 = vector.load %arg8[%c0_18, %c0_19] : memref<1x128xf32, #tpu.memory_space<vmem>>, vector<1x128xf32>
      %23 = vector.broadcast %22 : vector<1x128xf32> to vector<16x128xf32>
      %24 = arith.addf %21, %23 : vector<16x128xf32>
      %c0_20 = arith.constant 0 : index
      %c0_21 = arith.constant 0 : index
      %25 = vector.load %arg2[%c0_20, %c0_21] : memref<16x128xf32, #tpu.memory_space<vmem>>, vector<16x128xf32>
      %26 = arith.addf %24, %25 : vector<16x128xf32>
      %c0_22 = arith.constant 0 : index
      %c0_23 = arith.constant 0 : index
      %27 = vector.load %arg9[%c0_22, %c0_23] : memref<16x128xf32, #tpu.memory_space<vmem>>, vector<16x128xf32>
      tpu.vector_store %arg9[%c0_22, %c0_23], %26 {strides = array<i32>} : memref<16x128xf32, #tpu.memory_space<vmem>>, vector<16x128xf32>,
    } else {
    }
    return
  }
  func.func @transform_0(%arg0: i32, %arg1: i32) -> (i32, i32) {
    %c0_i32 = arith.constant 0 : i32
    %c0_i32_0 = arith.constant 0 : i32
    return %arg0, %c0_i32 : i32, i32
  }
  func.func @transform_1(%arg0: i32, %arg1: i32) -> (i32, i32) {
    %c0_i32 = arith.constant 0 : i32
    %c0_i32_0 = arith.constant 0 : i32
    %c0_i32_1 = arith.constant 0 : i32
    return %c0_i32, %c0_i32_0 : i32, i32
  }
  func.func @transform_2(%arg0: i32, %arg1: i32) -> (i32, i32) {
    %c0_i32 = arith.constant 0 : i32
    %c0_i32_0 = arith.constant 0 : i32
    %c0_i32_1 = arith.constant 0 : i32
    return %c0_i32, %c0_i32_0 : i32, i32
  }
  func.func @transform_3(%arg0: i32, %arg1: i32) -> (i32, i32) {
    %c0_i32 = arith.constant 0 : i32
    %c0_i32_0 = arith.constant 0 : i32
    return %c0_i32, %arg1 : i32, i32
  }
  func.func @transform_4(%arg0: i32, %arg1: i32) -> (i32, i32) {
    %c0_i32 = arith.constant 0 : i32
    %c0_i32_0 = arith.constant 0 : i32
    return %c0_i32, %arg1 : i32, i32
  }
  func.func @transform_5(%arg0: i32, %arg1: i32) -> (i32, i32) {
    %c0_i32 = arith.constant 0 : i32
    %c0_i32_0 = arith.constant 0 : i32
    return %arg1, %c0_i32 : i32, i32
  }
  func.func @transform_6(%arg0: i32, %arg1: i32) -> (i32, i32) {
    %c0_i32 = arith.constant 0 : i32
    %c0_i32_0 = arith.constant 0 : i32
    %c0_i32_1 = arith.constant 0 : i32
    return %c0_i32, %c0_i32_0 : i32, i32
  }
  func.func @transform_7(%arg0: i32, %arg1: i32) -> (i32, i32) {
    %c0_i32 = arith.constant 0 : i32
    %c0_i32_0 = arith.constant 0 : i32
    return %arg0, %c0_i32 : i32, i32
  }
}

</mosaic_0001>

<bundles_post_ra>
// kernel: layer_forward.7
= control target key start
LH: loop header
LB: loop body
LE: loop exit
PB: predicated region body
PF: predicated region fallthrough
CT: control target
= control target key end

     0   :  { %10 = vsyncpa [#allocation4], 0  ;;  %s1203_s0 = inlined_call_operand.vmem [shape: f32[16,128], index: 0, kind: input, shape index: {}]   ;;  %s1204_s1 = inlined_call_operand.vmem [shape: bf16[128,384], index: 1, kind: input, shape index: {}]   ;;  %s1205_s2 = inlined_call_operand.vmem [shape: f32[1,384], index: 2, kind: input, shape index: {}]   ;;  %s1206_s3 = inlined_call_operand.hbm [shape: f32[1,128], index: 3, kind: input, shape index: {}]   ;;  %s1207_s4 = inlined_call_operand.hbm [shape: f32[1,128], index: 4, kind: input, shape index: {}]   ;;  %s1208_s5 = inlined_call_operand.vmem [shape: f32[16,384], index: 5, kind: output, shape index: {}]  }
   0x1   :  { %11 = vsyncpa [#allocation6], 0  ;;  %s1038_s18 = smov 0   ;;  %s1040_s19 = smov 0  }
   0x2   :  { %s1042_s20 = smov 0   ;;  %s1044_s21 = smov 0  }
   0x3   :  { %s1046_s22 = smov 0  }
   0x4 LB: > { %s771_s23 = sadd.s32 4294967295, %s1002_s22   ;;  %s32_s24 = sadd.s32 1, %s998_s21  ;;  %s1002_s22 = sphi %s1046_s22, %s17_s22   ;;  %s998_s21 = sphi %s1044_s21, %s1223_s21   ;;  %s994_s20 = sphi %s1042_s20, %s1222_s20   ;;  %s990_s19 = sphi %s1040_s19, %s1221_s19   ;;  %s986_s18 = sphi %s1038_s18, %s1220_s18  }
   0x5   : > { %p34_p0 = scmp.ge.s32.totalorder %s32_s24, 3  ;;  %s73_s25 = sadd.s32 1, %s990_s19 }
   0x6   : > { %p80_p1 = scmp.ne.s32.totalorder %s990_s19, %s986_s18  ;;  %p81_p2 = scmp.eq.s32.totalorder %s1002_s22, 0 }
   0x7   : > { %s1225_s24 = smov (%p34_p0, %s32_s24), 0  ;;  %p180_p4 = scmp.eq.s32.totalorder %s771_s23, 2 }
   0x8   : > { %p1071_p3 = por %p81_p2, %p80_p1  ;;  %s69_s27 = ssub.s32 %s998_s21, %s1225_s24 }
   0x9   : > { %p773_p5 = scmp.ge.s32.totalorder %s1002_s22, 1  ;;  %p71_p6 = scmp.eq.s32.totalorder %s69_s27, 0 }
   0xa   : > { %p1078_p7 = por %p180_p4, %p80_p1  ;;  %p193_p8 = scmp.lt.s32.totalorder %s1002_s22, 4 }
   0xb   : > { %s1084_s29 = scalar_select %p71_p6, %s990_s19, %s73_s25  }
   0xc   : > { %s1213_s28 = scalar_select %p1078_p7, 1, 0 }
   0xd   : > { %p1086_p9 = pnand %p773_p5, %p193_p8  ;;  %p1090_p10 = scmp.eq.s32.totalorder %s771_s23, 0 }
   0xe   : > { %s1004_s7 = smov [#allocation3]   ;;  %s1005_s9 = smov [#allocation5]  }
   0xf   : > { %s1214_s30 = scalar_select %p1086_p9, 1, 0 }
  0x10   : > { %s1215_s6 = scalar_select %p1090_p10, 1, 0 }
  0x11   : > { %p837_p11 = pneg %p1086_p9  ;;  %s218_s8 = sshll.u32 %s1004_s7, 4  ;;  %s219_s8 = int_to_ptr.vmem [resolvable:$true] %s218_s8 }
  0x12   : > { %s229_s10 = sshll.u32 %s1005_s9, 4  ;;  %s915_s12 = scalar_lea.vmem %s219_s8, 16  ;;  %s230_s10 = int_to_ptr.vmem [resolvable:$true] %s229_s10 }
  0x13   : > { %p1098_p12 = pnand %p1090_p10, %p837_p11  ;;  %p916_p0 = scmp.ne.s32.totalorder %s219_s8, %s915_s12 }
  0x14   : > { %s922_s13 = scalar_lea.vmem %s219_s8, 32  ;;  %p923_p4 = scmp.lt.s32.totalorder %s219_s8, %s219_s8 }
  0x15   : > { %p906_p13 = pneg %p1098_p12  ;;  %p924_p5 = scmp.lt.s32.totalorder %s922_s13, %s915_s12 }
  0x17   : > { %p918_p1 = pnand %p916_p0, %p906_p13  ;;  %p925_p6 = por %p924_p5, %p923_p4 }
  0x19   : > { %p919_p2 = pneg %p918_p1 }
  0x1b   : > { %p926_p8 = pnand %p925_p6, %p919_p2 }
  0x1d   : > { %929 = shalt.err (!%p926_p8)
}
  0x1e   : > { %840 = dma.hbm_to_vmem [thread:$0]  (!%p1098_p12), %s1206_s3, 16, %s219_s8, [#allocation4]  }
  0x1f   : > { %s941_s16 = scalar_lea.vmem %s230_s10, 16  ;;  %s948_s17 = scalar_lea.vmem %s230_s10, 32 }
  0x20   : > { %p942_p11 = scmp.ne.s32.totalorder %s230_s10, %s941_s16  ;;  %p949_p1 = scmp.lt.s32.totalorder %s230_s10, %s230_s10 }
  0x21   : > { %p950_p10 = scmp.lt.s32.totalorder %s948_s17, %s941_s16 }
  0x22   : > { %p944_p7 = pnand %p942_p11, %p906_p13 }
  0x23   : > { %p951_p9 = por %p950_p10, %p949_p1 }
  0x24   : > { %p945_p0 = pneg %p944_p7 }
  0x26   : > { %p952_p4 = pnand %p951_p9, %p945_p0 }
  0x28   : > { %955 = shalt.err (!%p952_p4)
}
  0x29   : > { %843 = dma.hbm_to_vmem [thread:$0]  (!%p1098_p12), %s1207_s4, 16, %s230_s10, [#allocation6]  }
  0x2a   : > { %p777_p2 = scmp.ge.s32.totalorder %s1002_s22, 3 }
  0x2c   : > { %236 = sbr.rel (%p777_p2) target bundleno = 63 (0x3f), region = 28 }
  0x31   : > { %239 = sbr.rel (!%p1071_p3) target bundleno = 63 (0x3f), region = 32  ;;  %s241_s27 = sand.u32 (%p1071_p3), 1, %s990_s19  }
  0x32   : > { %s779_s7 = sshll.u32 (%p1071_p3), %s998_s21, 2  ;;  %s778_s8 = sshll.u32 (%p1071_p3), %s241_s27, 6 }
  0x33   : > { %s1128_s13 = scalar_lea.vmem (%p1071_p3), %s1204_s1, %s779_s7  ;;  %s243_s26 = scalar_lea.vmem (%p1071_p3), [#allocation2], %s778_s8 }
  0x34   : > { %v265_v0 = vld [vmem:[%s1128_s13] sm:$0xf] (%p1071_p3)  ;;  %v267_v1 = vld [vmem:[%s1128_s13 + $0xc] sm:$0xf] (%p1071_p3)  ;;  %v269_v2 = vld [vmem:[%s1128_s13 + $0x18] sm:$0xf] (%p1071_p3) }
  0x35   : > { %266 = vst [vmem:[%s243_s26] sm:$0xf] (%p1071_p3), %v265_v0  ;;  %268 = vst [vmem:[%s243_s26 + $0x4] sm:$0xf] (%p1071_p3), %v267_v1  ;;  %v271_v3 = vld [vmem:[%s1128_s13 + $0x24] sm:$0xf] (%p1071_p3) }
  0x36   : > { %v273_v4 = vld [vmem:[%s1128_s13 + $0x30] sm:$0xf]  ;;  %270 = vst [vmem:[%s243_s26 + $0x8] sm:$0xf] %v269_v2  ;;  %272 = vst [vmem:[%s243_s26 + $0xc] sm:$0xf] %v271_v3 }
  0x37   : > { %274 = vst [vmem:[%s243_s26 + $0x10] sm:$0xf] %v273_v4  ;;  %v275_v5 = vld [vmem:[%s1128_s13 + $0x3c] sm:$0xf]  ;;  %v277_v6 = vld [vmem:[%s1128_s13 + $0x48] sm:$0xf] }
  0x38   : > { %v279_v7 = vld [vmem:[%s1128_s13 + $0x54] sm:$0xf]  ;;  %276 = vst [vmem:[%s243_s26 + $0x14] sm:$0xf] %v275_v5  ;;  %278 = vst [vmem:[%s243_s26 + $0x18] sm:$0xf] %v277_v6 }
  0x39   : > { %280 = vst [vmem:[%s243_s26 + $0x1c] sm:$0xf] %v279_v7  ;;  %v281_v8 = vld [vmem:[%s1128_s13 + $0x60] sm:$0xf]  ;;  %v283_v9 = vld [vmem:[%s1128_s13 + $0x6c] sm:$0xf] }
  0x3a   : > { %v285_v10 = vld [vmem:[%s1128_s13 + $0x78] sm:$0xf]  ;;  %282 = vst [vmem:[%s243_s26 + $0x20] sm:$0xf] %v281_v8  ;;  %284 = vst [vmem:[%s243_s26 + $0x24] sm:$0xf] %v283_v9 }
  0x3b   : > { %286 = vst [vmem:[%s243_s26 + $0x28] sm:$0xf] %v285_v10  ;;  %v287_v11 = vld [vmem:[%s1128_s13 + $0x84] sm:$0xf]  ;;  %v289_v12 = vld [vmem:[%s1128_s13 + $0x90] sm:$0xf] }
  0x3c   : > { %v291_v13 = vld [vmem:[%s1128_s13 + $0x9c] sm:$0xf]  ;;  %288 = vst [vmem:[%s243_s26 + $0x2c] sm:$0xf] %v287_v11  ;;  %290 = vst [vmem:[%s243_s26 + $0x30] sm:$0xf] %v289_v12 }
  0x3d   : > { %292 = vst [vmem:[%s243_s26 + $0x34] sm:$0xf] %v291_v13  ;;  %v293_v14 = vld [vmem:[%s1128_s13 + $0xa8] sm:$0xf]  ;;  %v295_v15 = vld [vmem:[%s1128_s13 + $0xb4] sm:$0xf] }
  0x3e   : > { %294 = vst [vmem:[%s243_s26 + $0x38] sm:$0xf] %v293_v14  ;;  %296 = vst [vmem:[%s243_s26 + $0x3c] sm:$0xf] %v295_v15 }
  0x3f PF: > { %p1217_p3 = scmp.ne.s32.totalorder %s1214_s30, 0 }
  0x40   : > { %s364_s10 = sand.u32 (!%p1217_p3), 1, %s986_s18   ;;  %p1218_p7 = scmp.ne.s32.totalorder (!%p1217_p3), %s1215_s6, 0 }
  0x41   : > { %361 = sbr.rel (%p1217_p3) target bundleno = 594 (0x252), region = 77  ;;  %s781_s11 = sshll.u32 (!%p1217_p3), %s364_s10, 6 }
  0x42   : > { %s1151_s14 = scalar_lea.vmem (!%p1217_p3), [#allocation2], %s781_s11 }
  0x46   : > { %977 = dma.done.wait (%p1218_p7), [#allocation4], 16  }
  0x47   : > { %979 = vsyncadd (%p1218_p7), [#allocation4], 4294967280 }
  0x48   : > { %981 = dma.done.wait (%p1218_p7), [#allocation6], 16  }
  0x49   : > { %983 = vsyncadd (%p1218_p7), [#allocation6], 4294967280  ;;  %v430_v16 = vld [vmem:[%s1203_s0] sm:$0xff]  ;;  %v431_v17 = vld [vmem:[%s1203_s0 + $0x8] sm:$0xff]  ;;  %v1006_v19 = vmov 0.0   ;;  %vm1007_vm0 = vmmov 0  }
  0x4a   : > { %434 = vadd.xlane.f32.xlu0 %v430_v16  ;;  %v892_v18 = vld [vmem:[%s1151_s14 + $0x38] sm:$0xff]   ;;  %809 = vmatprep.subr.bf16.mxu0 %v1006_v19  ;;  %v893_v28 = vld [vmem:[%s1151_s14 + $0x30] sm:$0xff]   ;;  %v894_v29 = vld [vmem:[%s1151_s14 + $0x28] sm:$0xff]   ;;  %p419_p9 = scmp.lt.s32.totalorder %s994_s20, 2  ;;  %s784_s7 = sshll.u32 %s364_s10, 4 }
  0x4b   : > { %810 = vmatpush3.bf16.msra.mxu0 %v892_v18  ;;  %v895_v30 = vld [vmem:[%s1151_s14 + $0x20] sm:$0xff]   ;;  %825 = vmatprep.mubr.msk.bf16.mxu0 %vm1007_vm0, %v1006_v19  ;;  %v896_v31 = vld [vmem:[%s1151_s14 + $0x18] sm:$0xff]   ;;  %v897_v32 = vld [vmem:[%s1151_s14 + $0x10] sm:$0xff]   ;;  %s408_s8 = scalar_lea.vmem [#allocation7], %s784_s7  ;;  %p1219_p10 = scmp.ne.s32.totalorder %s1213_s28, 0 }
  0x4c   : > { %811 = vmatprep.subr.bf16.mxu0 %v1006_v19  ;;  %v898_v33 = vld [vmem:[%s1151_s14 + $0x8] sm:$0xff]   ;;  %v899_v34 = vld [vmem:[%s1151_s14] sm:$0xff]   ;;  %s420_s6 = scalar_select %p419_p9, %s994_s20, 2 }
  0x4d   : > { %v785_v43 = vld [vmem:[#allocation3] ss:$0 sm:$0xff]  ;;  %v786_v47 = vld [vmem:[#allocation5] ss:$0 sm:$0xff]  ;;  %s797_s9 = sshll.u32 (%p1219_p10), %s994_s20, 3 }
  0x4e   : > { %436 = vadd.xlane.f32.xlu0 %v431_v17  ;;  %s421_s27 = scalar_lea.vmem %s1205_s2, %s420_s6  ;;  %s612_s13 = scalar_lea.vmem (%p1219_p10), %s1208_s5, %s797_s9 }
  0x4f   : > { %812 = vmatpush3.bf16.msra.mxu0 %v893_v28  ;;  %v795_v53 = vld [vmem:[%s421_s27] ss:$0 sm:$0xff] }
  0x50   : > { %813 = vmatprep.subr.bf16.mxu0 %v1006_v19 }
  0x53   : > { %814 = vmatpush3.bf16.msra.mxu0 %v894_v29 }
  0x54   : > { %815 = vmatprep.subr.bf16.mxu0 %v1006_v19 }
  0x57   : > { %816 = vmatpush3.bf16.msra.mxu0 %v895_v30 }
  0x58   : > { %817 = vmatprep.subr.bf16.mxu0 %v1006_v19 }
  0x5b   : > { %818 = vmatpush3.bf16.msra.mxu0 %v896_v31 }
  0x5c   : > { %819 = vmatprep.subr.bf16.mxu0 %v1006_v19 }
  0x5f   : > { %820 = vmatpush3.bf16.msra.mxu0 %v897_v32 }
  0x60   : > { %821 = vmatprep.subr.bf16.mxu0 %v1006_v19 }
  0x63   : > { %822 = vmatpush3.bf16.msra.mxu0 %v898_v33 }
  0x64   : > { %823 = vmatprep.subr.bf16.mxu0 %v1006_v19 }
  0x67   : > { %824 = vmatpush3.bf16.msra.mxu0 %v899_v34 }
  0xd3   : > { %v435_v20 = vpop.xlane.xlu0 %434 }
  0xd4   : > { %v439_v21 = vmul.f32 0.0078125, %v435_v20 }
  0xd6   : > { %v441_v22 = vsub.f32 %v430_v16, %v439_v21 }
  0xd7   : > { %v437_v23 = vpop.xlane.xlu0 %436 }
  0xd8   : > { %v440_v24 = vmul.f32 0.0078125, %v437_v23  ;;  %v443_v25 = vmul.f32 %v441_v22, %v441_v22 }
  0xda   : > { %v442_v26 = vsub.f32 %v431_v17, %v440_v24  ;;  %445 = vadd.xlane.f32.xlu1 %v443_v25 }
  0xdc   : > { %v444_v27 = vmul.f32 %v442_v26, %v442_v26 }
  0xde   : > { %447 = vadd.xlane.f32.xlu1 %v444_v27 }
 0x163   : > { %v446_v35 = vpop.xlane.xlu1 %445 }
 0x164   : > { %v449_v36 = vmul.f32 0.0078125, %v446_v35 }
 0x166   : > { %v451_v37 = vadd.f32 1e-05, %v449_v36 }
 0x167   : > { %v448_v38 = vpop.xlane.xlu1 %447 }
 0x168   : > { %900 = vrsqrt.f32 %v451_v37  ;;  %v450_v39 = vmul.f32 0.0078125, %v448_v38 }
 0x16a   : > { %v452_v40 = vadd.f32 1e-05, %v450_v39 }
 0x16c   : > { %902 = vrsqrt.f32 %v452_v40 }
 0x175   : > { %v901_v41 = vpop.eup %900 }
 0x176   : > { %v455_v42 = vmul.f32 %v901_v41, %v441_v22 }
 0x178   : > { %v463_v46 = vmul.f32 %v785_v43, %v455_v42 }
 0x179   : > { %v903_v44 = vpop.eup %902 }
 0x17a   : > { %v456_v45 = vmul.f32 %v903_v44, %v442_v26  ;;  %v471_v49 = vadd.f32 %v786_v47, %v463_v46 }
 0x17c   : > { %v464_v48 = vmul.f32 %v785_v43, %v456_v45 }
 0x17e   : > { %v472_v50 = vadd.f32 %v786_v47, %v464_v48 }
 0x180   : > { %v475_v51 = vpack.c.bf16 %v472_v50, %v471_v49 }
 0x182   : > { %826 = vmatmul.mubr.bf16.vlgmr.msra.gmra.mxu0 %v475_v51 }
 0x242   : > { %v574_v52 = vpop.f32.mrf.mxu0 }
 0x243   : > { %v597_v55 = vadd.f32 %v795_v53, %v574_v52 }
 0x244   : > { %v827_v54 = vpop.f32.mrf.mxu0 }
 0x245   : > { %599 = vst [vmem:[%s408_s8] sm:$0xff] %v597_v55  ;;  %607 = sbr.rel (!%p1219_p10) target bundleno = 594 (0x252), region = 101 }
 0x246   : > { %v577_v56 = vpop.f32.mrf.mxu0 }
 0x247   : > { %v598_v58 = vadd.f32 %v795_v53, %v577_v56 }
 0x248   : > { %v828_v57 = vpop.f32.mrf.mxu0 }
 0x249   : > { %600 = vst [vmem:[%s408_s8 + $0x8] sm:$0xff] %v598_v58 }
 0x24c   : > { %v643_v59 = vld [vmem:[%s408_s8] sm:$0xff] }
 0x24d   : > { %644 = vst [vmem:[%s612_s13] sm:$0xff] %v643_v59 }
 0x250   : > { %v645_v60 = vld [vmem:[%s408_s8 + $0x8] sm:$0xff] }
 0x251   : > { %646 = vst [vmem:[%s612_s13 + $0x18] sm:$0xff] %v645_v60 }
 0x252 PF: > { %s17_s22 = sadd.s32 1, %s1002_s22   ;;  %s1220_s18 = smov %s990_s19 }
 0x253   : > { %p14_p12 = scmp.ge.s32.totalorder %s17_s22, 5   ;;  %s1221_s19 = smov %s1084_s29 }
 0x254   : > { %s1222_s20 = smov %s998_s21  ;;  %s1223_s21 = smov %s1225_s24 }
 0x255   :  { %16 = sbr.rel (!%p14_p12) target bundleno = 4 (0x4), region = 177 }
 0x25a   :  { %662 = vsyncpa [#allocation4], 1 }
 0x25b   :  { %664 = vsyncpa [#allocation4 + $0x1], 1 }
 0x25c   :  { %665 = vsyncpa [#allocation6], 1 }

// kernel: layer_forward.11
= control target key start
LH: loop header
LB: loop body
LE: loop exit
PB: predicated region body
PF: predicated region fallthrough
CT: control target
= control target key end

     0   :  { %8 = vsyncpa [#allocation3], 0  ;;  %s290_s12 = smov [#allocation2]   ;;  %s338_s0 = inlined_call_operand.vmem [shape: f32[16,128], index: 0, kind: input, shape index: {}]   ;;  %s339_s1 = inlined_call_operand.hbm [shape: bf16[128,256], index: 1, kind: input, shape index: {}]   ;;  %s340_s2 = inlined_call_operand.vmem [shape: f32[1,256], index: 2, kind: input, shape index: {}]   ;;  %s341_s3 = inlined_call_operand.vmem [shape: f32[16,256], index: 3, kind: output, shape index: {}]  }
   0x1   :  { %s16_s13 = sshll.u32 %s290_s12, 4  ;;  %s17_s13 = int_to_ptr.vmem [resolvable:$true] %s16_s13 }
   0x2   :  { %s276_s14 = scalar_lea.vmem %s17_s13, 2048  ;;  %p281_p1 = scmp.lt.s32.totalorder %s17_s13, %s17_s13 }
   0x3   :  { %p277_p0 = scmp.ne.s32.totalorder %s17_s13, %s276_s14  ;;  %p282_p2 = scmp.lt.s32.totalorder %s276_s14, %s276_s14 }
   0x5   :  { %p283_p3 = por %p282_p2, %p281_p1 }
   0x7   :  { %p284_p4 = pnand %p283_p3, %p277_p0 }
   0x9   :  { %287 = shalt.err (!%p284_p4)
}
   0xa   :  { %s291_s15 = smov 128   ;;  %s292_s16 = smov 8  }
   0xb   :  { %22 = dma.hbm_to_vmem [thread:$0]  %s339_s1, 2048, %s17_s13, [#allocation3], %s291_s15, %s291_s15, %s292_s16  }
   0xc   :  { %288 = dma.done.wait [#allocation3], 2048  }
   0xd   :  { %289 = vsyncadd [#allocation3], 4294965248  ;;  %v293_v0 = vmov 0   ;;  %v244_v1 = vld [vmem:[#allocation2 + $0x74] ss:$8 sps:$4 sm:$0xff]   ;;  %v37_v17 = vld [vmem:[%s338_s0] sm:$0xff]  ;;  %v200_v20 = vlaneseq }
   0xe   :  { %172 = vmatprep.mubr.bf16.mxu0 %v293_v0  ;;  %v246_v2 = vld [vmem:[#allocation2 + $0x70] ss:$8 sps:$4 sm:$0xff]   ;;  %140 = vmatprep.subr.bf16.mxu0 %v244_v1  ;;  %v247_v3 = vld [vmem:[#allocation2 + $0x64] ss:$8 sps:$4 sm:$0xff]   ;;  %v249_v4 = vld [vmem:[#allocation2 + $0x60] ss:$8 sps:$4 sm:$0xff]  }
   0xf   :  { %141 = vmatpush1.bf16.msra.mxu0 %v246_v2  ;;  %v250_v5 = vld [vmem:[#allocation2 + $0x54] ss:$8 sps:$4 sm:$0xff]   ;;  %v252_v6 = vld [vmem:[#allocation2 + $0x50] ss:$8 sps:$4 sm:$0xff]   ;;  %v253_v7 = vld [vmem:[#allocation2 + $0x44] ss:$8 sps:$4 sm:$0xff]  }
  0x10   :  { %142 = vmatprep.subr.bf16.mxu0 %v247_v3  ;;  %v255_v8 = vld [vmem:[#allocation2 + $0x40] ss:$8 sps:$4 sm:$0xff]   ;;  %v256_v9 = vld [vmem:[#allocation2 + $0x34] ss:$8 sps:$4 sm:$0xff]   ;;  %v258_v10 = vld [vmem:[#allocation2 + $0x30] ss:$8 sps:$4 sm:$0xff]  }
  0x11   :  { %v259_v11 = vld [vmem:[#allocation2 + $0x24] ss:$8 sps:$4 sm:$0xff]   ;;  %v261_v12 = vld [vmem:[#allocation2 + $0x20] ss:$8 sps:$4 sm:$0xff]   ;;  %v262_v13 = vld [vmem:[#allocation2 + $0x14] ss:$8 sps:$4 sm:$0xff]  }
  0x12   :  { %v264_v14 = vld [vmem:[#allocation2 + $0x10] ss:$8 sps:$4 sm:$0xff]   ;;  %v265_v15 = vld [vmem:[#allocation2 + $0x4] ss:$8 sps:$4 sm:$0xff]   ;;  %v267_v16 = vld [vmem:[#allocation2] ss:$8 sps:$4 sm:$0xff]  }
  0x13   :  { %143 = vmatpush1.bf16.msra.mxu0 %v249_v4  ;;  %v38_v18 = vld [vmem:[%s338_s0 + $0x8] sm:$0xff]  ;;  %v201_v21 = vshrl.u32 %v200_v20, 7  ;;  %v198_v23 = vld [vmem:[%s340_s2] sm:$0x3] }
  0x14   :  { %144 = vmatprep.subr.bf16.mxu0 %v250_v5  ;;  %v43_v19 = vpack.c.bf16 %v38_v18, %v37_v17 }
  0x15   :  { %v202_v22 = vsub.s32 0, %v201_v21  ;;  %v206_v24 = vsub.s32 1, %v201_v21 }
  0x17   :  { %145 = vmatpush1.bf16.msra.mxu0 %v252_v6  ;;  %v203_v25 = vrot.slane %v198_v23, %v202_v22  ;;  %v207_v27 = vrot.slane %v198_v23, %v206_v24 }
  0x18   :  { %146 = vmatprep.subr.bf16.mxu0 %v253_v7 }
  0x1b   :  { %147 = vmatpush1.bf16.msra.mxu0 %v255_v8 }
  0x1c   :  { %148 = vmatprep.subr.bf16.mxu0 %v256_v9 }
  0x1f   :  { %149 = vmatpush1.bf16.msra.mxu0 %v258_v10 }
  0x20   :  { %150 = vmatprep.subr.bf16.mxu0 %v259_v11 }
  0x23   :  { %151 = vmatpush1.bf16.msra.mxu0 %v261_v12 }
  0x24   :  { %152 = vmatprep.subr.bf16.mxu0 %v262_v13 }
  0x27   :  { %153 = vmatpush1.bf16.msra.mxu0 %v264_v14 }
  0x28   :  { %154 = vmatprep.subr.bf16.mxu0 %v265_v15 }
  0x2b   :  { %155 = vmatpush1.bf16.msra.mxu0 %v267_v16 }
  0x2e   :  { %173 = vmatmul.mubr.bf16.vlgmr.msra.gmra.mxu0 %v43_v19 }
  0xee   :  { %v174_v26 = vpop.f32.mrf.mxu0 }
  0xef   :  { %v210_v29 = vadd.f32 %v203_v25, %v174_v26 }
  0xf0   :  { %v176_v28 = vpop.f32.mrf.mxu0 }
  0xf1   :  { %214 = vst [vmem:[%s341_s3] sm:$0xff] %v210_v29  ;;  %v211_v31 = vadd.f32 %v207_v27, %v176_v28 }
  0xf2   :  { %v178_v30 = vpop.f32.mrf.mxu0 }
  0xf3   :  { %215 = vst [vmem:[%s341_s3 + $0x8] sm:$0xff] %v211_v31  ;;  %v212_v33 = vadd.f32 %v203_v25, %v178_v30 }
  0xf4   :  { %v180_v32 = vpop.f32.mrf.mxu0 }
  0xf5   :  { %216 = vst [vmem:[%s341_s3 + $0x10] sm:$0xff] %v212_v33  ;;  %v213_v34 = vadd.f32 %v207_v27, %v180_v32 }
  0xf7   :  { %217 = vst [vmem:[%s341_s3 + $0x18] sm:$0xff] %v213_v34 }
  0xf8   :  { %222 = vsyncpa [#allocation3], 1 }

// kernel: layer_forward.8
= control target key start
LH: loop header
LB: loop body
LE: loop exit
PB: predicated region body
PF: predicated region fallthrough
CT: control target
= control target key end

     0   :  { %13 = vsyncpa [#allocation3], 0  ;;  %s2662_s0 = inlined_call_operand.vmem [shape: f32[2,8,384], index: 0, kind: input, shape index: {}, may-alias: {0,1,2}]   ;;  %s2663_s1 = inlined_call_operand.vmem [shape: f32[2,8,384], index: 1, kind: input, shape index: {}, may-alias: {0,1,2}]   ;;  %s2664_s2 = inlined_call_operand.vmem [shape: f32[2,8,384], index: 2, kind: input, shape index: {}, may-alias: {0,1,2}]   ;;  %s2665_s3 = inlined_call_operand.hbm [shape: bf16[128,128], index: 3, kind: input, shape index: {}]   ;;  %s2666_s4 = inlined_call_operand.hbm [shape: f32[1,128], index: 4, kind: input, shape index: {}]   ;;  %s2667_s5 = inlined_call_operand.vmem [shape: f32[2,8,128], index: 5, kind: input, shape index: {}]   ;;  %s2668_s6 = inlined_call_operand.vmem [shape: f32[2,8,128], index: 6, kind: output, shape index: {0}]   ;;  %s2669_s7 = inlined_call_operand.hbm [shape: f32[2,4,8,8], index: 7, kind: output, shape index: {1}]  }
   0x1   :  { %14 = vsyncpa [#allocation6], 0 }
   0x2   :  { %15 = vsyncpa [#allocation4], 0 }
   0x3   :  { %17 = vsyncpa [#allocation4 + $0x1], 0  ;;  %s2301_s24 = smov 0   ;;  %s2303_s25 = smov 0  }
   0x4   :  { %s2305_s26 = smov 0   ;;  %s2307_s27 = smov 0  }
   0x5   :  { %s2309_s28 = smov 0   ;;  %s2311_s29 = smov 0  }
   0x6 LB: > { %s1862_s30 = sadd.s32 4294967295, %s2244_s29   ;;  %s1863_s8 = sadd.s32 4294967294, %s2244_s29   ;;  %s2244_s29 = sphi %s2311_s29, %s23_s29   ;;  %s2240_s28 = sphi %s2309_s28, %s2680_s28   ;;  %s2236_s27 = sphi %s2307_s27, %s2679_s27   ;;  %s2232_s26 = sphi %s2305_s26, %s2678_s26   ;;  %s2228_s25 = sphi %s2303_s25, %s2677_s25   ;;  %s2224_s24 = sphi %s2301_s24, %s2676_s24  }
   0x7   : > { %s35_s9 = sadd.s32 1, %s2240_s28  ;;  %s222_s10 = sadd.s32 1, %s2232_s26 }
   0x8   : > { %p37_p0 = scmp.ge.s32.totalorder %s35_s9, 2  ;;  %p232_p1 = scmp.ne.s32.totalorder %s2232_s26, %s2228_s25 }
   0x9   : > { %p233_p2 = scmp.eq.s32.totalorder %s1862_s30, 1  ;;  %p238_p3 = scmp.ne.s32.totalorder %s2228_s25, %s2224_s24 }
   0xa   : > { %s2682_s9 = smov (%p37_p0, %s35_s9), 0  ;;  %p239_p5 = scmp.eq.s32.totalorder %s1863_s8, 1 }
   0xb   : > { %p2341_p4 = por %p233_p2, %p232_p1  ;;  %s217_s12 = ssub.s32 %s2240_s28, %s2682_s9 }
   0xc   : > { %p1864_p6 = scmp.ge.s32.totalorder %s2244_s29, 1  ;;  %p220_p7 = scmp.eq.s32.totalorder %s217_s12, 0 }
   0xd   : > { %p2348_p8 = por %p239_p5, %p238_p3  ;;  %p246_p9 = scmp.lt.s32.totalorder %s2244_s29, 3 }
   0xe   : > { %s2354_s14 = scalar_select %p220_p7, %s2232_s26, %s222_s10  }
   0xf   : > { %s2671_s13 = scalar_select %p2348_p8, 1, 0 }
  0x10   : > { %p2356_p10 = pnand %p1864_p6, %p246_p9  ;;  %p2360_p11 = scmp.eq.s32.totalorder %s1862_s30, 0 }
  0x11   : > { %s2246_s17 = smov [#allocation2]   ;;  %s2247_s20 = smov [#allocation5]  }
  0x12   : > { %p2006_p12 = pneg %p2356_p10  ;;  %s258_s18 = sshll.u32 %s2246_s17, 4  ;;  %s259_s18 = int_to_ptr.vmem [resolvable:$true] %s258_s18 }
  0x13   : > { %s272_s21 = sshll.u32 %s2247_s20, 4  ;;  %s2119_s22 = scalar_lea.vmem %s259_s18, 1024  ;;  %s273_s21 = int_to_ptr.vmem [resolvable:$true] %s272_s21 }
  0x14   : > { %p2368_p13 = pnand %p2360_p11, %p2006_p12  ;;  %p2120_p1 = scmp.ne.s32.totalorder %s259_s18, %s2119_s22 }
  0x15   : > { %p2127_p5 = scmp.lt.s32.totalorder %s259_s18, %s259_s18  ;;  %p2128_p6 = scmp.lt.s32.totalorder %s2119_s22, %s2119_s22 }
  0x16   : > { %p2110_p0 = pneg %p2368_p13 }
  0x17   : > { %p2129_p7 = por %p2128_p6, %p2127_p5 }
  0x18   : > { %p2122_p2 = pnand %p2120_p1, %p2110_p0 }
  0x1a   : > { %p2123_p3 = pneg %p2122_p2 }
  0x1c   : > { %p2130_p9 = pnand %p2129_p7, %p2123_p3 }
  0x1e   : > { %2133 = shalt.err (!%p2130_p9)
}
  0x1f   : > { %s2248_s23 = smov 64   ;;  %s2249_s30 = smov 4  }
  0x20   : > { %2009 = dma.hbm_to_vmem [thread:$0]  (!%p2368_p13), %s2665_s3, 1024, %s259_s18, [#allocation3], %s2248_s23, %s2248_s23, %s2249_s30  }
  0x21   : > { %s2145_s12 = scalar_lea.vmem %s273_s21, 16  ;;  %s2152_s17 = scalar_lea.vmem %s273_s21, 32 }
  0x22   : > { %p2146_p12 = scmp.ne.s32.totalorder %s273_s21, %s2145_s12  ;;  %p2153_p8 = scmp.lt.s32.totalorder %s273_s21, %s273_s21 }
  0x23   : > { %p2154_p5 = scmp.lt.s32.totalorder %s2152_s17, %s2145_s12 }
  0x24   : > { %p2148_p1 = pnand %p2146_p12, %p2110_p0 }
  0x25   : > { %p2155_p3 = por %p2154_p5, %p2153_p8 }
  0x26   : > { %p2149_p2 = pneg %p2148_p1 }
  0x28   : > { %p2156_p6 = pnand %p2155_p3, %p2149_p2 }
  0x2a   : > { %2159 = shalt.err (!%p2156_p6)
}
  0x2b   : > { %2012 = dma.hbm_to_vmem [thread:$0]  (!%p2368_p13), %s2666_s4, 16, %s273_s21, [#allocation6]  }
  0x2c   : > { %325 = sbr.rel (%p2356_p10) target bundleno = 1323 (0x52b), region = 44 }
  0x31   : > { %2211 = dma.done.wait (%p2360_p11), [#allocation3], 1024  }
  0x32   : > { %2213 = vsyncadd (%p2360_p11), [#allocation3], 4294966272 }
  0x33   : > { %2215 = dma.done.wait (%p2360_p11), [#allocation6], 16  }
  0x34   : > { %2217 = vsyncadd (%p2360_p11), [#allocation6], 4294967280  ;;  %p391_p8 = scmp.lt.s32.totalorder %s2236_s27, 1  ;;  %s2250_s16 = smov 32   ;;  %v2253_v4 = vmov 0.0   ;;  %vm2254_vm0 = vmmov 0   ;;  %v439_v7 = vlaneseq }
  0x35   : > { %s2251_s12 = smov 96   ;;  %s2252_s17 = smov 64   ;;  %1927 = vmatprep.subr.bf16.mxu1 %v2253_v4  ;;  %1951 = vmatprep.subr.bf16.mxu0 %v2253_v4  ;;  %v2255_v5 = vmov 1983009808   ;;  %v2256_v10 = vmov 1934713408  }
  0x36   : > { %s2402_s18 = scalar_select %p391_p8, %s2236_s27, 1  ;;  %1929 = vmatprep.mubr.msk.bf16.mxu1 %vm2254_vm0, %v2253_v4  ;;  %1953 = vmatprep.mubr.msk.bf16.mxu0 %vm2254_vm0, %v2253_v4  ;;  %v437_v6 = vunpack.c.l.s4 %v2255_v5  ;;  %v440_v9 = vshrl.u32 %v439_v7, 7  ;;  %v454_v11 = vunpack.c.l.s4 %v2256_v10  ;;  %v2257_v33 = vmov 0  }
  0x37   : > { %vm937_vm1 = vcmask 261120   ;;  %vm1122_vm2 = vcmask 64512   ;;  %vm1178_vm3 = vcmask 1043456   ;;  %vm1531_vm4 = vcmask 523264   ;;  %s1901_s30 = sshll.u32 %s2236_s27, 9  ;;  %s2258_s27 = smov [#allocation7]  }
  0x38   : > { %s2405_s15 = smul.u32 24, %s2402_s18  ;;  %v438_v8 = vunpack.c.0.s8 %v437_v6  ;;  %v455_v13 = vunpack.c.0.s8 %v454_v11  ;;  %vm1534_vm5 = vcmask 785408   ;;  %s2164_s22 = sshll.u32 %s2258_s27, 4  ;;  %s2165_s22 = int_to_ptr.vmem [resolvable:$false] %s2164_s22 }
  0x3a   : > { %s1760_s23 = scalar_lea.vmem %s2663_s1, %s2405_s15  ;;  %s399_s10 = scalar_lea.vmem %s2662_s0, %s2405_s15  ;;  %v2427_v12 = vsub.s32 %v438_v8, %v440_v9  ;;  %v2430_v17 = vsub.s32 %v455_v13, %v440_v9 }
  0x3b   : > { %v1877_v0 = vld [vmem:[%s1760_s23 + $0x8] sm:$0xff]  ;;  %v427_v1 = vld [vmem:[%s399_s10] sm:$0xff]  ;;  %s1764_s19 = scalar_lea.vmem %s2664_s2, %s2405_s15  ;;  %s388_s15 = sand.u32 1, %s2228_s25  }
  0x3c   : > { %v536_v2 = vpack.c.bf16 %v1877_v0, %v1877_v0  ;;  %v428_v3 = vpack.c.bf16 %v427_v1, %v427_v1  ;;  %s1871_s21 = sshll.u32 %s388_s15, 5 }
  0x3d   : > { %s2527_s23 = scalar_lea.vmem [#allocation7], %s1871_s21 }
  0x3e   : > { %542 = vrot.lane.b32.xlu1 %v536_v2, %s2250_s16  ;;  %538 = vrot.lane.b32.xlu0 %v536_v2, %s2251_s12  ;;  %v550_v22 = vrot.slane %v536_v2, %v2427_v12  ;;  %v442_v28 = vrot.slane %v428_v3, %v2427_v12  ;;  %s1677_s8 = sshll.u32 %s2527_s23, 4  ;;  %s2606_s8 = int_to_ptr.vmem [resolvable:$true] %s1677_s8 }
  0x3f   : > { %s2160_s20 = scalar_lea.vmem %s2606_s8, 512  ;;  %p2167_p0 = scmp.lt.s32.totalorder %s2606_s8, %s2165_s22 }
  0x40   : > { %p2161_p10 = scmp.ne.s32.totalorder %s2606_s8, %s2160_s20 }
  0x42   : > { %540 = vrot.lane.b32.xlu0 %v536_v2, %s2252_s17  ;;  %430 = vrot.lane.b32.xlu1 %v428_v3, %s2251_s12  ;;  %p2162_p11 = pnand %p2161_p10, %p2341_p4 }
  0x44   : > { %p2163_p13 = pneg %p2162_p11 }
  0x46   : > { %432 = vrot.lane.b32.xlu0 %v428_v3, %s2252_s17  ;;  %434 = vrot.lane.b32.xlu1 %v428_v3, %s2250_s16 }
  0xb0   : > { %v543_v14 = vpop.permute.xlu1 %542  ;;  %v539_v15 = vpop.permute.xlu0 %538 }
  0xb1   : > { %v592_v16 = vrot.slane %v543_v14, %v2427_v12  ;;  %v584_v18 = vrot.slane %v539_v15, %v2427_v12 }
  0xb3   : > { %v593_v19 = vcombine.low %v584_v18, %v592_v16  ;;  %v594_v20 = vcombine.high %v584_v18, %v592_v16 }
  0xb4   : > { %v541_v21 = vpop.permute.xlu0 %540  ;;  %v431_v23 = vpop.permute.xlu1 %430 }
  0xb5   : > { %v601_v24 = vrot.slane %v593_v19, %v2430_v17  ;;  %v558_v25 = vrot.slane %v541_v21, %v2427_v12  ;;  %v608_v26 = vrot.slane %v594_v20, %v2430_v17  ;;  %v476_v27 = vrot.slane %v431_v23, %v2427_v12 }
  0xb7   : > { %v559_v29 = vcombine.low %v550_v22, %v558_v25  ;;  %v560_v30 = vcombine.high %v550_v22, %v558_v25  ;;  %v609_v34 = vcombine.high %v601_v24, %v2257_v33  ;;  %v610_v37 = vcombine.high %v608_v26, %v2257_v33 }
  0xb8   : > { %v433_v31 = vpop.permute.xlu0 %432  ;;  %v435_v32 = vpop.permute.xlu1 %434  ;;  %v616_v38 = vshrl.u32 %v601_v24, 16  ;;  %v632_v53 = vshrl.u32 %v608_v26, 16 }
  0xb9   : > { %v450_v35 = vrot.slane %v433_v31, %v2427_v12  ;;  %v484_v36 = vrot.slane %v435_v32, %v2427_v12  ;;  %v567_v39 = vrot.slane %v559_v29, %v2430_v17  ;;  %v574_v40 = vrot.slane %v560_v30, %v2430_v17 }
  0xba   : > { %v624_v57 = vshrl.u32 %v609_v34, 16  ;;  %v640_v60 = vshrl.u32 %v610_v37, 16 }
  0xbb   : > { %v451_v41 = vcombine.low %v442_v28, %v450_v35  ;;  %v452_v42 = vcombine.high %v442_v28, %v450_v35  ;;  %v485_v43 = vcombine.low %v476_v27, %v484_v36  ;;  %v486_v44 = vcombine.high %v476_v27, %v484_v36 }
  0xbc   : > { %v575_v45 = vcombine.high %v567_v39, %v2257_v33  ;;  %v576_v46 = vcombine.high %v574_v40, %v2257_v33  ;;  %v613_v47 = vpack.i.b16 %v601_v24, %v567_v39  ;;  %v615_v48 = vshrl.u32 %v567_v39, 16 }
  0xbd   : > { %v629_v49 = vpack.i.b16 %v608_v26, %v574_v40  ;;  %v631_v50 = vshrl.u32 %v574_v40, 16  ;;  %v459_v51 = vrot.slane %v451_v41, %v2430_v17  ;;  %v466_v52 = vrot.slane %v452_v42, %v2430_v17 }
  0xbe   : > { %v621_v54 = vpack.i.b16 %v609_v34, %v575_v45  ;;  %v623_v55 = vshrl.u32 %v575_v45, 16  ;;  %v637_v56 = vpack.i.b16 %v610_v37, %v576_v46  ;;  %v639_v58 = vshrl.u32 %v576_v46, 16 }
  0xbf   : > { %v467_v59 = vcombine.high %v459_v51, %v2257_v33  ;;  %v617_v61 = vpack.i.b16 %v616_v38, %v615_v48  ;;  %v633_v62 = vpack.i.b16 %v632_v53, %v631_v50  ;;  %v468_v63 = vcombine.high %v466_v52, %v2257_v33 }
  0xc0   : > { %v813_v0 = vcombine.low %v613_v47, %v629_v49  ;;  %v507_v1 = vshrl.u32 %v459_v51, 16  ;;  %v493_v2 = vrot.slane %v485_v43, %v2430_v17  ;;  %v500_v3 = vrot.slane %v486_v44, %v2430_v17 }
  0xc1   : > { %v625_v5 = vpack.i.b16 %v624_v57, %v623_v55  ;;  %v641_v6 = vpack.i.b16 %v640_v60, %v639_v58  ;;  %v523_v7 = vshrl.u32 %v466_v52, 16  ;;  %v821_v8 = vcombine.low %v621_v54, %v637_v56 }
  0xc2   : > { %v515_v9 = vshrl.u32 %v467_v59, 16  ;;  %v501_v10 = vcombine.high %v493_v2, %v2257_v33  ;;  %v502_v11 = vcombine.high %v500_v3, %v2257_v33  ;;  %v508_v13 = vshrl.u32 %v493_v2, 16 }
  0xc3   : > { %v531_v14 = vshrl.u32 %v468_v63, 16  ;;  %v524_v15 = vshrl.u32 %v500_v3, 16  ;;  %v828_v16 = vrot.slane %v821_v8, %v2427_v12  ;;  %v838_v18 = vcombine.low %v617_v61, %v633_v62 }
  0xc4   : > { %v509_v19 = vpack.i.b16 %v508_v13, %v507_v1  ;;  %v513_v20 = vpack.i.b16 %v501_v10, %v467_v59  ;;  %v516_v21 = vshrl.u32 %v501_v10, 16  ;;  %v529_v22 = vpack.i.b16 %v502_v11, %v468_v63 }
  0xc5   : > { %v525_v23 = vpack.i.b16 %v524_v15, %v523_v7  ;;  %v532_v24 = vshrl.u32 %v502_v11, 16  ;;  %v820_v25 = vrot.slane %v813_v0, %v2427_v12  ;;  %v505_v26 = vpack.i.b16 %v493_v2, %v459_v51 }
  0xc6   : > { %v517_v27 = vpack.i.b16 %v516_v21, %v515_v9  ;;  %v521_v28 = vpack.i.b16 %v500_v3, %v466_v52  ;;  %v846_v29 = vcombine.low %v625_v5, %v641_v6  ;;  %v845_v31 = vrot.slane %v838_v18, %v2427_v12 }
  0xc7   : > { %v533_v30 = vpack.i.b16 %v532_v24, %v531_v14  ;;  %v759_v32 = vcombine.low %v513_v20, %v529_v22  ;;  %v776_v34 = vcombine.low %v509_v19, %v525_v23  ;;  %v829_v35 = vcombine.low %v820_v25, %v828_v16 }
  0xc8   : > { %v853_v36 = vrot.slane %v846_v29, %v2427_v12  ;;  %v751_v38 = vcombine.low %v505_v26, %v521_v28 }
  0xc9   : > { %v784_v37 = vcombine.low %v517_v27, %v533_v30  ;;  %v766_v41 = vrot.slane %v759_v32, %v2427_v12  ;;  %v783_v42 = vrot.slane %v776_v34, %v2427_v12  ;;  %v836_v43 = vrot.slane %v829_v35, %v2430_v17  ;;  %v1878_v27 = vld [vmem:[%s1764_s19 + $0x10] sm:$0xff]  ;;  %s2166_s19 = scalar_lea.vmem %s2165_s22, 1024 }
  0xca   : > { %v854_v39 = vcombine.low %v845_v31, %v853_v36  ;;  %v758_v45 = vrot.slane %v751_v38, %v2427_v12  ;;  %v644_v29 = vpack.c.bf16 %v1878_v27, %v1878_v27  ;;  %p2168_p7 = scmp.lt.s32.totalorder %s2166_s19, %s2160_s20 }
  0xcb   : > { %v791_v40 = vrot.slane %v784_v37, %v2427_v12  ;;  %v866_v52 = vshrl.u32 %v836_v43, 16  ;;  %v837_v59 = vcombine.high %v836_v43, %v2257_v33 }
  0xcc   : > { %v861_v44 = vrot.slane %v854_v39, %v2430_v17  ;;  %v767_v49 = vcombine.low %v758_v45, %v766_v41  ;;  %p2169_p9 = por %p2168_p7, %p2167_p0 }
  0xcd   : > { %v792_v47 = vcombine.low %v783_v42, %v791_v40  ;;  %v872_v2 = vshrl.u32 %v837_v59, 16 }
  0xce   : > { %v865_v46 = vpack.i.b16 %v861_v44, %v836_v43  ;;  %v867_v50 = vshrl.u32 %v861_v44, 16  ;;  %v774_v53 = vrot.slane %v767_v49, %v2430_v17  ;;  %v862_v57 = vcombine.high %v861_v44, %v2257_v33  ;;  %p2170_p12 = pnand %p2169_p9, %p2163_p13 }
  0xcf   : > { %v799_v51 = vrot.slane %v792_v47, %v2430_v17 }
  0xd0   : > { %v942_v48 = vsel %vm937_vm1, %v865_v46, 0  ;;  %v868_v54 = vpack.i.b16 %v867_v50, %v866_v52  ;;  %v804_v60 = vshrl.u32 %v774_v53, 16  ;;  %v871_v61 = vpack.i.b16 %v862_v57, %v837_v59 }
  0xd1   : > { %1928 = vmatpush3.bf16.xpose.msra.mxu1 %v942_v48  ;;  %v803_v55 = vpack.i.b16 %v799_v51, %v774_v53  ;;  %v805_v58 = vshrl.u32 %v799_v51, 16  ;;  %v873_v0 = vshrl.u32 %v862_v57, 16  ;;  %v800_v1 = vcombine.high %v799_v51, %v2257_v33 }
  0xd2   : > { %1933 = vmatprep.subr.bf16.mxu1 %v2253_v4  ;;  %v988_v56 = vsel %vm937_vm1, %v868_v54, 0  ;;  %v1034_v63 = vsel %vm937_vm1, %v871_v61, 0  ;;  %v775_v3 = vcombine.high %v774_v53, %v2257_v33 }
  0xd3   : > { %v806_v62 = vpack.i.b16 %v805_v58, %v804_v60  ;;  %v874_v5 = vpack.i.b16 %v873_v0, %v872_v2  ;;  %v811_v8 = vshrl.u32 %v800_v1, 16  ;;  %v658_v0 = vrot.slane %v644_v29, %v2427_v12 }
  0xd4   : > { %v809_v6 = vpack.i.b16 %v800_v1, %v775_v3  ;;  %v810_v9 = vshrl.u32 %v775_v3, 16 }
  0xd5   : > { %v1080_v7 = vsel %vm937_vm1, %v874_v5, 0 }
  0xd6   : > { %v812_v10 = vpack.i.b16 %v811_v8, %v810_v9 }
  0xd8   : > { %1930 = vmatmul.mubr.msk.bf16.vlgmr.msra.gmra.mxu1 %vm937_vm1, %v803_v55 }
  0xd9   : > { %1934 = vmatpush3.bf16.xpose.msra.mxu1 %v988_v56  ;;  %1935 = vmatprep.mubr.msk.bf16.mxu1 %vm2254_vm0, %v2253_v4 }
  0xda   : > { %1939 = vmatprep.subr.bf16.mxu1 %v2253_v4 }
  0xe0   : > { %1936 = vmatmul.mubr.msk.bf16.vlgmr.msra.gmra.mxu1 %vm937_vm1, %v806_v62 }
  0xe1   : > { %1940 = vmatpush3.bf16.xpose.msra.mxu1 %v1034_v63  ;;  %1941 = vmatprep.mubr.msk.bf16.mxu1 %vm2254_vm0, %v2253_v4 }
  0xe2   : > { %1945 = vmatprep.subr.bf16.mxu1 %v2253_v4 }
  0xe8   : > { %1942 = vmatmul.mubr.msk.bf16.vlgmr.msra.gmra.mxu1 %vm937_vm1, %v809_v6 }
  0xe9   : > { %1946 = vmatpush3.bf16.xpose.msra.mxu1 %v1080_v7  ;;  %1947 = vmatprep.mubr.msk.bf16.mxu1 %vm2254_vm0, %v2253_v4 }
  0xea   : > { %1957 = vmatprep.subr.bf16.mxu1 %v2253_v4 }
  0xf0   : > { %1948 = vmatmul.mubr.msk.bf16.vlgmr.msra.gmra.mxu1 %vm937_vm1, %v812_v10 }
  0xf1   : > { %1959 = vmatprep.mubr.msk.bf16.mxu1 %vm2254_vm0, %v2253_v4 }
 0x198   : > { %v978_v11 = vpop.f32.mrf.mxu1 }
 0x199   : > { %v1123_v13 = vsel %vm1122_vm2, %v978_v11, -inf }
 0x19a   : > { %1124 = vmax.xlane.f32.xlu0 %v1123_v13  ;;  %v1931_v14 = vpop.f32.mrf.mxu1 }
 0x19c   : > { %v981_v15 = vpop.f32.mrf.mxu1 }
 0x19e   : > { %v1932_v16 = vpop.f32.mrf.mxu1 }
 0x1a0   : > { %v1024_v18 = vpop.f32.mrf.mxu1 }
 0x1a1   : > { %v1126_v19 = vsel %vm1122_vm2, %v1024_v18, -inf }
 0x1a2   : > { %1127 = vmax.xlane.f32.xlu1 %v1126_v19  ;;  %v1937_v20 = vpop.f32.mrf.mxu1 }
 0x1a4   : > { %v1027_v21 = vpop.f32.mrf.mxu1 }
 0x1a6   : > { %v1938_v22 = vpop.f32.mrf.mxu1 }
 0x1a8   : > { %v1070_v23 = vpop.f32.mrf.mxu1 }
 0x1a9   : > { %v1129_v24 = vsel %vm1122_vm2, %v1070_v23, -inf }
 0x1aa   : > { %1130 = vmax.xlane.f32.xlu0 %v1129_v24  ;;  %v1943_v25 = vpop.f32.mrf.mxu1 }
 0x1ac   : > { %v1073_v26 = vpop.f32.mrf.mxu1 }
 0x1ae   : > { %v1944_v28 = vpop.f32.mrf.mxu1 }
 0x1b0   : > { %v1116_v30 = vpop.f32.mrf.mxu1 }
 0x1b1   : > { %v1132_v31 = vsel %vm1122_vm2, %v1116_v30, -inf }
 0x1b2   : > { %1133 = vmax.xlane.f32.xlu0 %v1132_v31  ;;  %v1949_v32 = vpop.f32.mrf.mxu1 }
 0x1b3   : > { %646 = vrot.lane.b32.xlu1 %v644_v29, %s2251_s12 }
 0x1b4   : > { %v1119_v34 = vpop.f32.mrf.mxu1 }
 0x1b6   : > { %v1950_v35 = vpop.f32.mrf.mxu1 }
 0x223   : > { %v1125_v36 = vpop.xlane.xlu0 %1124 }
 0x224   : > { %v1135_v37 = vsub.f32 %v978_v11, %v1125_v36 }
 0x226   : > { %v1139_v38 = vmul.f32 1.442695, %v1135_v37 }
 0x228   : > { %2092 = vpow2.f32 %v1139_v38 }
 0x22b   : > { %v1128_v39 = vpop.xlane.xlu1 %1127 }
 0x22c   : > { %v1136_v40 = vsub.f32 %v1024_v18, %v1128_v39 }
 0x22e   : > { %v1141_v41 = vmul.f32 1.442695, %v1136_v40 }
 0x22f   : > { %v647_v56 = vpop.permute.xlu1 %646 }
 0x230   : > { %2094 = vpow2.f32 %v1141_v41  ;;  %v692_v60 = vrot.slane %v647_v56, %v2427_v12 }
 0x233   : > { %v1131_v46 = vpop.xlane.xlu0 %1130 }
 0x234   : > { %v1137_v47 = vsub.f32 %v1070_v23, %v1131_v46 }
 0x235   : > { %v2093_v42 = vpop.eup %2092 }
 0x236   : > { %v1147_v43 = vsel %vm1122_vm2, %v2093_v42, 0.0  ;;  %v1143_v48 = vmul.f32 1.442695, %v1137_v47 }
 0x237   : > { %1148 = vadd.xlane.f32.xlu1 %v1147_v43 }
 0x238   : > { %2096 = vpow2.f32 %v1143_v48 }
 0x23b   : > { %v1134_v49 = vpop.xlane.xlu0 %1133 }
 0x23c   : > { %v1138_v50 = vsub.f32 %v1116_v30, %v1134_v49 }
 0x23d   : > { %v2501_v44 = vpop.eup %2094 }
 0x23e   : > { %v1150_v45 = vsel %vm1122_vm2, %v2501_v44, 0.0  ;;  %v1145_v51 = vmul.f32 1.442695, %v1138_v50 }
 0x23f   : > { %1151 = vadd.xlane.f32.xlu0 %v1150_v45 }
 0x240   : > { %2098 = vpow2.f32 %v1145_v51 }
 0x245   : > { %v2507_v52 = vpop.eup %2096 }
 0x246   : > { %v1153_v53 = vsel %vm1122_vm2, %v2507_v52, 0.0 }
 0x248   : > { %650 = vrot.lane.b32.xlu1 %v644_v29, %s2250_s16 }
 0x24d   : > { %v2511_v54 = vpop.eup %2098 }
 0x24e   : > { %v1156_v55 = vsel %vm1122_vm2, %v2511_v54, 0.0 }
 0x255   : > { %648 = vrot.lane.b32.xlu0 %v644_v29, %s2252_s17 }
 0x26c   : > { %1154 = vadd.xlane.f32.xlu1 %v1153_v53 }
 0x274   : > { %1157 = vadd.xlane.f32.xlu0 %v1156_v55 }
 0x2c0   : > { %v1149_v57 = vpop.xlane.xlu1 %1148 }
 0x2c1   : > { %2100 = vrcp.f32 %v1149_v57 }
 0x2c4   : > { %v651_v58 = vpop.permute.xlu1 %650 }
 0x2c5   : > { %v700_v59 = vrot.slane %v651_v58, %v2427_v12 }
 0x2c7   : > { %v701_v61 = vcombine.low %v692_v60, %v700_v59  ;;  %v702_v63 = vcombine.high %v692_v60, %v700_v59 }
 0x2c8   : > { %v1152_v62 = vpop.xlane.xlu0 %1151 }
 0x2c9   : > { %2102 = vrcp.f32 %v1152_v62  ;;  %v709_v1 = vrot.slane %v701_v61, %v2430_v17  ;;  %v716_v6 = vrot.slane %v702_v63, %v2430_v17 }
 0x2cb   : > { %v717_v10 = vcombine.high %v709_v1, %v2257_v33  ;;  %v718_v14 = vcombine.high %v716_v6, %v2257_v33  ;;  %v724_v15 = vshrl.u32 %v709_v1, 16  ;;  %v740_v22 = vshrl.u32 %v716_v6, 16 }
 0x2cc   : > { %v649_v2 = vpop.permute.xlu0 %648 }
 0x2cd   : > { %v666_v3 = vrot.slane %v649_v2, %v2427_v12  ;;  %v732_v21 = vshrl.u32 %v717_v10, 16  ;;  %v748_v30 = vshrl.u32 %v718_v14, 16 }
 0x2ce   : > { %v2101_v5 = vpop.eup %2100 }
 0x2cf   : > { %v667_v7 = vcombine.low %v658_v0, %v666_v3  ;;  %v668_v8 = vcombine.high %v658_v0, %v666_v3  ;;  %v1160_v9 = vmul.f32 %v2101_v5, %v2093_v42 }
 0x2d1   : > { %v675_v11 = vrot.slane %v667_v7, %v2430_v17  ;;  %v682_v13 = vrot.slane %v668_v8, %v2430_v17  ;;  %1167 = vst.msk [vmem:[%s2527_s23] sm:$0xff] %vm1122_vm2, %v1160_v9  ;;  %v1171_v62 = vpack.c.bf16 %v1160_v9, %v1160_v9 }
 0x2d3   : > { %v683_v16 = vcombine.high %v675_v11, %v2257_v33  ;;  %v684_v18 = vcombine.high %v682_v13, %v2257_v33  ;;  %v721_v19 = vpack.i.b16 %v709_v1, %v675_v11  ;;  %v723_v20 = vshrl.u32 %v675_v11, 16 }
 0x2d4   : > { %v737_v23 = vpack.i.b16 %v716_v6, %v682_v13  ;;  %v739_v24 = vshrl.u32 %v682_v13, 16  ;;  %v2084_v13 = vld [vmem:[#allocation2 + $0x38] sm:$0xff]  }
 0x2d5   : > { %v725_v25 = vpack.i.b16 %v724_v15, %v723_v20  ;;  %v729_v26 = vpack.i.b16 %v717_v10, %v683_v16  ;;  %v731_v27 = vshrl.u32 %v683_v16, 16  ;;  %v745_v28 = vpack.i.b16 %v718_v14, %v684_v18  ;;  %v2085_v14 = vld [vmem:[#allocation2 + $0x30] sm:$0xff]   ;;  %v2087_v15 = vld [vmem:[#allocation2 + $0x20] sm:$0xff]  }
 0x2d6   : > { %v2103_v29 = vpop.eup %2102  ;;  %v741_v31 = vpack.i.b16 %v740_v22, %v739_v24  ;;  %v747_v32 = vshrl.u32 %v684_v18, 16  ;;  %v875_v34 = vcombine.low %v721_v19, %v737_v23  ;;  %v2089_v16 = vld [vmem:[#allocation2 + $0x10] sm:$0xff]   ;;  %v2090_v18 = vld [vmem:[#allocation2 + $0x8] sm:$0xff]  }
 0x2d7   : > { %v733_v35 = vpack.i.b16 %v732_v21, %v731_v27  ;;  %v883_v36 = vcombine.low %v729_v26, %v745_v28  ;;  %v1162_v37 = vmul.f32 %v2103_v29, %v2501_v44 }
 0x2d8   : > { %v749_v38 = vpack.i.b16 %v748_v30, %v747_v32  ;;  %v900_v39 = vcombine.low %v725_v25, %v741_v31  ;;  %v882_v40 = vrot.slane %v875_v34, %v2427_v12 }
 0x2d9   : > { %v890_v41 = vrot.slane %v883_v36, %v2427_v12  ;;  %1168 = vst.msk [vmem:[%s2527_s23 + $0x8] sm:$0xff] %vm1122_vm2, %v1162_v37  ;;  %v1172_v1 = vpack.c.bf16 %v1162_v37, %v1162_v37 }
 0x2da   : > { %v908_v42 = vcombine.low %v733_v35, %v749_v38  ;;  %v907_v45 = vrot.slane %v900_v39, %v2427_v12 }
 0x2db   : > { %v891_v43 = vcombine.low %v882_v40, %v890_v41 }
 0x2dc   : > { %v915_v46 = vrot.slane %v908_v42, %v2427_v12 }
 0x2dd   : > { %v898_v47 = vrot.slane %v891_v43, %v2430_v17 }
 0x2de   : > { %v916_v48 = vcombine.low %v907_v45, %v915_v46 }
 0x2df   : > { %v899_v49 = vcombine.high %v898_v47, %v2257_v33  ;;  %v928_v51 = vshrl.u32 %v898_v47, 16 }
 0x2e0   : > { %v923_v44 = vrot.slane %v916_v48, %v2430_v17 }
 0x2e1   : > { %v934_v56 = vshrl.u32 %v899_v49, 16 }
 0x2e2   : > { %v927_v50 = vpack.i.b16 %v923_v44, %v898_v47  ;;  %v929_v53 = vshrl.u32 %v923_v44, 16  ;;  %v924_v55 = vcombine.high %v923_v44, %v2257_v33 }
 0x2e4   : > { %v1180_v57 = vsel %vm1178_vm3, %v927_v50, 0  ;;  %v930_v58 = vpack.i.b16 %v929_v53, %v928_v51  ;;  %v933_v59 = vpack.i.b16 %v924_v55, %v899_v49  ;;  %v935_v60 = vshrl.u32 %v924_v55, 16 }
 0x2e5   : > { %1952 = vmatpush3.bf16.msra.mxu0 %v1180_v57 }
 0x2e6   : > { %v1226_v61 = vsel %vm1178_vm3, %v930_v58, 0  ;;  %1963 = vmatprep.subr.bf16.mxu0 %v2253_v4  ;;  %v936_v63 = vpack.i.b16 %v935_v60, %v934_v56  ;;  %v1272_v0 = vsel %vm1178_vm3, %v933_v59, 0 }
 0x2e7   : > { %1958 = vmatpush3.bf16.msra.mxu1 %v1226_v61 }
 0x2e8   : > { %1954 = vmatmul.mubr.msk.bf16.vlgmr.msra.gmra.mxu0 %vm1122_vm2, %v1171_v62  ;;  %1969 = vmatprep.subr.bf16.mxu1 %v2253_v4  ;;  %v1318_v2 = vsel %vm1178_vm3, %v936_v63, 0 }
 0x2e9   : > { %1964 = vmatpush3.bf16.msra.mxu0 %v1272_v0  ;;  %1965 = vmatprep.mubr.msk.bf16.mxu0 %vm2254_vm0, %v2253_v4 }
 0x2ea   : > { %1960 = vmatmul.mubr.msk.bf16.vlgmr.msra.gmra.mxu1 %vm1122_vm2, %v1172_v1  ;;  %1975 = vmatprep.subr.bf16.mxu0 %v2253_v4 }
 0x2eb   : > { %1970 = vmatpush3.bf16.msra.mxu1 %v1318_v2  ;;  %1971 = vmatprep.mubr.msk.bf16.mxu1 %vm2254_vm0, %v2253_v4 }
 0x2f5   : > { %v1155_v3 = vpop.xlane.xlu1 %1154 }
 0x2f6   : > { %2104 = vrcp.f32 %v1155_v3 }
 0x2fd   : > { %v1158_v5 = vpop.xlane.xlu0 %1157 }
 0x2fe   : > { %2106 = vrcp.f32 %v1158_v5 }
 0x303   : > { %v2105_v6 = vpop.eup %2104 }
 0x304   : > { %v1164_v7 = vmul.f32 %v2105_v6, %v2507_v52  ;;  %v2086_v52 = vld [vmem:[#allocation2 + $0x28] sm:$0xff]  }
 0x306   : > { %1169 = vst.msk [vmem:[%s2527_s23 + $0x10] sm:$0xff] %vm1122_vm2, %v1164_v7  ;;  %v1173_v8 = vpack.c.bf16 %v1164_v7, %v1164_v7 }
 0x308   : > { %1966 = vmatmul.mubr.msk.bf16.vlgmr.msra.gmra.mxu0 %vm1122_vm2, %v1173_v8 }
 0x309   : > { %1991 = vmatprep.mubr.msk.bf16.mxu0 %vm2254_vm0, %v2253_v4  ;;  %1976 = vmatpush3.bf16.msra.mxu0 %v2084_v13 }
 0x30a   : > { %1977 = vmatprep.subr.bf16.mxu0 %v2253_v4 }
 0x30b   : > { %v2107_v9 = vpop.eup %2106 }
 0x30c   : > { %v1166_v10 = vmul.f32 %v2107_v9, %v2511_v54  ;;  %v2088_v54 = vld [vmem:[#allocation2 + $0x18] sm:$0xff]  }
 0x30d   : > { %1978 = vmatpush3.bf16.msra.mxu0 %v2085_v14 }
 0x30e   : > { %1170 = vst.msk [vmem:[%s2527_s23 + $0x18] sm:$0xff] %vm1122_vm2, %v1166_v10  ;;  %v1174_v11 = vpack.c.bf16 %v1166_v10, %v1166_v10  ;;  %1979 = vmatprep.subr.bf16.mxu0 %v2253_v4 }
 0x310   : > { %1972 = vmatmul.mubr.msk.bf16.vlgmr.msra.gmra.mxu1 %vm1122_vm2, %v1174_v11 }
 0x311   : > { %1980 = vmatpush3.bf16.msra.mxu0 %v2086_v52 }
 0x312   : > { %1981 = vmatprep.subr.bf16.mxu0 %v2253_v4 }
 0x315   : > { %1982 = vmatpush3.bf16.msra.mxu0 %v2087_v15  ;;  %v2091_v15 = vld [vmem:[#allocation2] sm:$0xff]  }
 0x316   : > { %1983 = vmatprep.subr.bf16.mxu0 %v2253_v4 }
 0x319   : > { %1984 = vmatpush3.bf16.msra.mxu0 %v2088_v54 }
 0x31a   : > { %1985 = vmatprep.subr.bf16.mxu0 %v2253_v4 }
 0x31d   : > { %1986 = vmatpush3.bf16.msra.mxu0 %v2089_v16 }
 0x31e   : > { %1987 = vmatprep.subr.bf16.mxu0 %v2253_v4 }
 0x321   : > { %1988 = vmatpush3.bf16.msra.mxu0 %v2090_v18 }
 0x322   : > { %1989 = vmatprep.subr.bf16.mxu0 %v2253_v4 }
 0x325   : > { %1990 = vmatpush3.bf16.msra.mxu0 %v2091_v15 }
 0x3a8   : > { %v1216_v19 = vpop.f32.mrf.mxu0 }
 0x3a9   : > { %v1360_v28 = vpack.c.bf16 %v1216_v19, %v1216_v19 }
 0x3aa   : > { %v1955_v20 = vpop.f32.mrf.mxu0  ;;  %v1262_v21 = vpop.f32.mrf.mxu1 }
 0x3ab   : > { %v1367_v34 = vrot.slane %v1360_v28, %v2427_v12  ;;  %v1394_v4 = vpack.c.bf16 %v1262_v21, %v1262_v21 }
 0x3ac   : > { %v1219_v22 = vpop.f32.mrf.mxu0  ;;  %v1961_v23 = vpop.f32.mrf.mxu1 }
 0x3ad   : > { %v1401_v42 = vrot.slane %v1394_v4, %v2427_v12 }
 0x3ae   : > { %v1956_v24 = vpop.f32.mrf.mxu0  ;;  %v1265_v25 = vpop.f32.mrf.mxu1 }
 0x3b0   : > { %v1962_v26 = vpop.f32.mrf.mxu1 }
 0x3c8   : > { %v1308_v27 = vpop.f32.mrf.mxu0 }
 0x3c9   : > { %v1368_v29 = vpack.c.bf16 %v1308_v27, %v1308_v27 }
 0x3ca   : > { %v1967_v30 = vpop.f32.mrf.mxu0 }
 0x3cb   : > { %v1375_v31 = vrot.slane %v1368_v29, %v2427_v12 }
 0x3cc   : > { %v1311_v32 = vpop.f32.mrf.mxu0 }
 0x3cd   : > { %v1376_v36 = vcombine.low %v1367_v34, %v1375_v31  ;;  %v1377_v38 = vcombine.high %v1367_v34, %v1375_v31 }
 0x3ce   : > { %v1968_v35 = vpop.f32.mrf.mxu0 }
 0x3cf   : > { %v1384_v41 = vrot.slane %v1376_v36, %v2430_v17  ;;  %v1391_v46 = vrot.slane %v1377_v38, %v2430_v17 }
 0x3d0   : > { %v1354_v37 = vpop.f32.mrf.mxu1 }
 0x3d1   : > { %v1402_v39 = vpack.c.bf16 %v1354_v37, %v1354_v37  ;;  %v1392_v44 = vcombine.high %v1384_v41, %v2257_v33  ;;  %v1393_v53 = vcombine.high %v1391_v46, %v2257_v33  ;;  %v1432_v55 = vshrl.u32 %v1384_v41, 16 }
 0x3d2   : > { %v1973_v40 = vpop.f32.mrf.mxu1  ;;  %v1448_v61 = vshrl.u32 %v1391_v46, 16 }
 0x3d3   : > { %v1409_v43 = vrot.slane %v1402_v39, %v2427_v12  ;;  %v1440_v60 = vshrl.u32 %v1392_v44, 16  ;;  %v1456_v5 = vshrl.u32 %v1393_v53, 16 }
 0x3d4   : > { %v1357_v45 = vpop.f32.mrf.mxu1 }
 0x3d5   : > { %v1410_v47 = vcombine.low %v1401_v42, %v1409_v43  ;;  %v1411_v48 = vcombine.high %v1401_v42, %v1409_v43 }
 0x3d6   : > { %v1974_v49 = vpop.f32.mrf.mxu1 }
 0x3d7   : > { %v1418_v50 = vrot.slane %v1410_v47, %v2430_v17  ;;  %v1425_v51 = vrot.slane %v1411_v48, %v2430_v17 }
 0x3d9   : > { %v1426_v56 = vcombine.high %v1418_v50, %v2257_v33  ;;  %v1427_v57 = vcombine.high %v1425_v51, %v2257_v33  ;;  %v1430_v58 = vpack.i.b16 %v1418_v50, %v1384_v41  ;;  %v1433_v59 = vshrl.u32 %v1418_v50, 16 }
 0x3da   : > { %v1446_v62 = vpack.i.b16 %v1425_v51, %v1391_v46  ;;  %v1449_v63 = vshrl.u32 %v1425_v51, 16 }
 0x3db   : > { %v1434_v0 = vpack.i.b16 %v1433_v59, %v1432_v55  ;;  %v1438_v1 = vpack.i.b16 %v1426_v56, %v1392_v44  ;;  %v1441_v2 = vshrl.u32 %v1426_v56, 16  ;;  %v1454_v3 = vpack.i.b16 %v1427_v57, %v1393_v53 }
 0x3dc   : > { %v1450_v6 = vpack.i.b16 %v1449_v63, %v1448_v61  ;;  %v1457_v7 = vshrl.u32 %v1427_v57, 16  ;;  %v1460_v8 = vcombine.low %v1430_v58, %v1446_v62 }
 0x3dd   : > { %v1442_v9 = vpack.i.b16 %v1441_v2, %v1440_v60  ;;  %v1468_v10 = vcombine.low %v1438_v1, %v1454_v3 }
 0x3de   : > { %v1458_v11 = vpack.i.b16 %v1457_v7, %v1456_v5  ;;  %v1485_v13 = vcombine.low %v1434_v0, %v1450_v6  ;;  %v1467_v14 = vrot.slane %v1460_v8, %v2427_v12 }
 0x3df   : > { %v1475_v52 = vrot.slane %v1468_v10, %v2427_v12 }
 0x3e0   : > { %v1493_v54 = vcombine.low %v1442_v9, %v1458_v11  ;;  %v1492_v18 = vrot.slane %v1485_v13, %v2427_v12 }
 0x3e1   : > { %v1476_v16 = vcombine.low %v1467_v14, %v1475_v52 }
 0x3e2   : > { %v1500_v19 = vrot.slane %v1493_v54, %v2427_v12 }
 0x3e3   : > { %v1483_v20 = vrot.slane %v1476_v16, %v2430_v17 }
 0x3e4   : > { %v1501_v21 = vcombine.low %v1492_v18, %v1500_v19 }
 0x3e5   : > { %v1513_v23 = vshrl.u32 %v1483_v20, 16  ;;  %v1484_v25 = vcombine.high %v1483_v20, %v2257_v33 }
 0x3e6   : > { %v1508_v22 = vrot.slane %v1501_v21, %v2430_v17 }
 0x3e7   : > { %v1519_v12 = vshrl.u32 %v1484_v25, 16 }
 0x3e8   : > { %v1514_v24 = vshrl.u32 %v1508_v22, 16  ;;  %v1509_v26 = vcombine.high %v1508_v22, %v2257_v33  ;;  %v1512_v27 = vpack.i.b16 %v1508_v22, %v1483_v20 }
 0x3ea   : > { %v1515_v28 = vpack.i.b16 %v1514_v24, %v1513_v23  ;;  %v1518_v29 = vpack.i.b16 %v1509_v26, %v1484_v25  ;;  %v1520_v30 = vshrl.u32 %v1509_v26, 16 }
 0x3ec   : > { %1522 = vrot.lane.b32.xlu0 %v1515_v28, %s2250_s16  ;;  %1524 = vrot.lane.b32.xlu1 %v1518_v29, %s2252_s17  ;;  %v1521_v31 = vpack.i.b16 %v1520_v30, %v1519_v12  ;;  %s2604_s17 = scalar_lea.hbm %s2669_s7, %s1901_s30 }
 0x3f0   : > { %1526 = vrot.lane.b32.xlu1 %v1521_v31, %s2251_s12  ;;  %s2610_s12 = scalar_lea.sflag [#allocation4], %s388_s15 }
 0x45e   : > { %v1523_v17 = vpop.permute.xlu0 %1522  ;;  %v1525_v32 = vpop.permute.xlu1 %1524 }
 0x45f   : > { %v1530_v33 = vsel %vm937_vm1, %v1512_v27, %v1523_v17 }
 0x460   : > { %v1533_v34 = vsel %vm1531_vm4, %v1530_v33, %v1525_v32 }
 0x462   : > { %v1527_v35 = vpop.permute.xlu1 %1526 }
 0x463   : > { %v1536_v36 = vsel %vm1534_vm5, %v1533_v34, %v1527_v35 }
 0x464   : > { %1992 = vmatmul.mubr.bf16.vlgmr.msra.gmra.mxu0 %v1536_v36 }
 0x465   : > { %2173 = shalt.err (!%p2170_p12)
}
 0x466   : > { %s2174_s15 = scalar_lea.hbm %s2604_s17, 512  ;;  %s2178_s30 = scalar_lea.hbm %s2669_s7, 1024 }
 0x467   : > { %p2175_p1 = scmp.ne.s32.totalorder %s2604_s17, %s2174_s15  ;;  %p2179_p3 = scmp.lt.s32.totalorder %s2604_s17, %s2669_s7 }
 0x468   : > { %p2180_p6 = scmp.lt.s32.totalorder %s2178_s30, %s2174_s15 }
 0x469   : > { %p2176_p2 = pnand %p2175_p1, %p2341_p4 }
 0x46a   : > { %p2181_p8 = por %p2180_p6, %p2179_p3 }
 0x46b   : > { %p2177_p5 = pneg %p2176_p2 }
 0x46d   : > { %p2182_p10 = pnand %p2181_p8, %p2177_p5 }
 0x46f   : > { %2185 = shalt.err (!%p2182_p10)
}
 0x470   : > { %s2259_s20 = smov 128   ;;  %s2260_s27 = smov 8   ;;  %v1887_v4 = vld [vmem:[#allocation5] ss:$0 sm:$0xff] }
 0x471   : > { %2004 = dma.vmem_to_hbm [thread:$0]  (%p2341_p4), %s2606_s8, 512, %s2604_s17, %s2610_s12, %s2259_s20, %s2259_s20, %s2260_s27  }
 0x472   : > { %s1875_s22 = sshll.u32 %s2402_s18, 3 }
 0x473   : > { %s418_s23 = scalar_lea.vmem %s2667_s5, %s1875_s22  ;;  %s425_s10 = scalar_lea.vmem %s2668_s6, %s1875_s22 }
 0x474   : > { %v1649_v38 = vld [vmem:[%s418_s23] sm:$0xff] }
 0x524   : > { %v1643_v37 = vpop.f32.mrf.mxu0 }
 0x525   : > { %v1644_v39 = vadd.f32 %v1887_v4, %v1643_v37 }
 0x526   : > { %v1993_v40 = vpop.f32.mrf.mxu0 }
 0x527   : > { %v1650_v41 = vadd.f32 %v1649_v38, %v1644_v39 }
 0x528   : > { %v1646_v42 = vpop.f32.mrf.mxu0 }
 0x529   : > { %1651 = vst [vmem:[%s425_s10] sm:$0xff] %v1650_v41 }
 0x52a   : > { %v1994_v43 = vpop.f32.mrf.mxu0 }
 0x52b PF: > { %p2021_p4 = scmp.ge.s32.totalorder %s2244_s29, 2  ;;  %s1702_s11 = sand.u32 1, %s2224_s24  }
 0x52c   : > { %p2675_p11 = scmp.ne.s32.totalorder %s2671_s13, 0  ;;  %s1703_s18 = scalar_lea.sflag [#allocation4], %s1702_s11 }
 0x52e   : > { %p2014_p13 = pnand %p2021_p4, %p2675_p11 }
 0x530   : > { %p2015_p0 = pneg %p2014_p13 }
 0x532   : > { %2219 = dma.done.wait (%p2015_p0), %s1703_s18, 512  }
 0x533   : > { %2221 = vsyncadd (%p2015_p0), %s1703_s18, 4294966784  ;;  %s23_s29 = sadd.s32 1, %s2244_s29   ;;  %s2676_s24 = smov %s2228_s25 }
 0x534   : > { %p20_p7 = scmp.ge.s32.totalorder %s23_s29, 4   ;;  %s2677_s25 = smov %s2232_s26 }
 0x535   : > { %s2678_s26 = smov %s2354_s14  ;;  %s2679_s27 = smov %s2240_s28 }
 0x536   : > { %s2680_s28 = smov %s2682_s9  ;;  %22 = sbr.rel (!%p20_p7) target bundleno = 6 (0x6), region = 109 }
 0x53b   :  { %1708 = vsyncpa [#allocation3], 1 }
 0x53c   :  { %1710 = vsyncpa [#allocation3 + $0x1], 1 }
 0x53d   :  { %1711 = vsyncpa [#allocation6], 1 }
 0x53e   :  { %1712 = vsyncpa [#allocation4], 1 }
 0x53f   :  { %1714 = vsyncpa [#allocation4 + $0x1], 1 }

// kernel: layer_forward.9
= control target key start
LH: loop header
LB: loop body
LE: loop exit
PB: predicated region body
PF: predicated region fallthrough
CT: control target
= control target key end

     0   :  { %12 = vsyncpa [#allocation4], 0  ;;  %s1342_s0 = inlined_call_operand.vmem [shape: f32[16,128], index: 0, kind: input, shape index: {}]   ;;  %s1343_s1 = inlined_call_operand.hbm [shape: f32[1,128], index: 1, kind: input, shape index: {}]   ;;  %s1344_s2 = inlined_call_operand.hbm [shape: f32[1,128], index: 2, kind: input, shape index: {}]   ;;  %s1345_s3 = inlined_call_operand.vmem [shape: bf16[128,512], index: 3, kind: input, shape index: {}]   ;;  %s1346_s4 = inlined_call_operand.vmem [shape: f32[1,512], index: 4, kind: input, shape index: {}]   ;;  %s1347_s5 = inlined_call_operand.vmem [shape: bf16[512,128], index: 5, kind: input, shape index: {}]   ;;  %s1348_s6 = inlined_call_operand.hbm [shape: f32[1,128], index: 6, kind: input, shape index: {}]   ;;  %s1349_s7 = inlined_call_operand.vmem [shape: f32[16,128], index: 7, kind: output, shape index: {}]  }
   0x1   :  { %13 = vsyncpa [#allocation6], 0  ;;  %s1062_s24 = smov [#allocation5]   ;;  %s1063_s26 = smov [#allocation3]  }
   0x2   :  { %s32_s25 = sshll.u32 %s1062_s24, 4  ;;  %s22_s27 = sshll.u32 %s1063_s26, 4  ;;  %s33_s25 = int_to_ptr.vmem [resolvable:$true] %s32_s25  ;;  %s23_s27 = int_to_ptr.vmem [resolvable:$true] %s22_s27 }
   0x3   :  { %s1006_s28 = scalar_lea.vmem %s33_s25, 16  ;;  %s1010_s29 = scalar_lea.vmem %s33_s25, 32 }
   0x4   :  { %p1007_p0 = scmp.ne.s32.totalorder %s33_s25, %s1006_s28  ;;  %p1011_p1 = scmp.lt.s32.totalorder %s33_s25, %s33_s25 }
   0x5   :  { %p1012_p2 = scmp.lt.s32.totalorder %s1010_s29, %s1006_s28 }
   0x7   :  { %p1013_p3 = por %p1012_p2, %p1011_p1 }
   0x9   :  { %p1014_p4 = pnand %p1013_p3, %p1007_p0 }
   0xb   :  { %1017 = shalt.err (!%p1014_p4)
}
   0xc   :  { %35 = dma.hbm_to_vmem [thread:$0]  %s1344_s2, 16, %s33_s25, [#allocation6]  }
   0xd   :  { %s1026_s9 = scalar_lea.vmem %s23_s27, 16  ;;  %s1030_s10 = scalar_lea.vmem %s23_s27, 32 }
   0xe   :  { %p1027_p5 = scmp.ne.s32.totalorder %s23_s27, %s1026_s9  ;;  %p1031_p6 = scmp.lt.s32.totalorder %s23_s27, %s23_s27 }
   0xf   :  { %p1032_p7 = scmp.lt.s32.totalorder %s1030_s10, %s1026_s9 }
  0x11   :  { %p1033_p8 = por %p1032_p7, %p1031_p6 }
  0x13   :  { %p1034_p9 = pnand %p1033_p8, %p1027_p5 }
  0x15   :  { %1037 = shalt.err (!%p1034_p9)
}
  0x16   :  { %25 = dma.hbm_to_vmem [thread:$0]  %s1343_s1, 16, %s23_s27, [#allocation4]  }
  0x17   :  { %s1064_s13 = smov [#allocation7]  }
  0x18   :  { %s48_s14 = sshll.u32 %s1064_s13, 4  ;;  %s49_s14 = int_to_ptr.vmem [resolvable:$true] %s48_s14 }
  0x19   :  { %s1046_s15 = scalar_lea.vmem %s49_s14, 16  ;;  %s1050_s16 = scalar_lea.vmem %s49_s14, 32 }
  0x1a   :  { %p1047_p10 = scmp.ne.s32.totalorder %s49_s14, %s1046_s15  ;;  %p1051_p11 = scmp.lt.s32.totalorder %s49_s14, %s49_s14 }
  0x1b   :  { %p1052_p12 = scmp.lt.s32.totalorder %s1050_s16, %s1046_s15 }
  0x1d   :  { %p1053_p13 = por %p1052_p12, %p1051_p11 }
  0x1f   :  { %p1054_p0 = pnand %p1053_p13, %p1047_p10 }
  0x21   :  { %1057 = shalt.err (!%p1054_p0)
}
  0x22   :  { %51 = dma.hbm_to_vmem [thread:$0]  %s1348_s6, 16, %s49_s14, [#allocation6]  }
  0x23   :  { %1058 = dma.done.wait [#allocation4], 16  }
  0x24   :  { %1059 = vsyncadd [#allocation4], 4294967280 }
  0x25   :  { %1060 = dma.done.wait [#allocation6], 32  }
  0x26   :  { %1061 = vsyncadd [#allocation6], 4294967264  ;;  %v1118_v0 = vld [vmem:[%s1342_s0] sm:$0xff]  ;;  %v1123_v1 = vld [vmem:[%s1342_s0 + $0x8] sm:$0xff]  ;;  %v1065_v36 = vmov 0  }
  0x27   :  { %72 = vadd.xlane.f32.xlu0 %v1118_v0  ;;  %v914_v2 = vld [vmem:[%s1345_s3 + $0xe4] ss:$16 sps:$4 sm:$0xff]   ;;  %v916_v3 = vld [vmem:[%s1345_s3 + $0xec] ss:$16 sps:$4 sm:$0xff]   ;;  %v918_v4 = vld [vmem:[%s1345_s3 + $0xe0] ss:$16 sps:$4 sm:$0xff]   ;;  %362 = vmatprep.mubr.bf16.mxu0 %v1065_v36 }
  0x28   :  { %v919_v5 = vld [vmem:[%s1345_s3 + $0xe8] ss:$16 sps:$4 sm:$0xff]   ;;  %330 = vmatprep.subr.bf16.mxu0 %v914_v2  ;;  %373 = vmatprep.subr.bf16.mxu1 %v916_v3  ;;  %v920_v14 = vld [vmem:[%s1345_s3 + $0xc4] ss:$16 sps:$4 sm:$0xff]   ;;  %v922_v15 = vld [vmem:[%s1345_s3 + $0xcc] ss:$16 sps:$4 sm:$0xff]  }
  0x29   :  { %331 = vmatpush1.bf16.msra.mxu0 %v918_v4  ;;  %374 = vmatpush1.bf16.msra.mxu1 %v919_v5  ;;  %v924_v16 = vld [vmem:[%s1345_s3 + $0xc0] ss:$16 sps:$4 sm:$0xff]   ;;  %v925_v17 = vld [vmem:[%s1345_s3 + $0xc8] ss:$16 sps:$4 sm:$0xff]   ;;  %v926_v18 = vld [vmem:[%s1345_s3 + $0xa4] ss:$16 sps:$4 sm:$0xff]  }
  0x2a   :  { %332 = vmatprep.subr.bf16.mxu0 %v920_v14  ;;  %375 = vmatprep.subr.bf16.mxu1 %v922_v15  ;;  %v928_v19 = vld [vmem:[%s1345_s3 + $0xac] ss:$16 sps:$4 sm:$0xff]   ;;  %v930_v20 = vld [vmem:[%s1345_s3 + $0xa0] ss:$16 sps:$4 sm:$0xff]   ;;  %v931_v21 = vld [vmem:[%s1345_s3 + $0xa8] ss:$16 sps:$4 sm:$0xff]  }
  0x2b   :  { %74 = vadd.xlane.f32.xlu0 %v1123_v1  ;;  %v932_v22 = vld [vmem:[%s1345_s3 + $0x84] ss:$16 sps:$4 sm:$0xff]   ;;  %v934_v23 = vld [vmem:[%s1345_s3 + $0x8c] ss:$16 sps:$4 sm:$0xff]   ;;  %v936_v24 = vld [vmem:[%s1345_s3 + $0x80] ss:$16 sps:$4 sm:$0xff]   ;;  %405 = vmatprep.mubr.bf16.mxu1 %v1065_v36 }
  0x2c   :  { %v937_v25 = vld [vmem:[%s1345_s3 + $0x88] ss:$16 sps:$4 sm:$0xff]   ;;  %v938_v26 = vld [vmem:[%s1345_s3 + $0x64] ss:$16 sps:$4 sm:$0xff]   ;;  %v940_v27 = vld [vmem:[%s1345_s3 + $0x6c] ss:$16 sps:$4 sm:$0xff]  }
  0x2d   :  { %333 = vmatpush1.bf16.msra.mxu0 %v924_v16  ;;  %376 = vmatpush1.bf16.msra.mxu1 %v925_v17  ;;  %v942_v28 = vld [vmem:[%s1345_s3 + $0x60] ss:$16 sps:$4 sm:$0xff]   ;;  %v943_v29 = vld [vmem:[%s1345_s3 + $0x68] ss:$16 sps:$4 sm:$0xff]   ;;  %v944_v30 = vld [vmem:[%s1345_s3 + $0x44] ss:$16 sps:$4 sm:$0xff]  }
  0x2e   :  { %334 = vmatprep.subr.bf16.mxu0 %v926_v18  ;;  %377 = vmatprep.subr.bf16.mxu1 %v928_v19  ;;  %v946_v31 = vld [vmem:[%s1345_s3 + $0x4c] ss:$16 sps:$4 sm:$0xff]   ;;  %v948_v32 = vld [vmem:[%s1345_s3 + $0x40] ss:$16 sps:$4 sm:$0xff]   ;;  %v949_v33 = vld [vmem:[%s1345_s3 + $0x48] ss:$16 sps:$4 sm:$0xff]  }
  0x2f   :  { %v950_v34 = vld [vmem:[%s1345_s3 + $0x24] ss:$16 sps:$4 sm:$0xff]   ;;  %v952_v35 = vld [vmem:[%s1345_s3 + $0x2c] ss:$16 sps:$4 sm:$0xff]   ;;  %v954_v37 = vld [vmem:[%s1345_s3 + $0x20] ss:$16 sps:$4 sm:$0xff]  }
  0x30   :  { %v955_v38 = vld [vmem:[%s1345_s3 + $0x28] ss:$16 sps:$4 sm:$0xff]   ;;  %v956_v39 = vld [vmem:[%s1345_s3 + $0x4] ss:$16 sps:$4 sm:$0xff]   ;;  %v958_v40 = vld [vmem:[%s1345_s3 + $0xc] ss:$16 sps:$4 sm:$0xff]  }
  0x31   :  { %335 = vmatpush1.bf16.msra.mxu0 %v930_v20  ;;  %378 = vmatpush1.bf16.msra.mxu1 %v931_v21  ;;  %v960_v41 = vld [vmem:[%s1345_s3] ss:$16 sps:$4 sm:$0xff]   ;;  %v961_v42 = vld [vmem:[%s1345_s3 + $0x8] ss:$16 sps:$4 sm:$0xff]  }
  0x32   :  { %336 = vmatprep.subr.bf16.mxu0 %v932_v22  ;;  %379 = vmatprep.subr.bf16.mxu1 %v934_v23  ;;  %v962_v43 = vld [vmem:[%s1347_s5 + $0x78] sm:$0xff]   ;;  %v798_v53 = vld [vmem:[#allocation3] ss:$0 sm:$0xff]  ;;  %v799_v57 = vld [vmem:[#allocation5] ss:$0 sm:$0xff] }
  0x33   :  { %v963_v44 = vld [vmem:[%s1347_s5 + $0xf8] sm:$0xff]   ;;  %v966_v2 = vld [vmem:[%s1347_s5 + $0x70] sm:$0xff]   ;;  %v986_v22 = vld [vmem:[%s1347_s5 + $0x48] sm:$0xff]  }
  0x34   :  { %v964_v61 = vld [vmem:[%s1347_s5 + $0x38] sm:$0xff]   ;;  %v967_v3 = vld [vmem:[%s1347_s5 + $0xf0] sm:$0xff]   ;;  %v987_v23 = vld [vmem:[%s1347_s5 + $0xc8] sm:$0xff]  }
  0x35   :  { %337 = vmatpush1.bf16.msra.mxu0 %v936_v24  ;;  %380 = vmatpush1.bf16.msra.mxu1 %v937_v25  ;;  %v965_v62 = vld [vmem:[%s1347_s5 + $0xb8] sm:$0xff]   ;;  %v968_v4 = vld [vmem:[%s1347_s5 + $0x30] sm:$0xff]   ;;  %v988_v24 = vld [vmem:[%s1347_s5 + $0x8] sm:$0xff]  }
  0x36   :  { %338 = vmatprep.subr.bf16.mxu0 %v938_v26  ;;  %381 = vmatprep.subr.bf16.mxu1 %v940_v27  ;;  %v969_v5 = vld [vmem:[%s1347_s5 + $0xb0] sm:$0xff]   ;;  %v978_v14 = vld [vmem:[%s1347_s5 + $0x58] sm:$0xff]   ;;  %v989_v25 = vld [vmem:[%s1347_s5 + $0x88] sm:$0xff]  }
  0x37   :  { %v979_v15 = vld [vmem:[%s1347_s5 + $0xd8] sm:$0xff]   ;;  %v982_v18 = vld [vmem:[%s1347_s5 + $0x50] sm:$0xff]   ;;  %v990_v26 = vld [vmem:[%s1347_s5 + $0x40] sm:$0xff]  }
  0x38   :  { %v980_v16 = vld [vmem:[%s1347_s5 + $0x18] sm:$0xff]   ;;  %v983_v19 = vld [vmem:[%s1347_s5 + $0xd0] sm:$0xff]   ;;  %v991_v27 = vld [vmem:[%s1347_s5 + $0xc0] sm:$0xff]  }
  0x39   :  { %339 = vmatpush1.bf16.msra.mxu0 %v942_v28  ;;  %382 = vmatpush1.bf16.msra.mxu1 %v943_v29  ;;  %v981_v17 = vld [vmem:[%s1347_s5 + $0x98] sm:$0xff]   ;;  %v984_v20 = vld [vmem:[%s1347_s5 + $0x10] sm:$0xff]   ;;  %v992_v28 = vld [vmem:[%s1347_s5] sm:$0xff]  }
  0x3a   :  { %340 = vmatprep.subr.bf16.mxu0 %v944_v30  ;;  %383 = vmatprep.subr.bf16.mxu1 %v946_v31  ;;  %v985_v21 = vld [vmem:[%s1347_s5 + $0x90] sm:$0xff]   ;;  %v993_v29 = vld [vmem:[%s1347_s5 + $0x80] sm:$0xff]   ;;  %v150_v30 = vlaneseq }
  0x3b   :  { %v148_v36 = vld [vmem:[%s1346_s4] sm:$0xf] }
  0x3c   :  { %v151_v31 = vshrl.u32 %v150_v30, 7 }
  0x3d   :  { %341 = vmatpush1.bf16.msra.mxu0 %v948_v32  ;;  %384 = vmatpush1.bf16.msra.mxu1 %v949_v33 }
  0x3e   :  { %342 = vmatprep.subr.bf16.mxu0 %v950_v34  ;;  %385 = vmatprep.subr.bf16.mxu1 %v952_v35  ;;  %v156_v32 = vsub.s32 1, %v151_v31  ;;  %v164_v33 = vsub.s32 3, %v151_v31  ;;  %v152_v34 = vsub.s32 0, %v151_v31  ;;  %v160_v35 = vsub.s32 2, %v151_v31 }
  0x41   :  { %343 = vmatpush1.bf16.msra.mxu0 %v954_v37  ;;  %386 = vmatpush1.bf16.msra.mxu1 %v955_v38 }
  0x42   :  { %344 = vmatprep.subr.bf16.mxu0 %v956_v39  ;;  %387 = vmatprep.subr.bf16.mxu1 %v958_v40  ;;  %v157_v39 = vrot.slane %v148_v36, %v156_v32  ;;  %v165_v40 = vrot.slane %v148_v36, %v164_v33 }
  0x45   :  { %345 = vmatpush1.bf16.msra.mxu0 %v960_v41  ;;  %388 = vmatpush1.bf16.msra.mxu1 %v961_v42  ;;  %v153_v41 = vrot.slane %v148_v36, %v152_v34  ;;  %v161_v42 = vrot.slane %v148_v36, %v160_v35 }
  0x46   :  { %865 = vmatprep.subr.bf16.mxu0 %v962_v43  ;;  %887 = vmatprep.subr.bf16.mxu1 %v963_v44 }
  0xb0   :  { %v73_v6 = vpop.xlane.xlu0 %72 }
  0xb1   :  { %v77_v7 = vmul.f32 0.0078125, %v73_v6  ;;  %v970_v6 = vld [vmem:[%s1347_s5 + $0x68] sm:$0xff]  }
  0xb3   :  { %v1140_v8 = vsub.f32 %v1118_v0, %v77_v7  ;;  %v971_v7 = vld [vmem:[%s1347_s5 + $0xe8] sm:$0xff]  }
  0xb4   :  { %v75_v9 = vpop.xlane.xlu0 %74 }
  0xb5   :  { %v78_v10 = vmul.f32 0.0078125, %v75_v9  ;;  %v81_v11 = vmul.f32 %v1140_v8, %v1140_v8  ;;  %v973_v9 = vld [vmem:[%s1347_s5 + $0xa8] sm:$0xff]  }
  0xb7   :  { %v1145_v12 = vsub.f32 %v1123_v1, %v78_v10  ;;  %83 = vadd.xlane.f32.xlu1 %v81_v11  ;;  %v974_v10 = vld [vmem:[%s1347_s5 + $0x60] sm:$0xff]  }
  0xb8   :  { %v975_v11 = vld [vmem:[%s1347_s5 + $0xe0] sm:$0xff]  }
  0xb9   :  { %v82_v13 = vmul.f32 %v1145_v12, %v1145_v12 }
  0xbb   :  { %85 = vadd.xlane.f32.xlu1 %v82_v13  ;;  %v977_v13 = vld [vmem:[%s1347_s5 + $0xa0] sm:$0xff]  }
 0x140   :  { %v84_v45 = vpop.xlane.xlu1 %83 }
 0x141   :  { %v87_v46 = vmul.f32 0.0078125, %v84_v45 }
 0x143   :  { %v89_v47 = vadd.f32 1e-05, %v87_v46 }
 0x144   :  { %v86_v48 = vpop.xlane.xlu1 %85 }
 0x145   :  { %994 = vrsqrt.f32 %v89_v47  ;;  %v88_v49 = vmul.f32 0.0078125, %v86_v48 }
 0x147   :  { %v90_v50 = vadd.f32 1e-05, %v88_v49 }
 0x149   :  { %996 = vrsqrt.f32 %v90_v50 }
 0x152   :  { %v995_v51 = vpop.eup %994 }
 0x153   :  { %v93_v52 = vmul.f32 %v995_v51, %v1140_v8  ;;  %v972_v8 = vld [vmem:[%s1347_s5 + $0x28] sm:$0xff]  }
 0x155   :  { %v101_v56 = vmul.f32 %v798_v53, %v93_v52 }
 0x156   :  { %v997_v54 = vpop.eup %996 }
 0x157   :  { %v94_v55 = vmul.f32 %v997_v54, %v1145_v12  ;;  %v109_v59 = vadd.f32 %v799_v57, %v101_v56  ;;  %v976_v12 = vld [vmem:[%s1347_s5 + $0x20] sm:$0xff]  }
 0x159   :  { %v102_v58 = vmul.f32 %v798_v53, %v94_v55 }
 0x15b   :  { %v110_v60 = vadd.f32 %v799_v57, %v102_v58 }
 0x15d   :  { %v115_v63 = vpack.c.bf16 %v110_v60, %v109_v59 }
 0x15f   :  { %363 = vmatmul.mubr.bf16.vlgmr.msra.gmra.mxu0 %v115_v63  ;;  %406 = vmatmul.mubr.bf16.vlgmr.msra.gmra.mxu1 %v115_v63 }
 0x160   :  { %866 = vmatpush3.bf16.msra.mxu0 %v964_v61  ;;  %888 = vmatpush3.bf16.msra.mxu1 %v965_v62 }
 0x161   :  { %867 = vmatprep.subr.bf16.mxu0 %v966_v2  ;;  %889 = vmatprep.subr.bf16.mxu1 %v967_v3 }
 0x164   :  { %868 = vmatpush3.bf16.msra.mxu0 %v968_v4  ;;  %890 = vmatpush3.bf16.msra.mxu1 %v969_v5 }
 0x165   :  { %869 = vmatprep.subr.bf16.mxu0 %v970_v6  ;;  %891 = vmatprep.subr.bf16.mxu1 %v971_v7 }
 0x168   :  { %870 = vmatpush3.bf16.msra.mxu0 %v972_v8  ;;  %892 = vmatpush3.bf16.msra.mxu1 %v973_v9 }
 0x169   :  { %871 = vmatprep.subr.bf16.mxu0 %v974_v10  ;;  %893 = vmatprep.subr.bf16.mxu1 %v975_v11 }
 0x16c   :  { %872 = vmatpush3.bf16.msra.mxu0 %v976_v12  ;;  %894 = vmatpush3.bf16.msra.mxu1 %v977_v13 }
 0x16d   :  { %873 = vmatprep.subr.bf16.mxu0 %v978_v14  ;;  %895 = vmatprep.subr.bf16.mxu1 %v979_v15 }
 0x170   :  { %874 = vmatpush3.bf16.msra.mxu0 %v980_v16  ;;  %896 = vmatpush3.bf16.msra.mxu1 %v981_v17  ;;  %v864_v16 = vld [vmem:[#allocation7] ss:$0 sm:$0xff] }
 0x171   :  { %875 = vmatprep.subr.bf16.mxu0 %v982_v18  ;;  %897 = vmatprep.subr.bf16.mxu1 %v983_v19 }
 0x174   :  { %876 = vmatpush3.bf16.msra.mxu0 %v984_v20  ;;  %898 = vmatpush3.bf16.msra.mxu1 %v985_v21 }
 0x175   :  { %877 = vmatprep.subr.bf16.mxu0 %v986_v22  ;;  %899 = vmatprep.subr.bf16.mxu1 %v987_v23 }
 0x178   :  { %878 = vmatpush3.bf16.msra.mxu0 %v988_v24  ;;  %900 = vmatpush3.bf16.msra.mxu1 %v989_v25 }
 0x179   :  { %879 = vmatprep.subr.bf16.mxu0 %v990_v26  ;;  %901 = vmatprep.subr.bf16.mxu1 %v991_v27 }
 0x17c   :  { %880 = vmatpush3.bf16.msra.mxu0 %v992_v28  ;;  %902 = vmatpush3.bf16.msra.mxu1 %v993_v29 }
 0x21f   :  { %v364_v37 = vpop.f32.mrf.mxu0  ;;  %v407_v38 = vpop.f32.mrf.mxu1 }
 0x220   :  { %v365_v51 = vadd.f32 %v364_v37, %v153_v41  ;;  %v408_v52 = vadd.f32 %v407_v38, %v161_v42 }
 0x221   :  { %v366_v43 = vpop.f32.mrf.mxu0  ;;  %v409_v44 = vpop.f32.mrf.mxu1 }
 0x222   :  { %v367_v47 = vadd.f32 %v366_v43, %v157_v39  ;;  %v410_v48 = vadd.f32 %v409_v44, %v165_v40  ;;  %v416_v63 = vmax.f32 %v365_v51, 0.0  ;;  %v418_v2 = vmax.f32 %v408_v52, 0.0 }
 0x223   :  { %v368_v45 = vpop.f32.mrf.mxu0  ;;  %v411_v46 = vpop.f32.mrf.mxu1 }
 0x224   :  { %v369_v49 = vadd.f32 %v368_v45, %v153_v41  ;;  %v412_v50 = vadd.f32 %v411_v46, %v161_v42  ;;  %v417_v59 = vmax.f32 %v367_v47, 0.0  ;;  %v419_v60 = vmax.f32 %v410_v48, 0.0 }
 0x225   :  { %v370_v53 = vpop.f32.mrf.mxu0  ;;  %v413_v54 = vpop.f32.mrf.mxu1 }
 0x226   :  { %v371_v55 = vadd.f32 %v370_v53, %v157_v39  ;;  %v414_v56 = vadd.f32 %v413_v54, %v165_v40  ;;  %v420_v57 = vmax.f32 %v369_v49, 0.0  ;;  %v422_v58 = vmax.f32 %v412_v50, 0.0 }
 0x228   :  { %v421_v61 = vmax.f32 %v371_v55, 0.0  ;;  %v423_v62 = vmax.f32 %v414_v56, 0.0  ;;  %v426_v5 = vpack.c.bf16 %v420_v57, %v416_v63  ;;  %v428_v6 = vpack.c.bf16 %v422_v58, %v418_v2 }
 0x22a   :  { %v427_v3 = vpack.c.bf16 %v421_v61, %v417_v59  ;;  %v429_v4 = vpack.c.bf16 %v423_v62, %v419_v60 }
 0x22c   :  { %718 = vmatprep.mubr.bf16.mxu0 %v427_v3  ;;  %759 = vmatprep.mubr.bf16.mxu1 %v429_v4 }
 0x22d   :  { %719 = vmatmul.mubr.bf16.vlgmr.msra.gmra.mxu0 %v426_v5  ;;  %760 = vmatmul.mubr.bf16.vlgmr.msra.gmra.mxu1 %v428_v6 }
 0x2ed   :  { %v881_v7 = vpop.f32.mrf.mxu0  ;;  %v903_v8 = vpop.f32.mrf.mxu1 }
 0x2ef   :  { %v882_v9 = vpop.f32.mrf.mxu0  ;;  %v904_v10 = vpop.f32.mrf.mxu1 }
 0x2f0   :  { %v883_v11 = vadd.f32 %v882_v9, %v881_v7  ;;  %v905_v12 = vadd.f32 %v904_v10, %v903_v8 }
 0x2f1   :  { %v884_v13 = vpop.f32.mrf.mxu0  ;;  %v906_v14 = vpop.f32.mrf.mxu1 }
 0x2f2   :  { %v762_v15 = vadd.f32 %v905_v12, %v883_v11 }
 0x2f3   :  { %v885_v17 = vpop.f32.mrf.mxu0  ;;  %v907_v18 = vpop.f32.mrf.mxu1 }
 0x2f4   :  { %v886_v19 = vadd.f32 %v885_v17, %v884_v13  ;;  %v908_v20 = vadd.f32 %v907_v18, %v906_v14  ;;  %v784_v21 = vadd.f32 %v864_v16, %v762_v15 }
 0x2f6   :  { %v765_v22 = vadd.f32 %v908_v20, %v886_v19  ;;  %v788_v23 = vadd.f32 %v784_v21, %v1118_v0 }
 0x2f8   :  { %790 = vst [vmem:[%s1349_s7] sm:$0xff] %v788_v23  ;;  %v785_v24 = vadd.f32 %v864_v16, %v765_v22 }
 0x2fa   :  { %v789_v25 = vadd.f32 %v785_v24, %v1123_v1 }
 0x2fc   :  { %791 = vst [vmem:[%s1349_s7 + $0x8] sm:$0xff] %v789_v25 }
 0x2fd   :  { %796 = vsyncpa [#allocation4], 1 }
 0x2fe   :  { %797 = vsyncpa [#allocation6], 1 }

// kernel: layer_forward.10
= control target key start
LH: loop header
LB: loop body
LE: loop exit
PB: predicated region body
PF: predicated region fallthrough
CT: control target
= control target key end

     0   :  { %v256_v2 = vmov 0.0   ;;  %vm257_vm0 = vmmov 0   ;;  %s333_s0 = inlined_call_operand.vmem [shape: f32[16,128], index: 0, kind: input, shape index: {}]   ;;  %s334_s1 = inlined_call_operand.vmem [shape: bf16[128,128], index: 1, kind: input, shape index: {}]   ;;  %s335_s3 = inlined_call_operand.vmem [shape: f32[1,128], index: 3, kind: input, shape index: {}]   ;;  %s336_s4 = inlined_call_operand.vmem [shape: f32[1,128], index: 4, kind: input, shape index: {}]   ;;  %s337_s2 = inlined_call_operand.vmem [shape: f32[1,128], index: 2, kind: input, shape index: {}]   ;;  %s338_s5 = inlined_call_operand.vmem [shape: f32[16,128], index: 5, kind: output, shape index: {}]  }
   0x1   :  { %v27_v0 = vld [vmem:[%s333_s0] sm:$0xff]  ;;  %v28_v1 = vld [vmem:[%s333_s0 + $0x8] sm:$0xff]  ;;  %222 = vmatprep.subr.bf16.mxu0 %v256_v2  ;;  %v244_v3 = vld [vmem:[%s334_s1 + $0x38] sm:$0xff]   ;;  %238 = vmatprep.mubr.msk.bf16.mxu0 %vm257_vm0, %v256_v2 }
   0x2   :  { %31 = vadd.xlane.f32.xlu0 %v27_v0  ;;  %223 = vmatpush3.bf16.msra.mxu0 %v244_v3  ;;  %v245_v12 = vld [vmem:[%s334_s1 + $0x30] sm:$0xff]   ;;  %v246_v13 = vld [vmem:[%s334_s1 + $0x28] sm:$0xff]   ;;  %v247_v14 = vld [vmem:[%s334_s1 + $0x20] sm:$0xff]  }
   0x3   :  { %224 = vmatprep.subr.bf16.mxu0 %v256_v2  ;;  %v248_v15 = vld [vmem:[%s334_s1 + $0x18] sm:$0xff]   ;;  %v249_v16 = vld [vmem:[%s334_s1 + $0x10] sm:$0xff]   ;;  %v250_v17 = vld [vmem:[%s334_s1 + $0x8] sm:$0xff]  }
   0x4   :  { %v251_v18 = vld [vmem:[%s334_s1] sm:$0xff]  }
   0x5   :  { %v202_v27 = vld [vmem:[%s335_s3] ss:$0 sm:$0xff] }
   0x6   :  { %33 = vadd.xlane.f32.xlu0 %v28_v1  ;;  %225 = vmatpush3.bf16.msra.mxu0 %v245_v12  ;;  %v203_v31 = vld [vmem:[%s336_s4] ss:$0 sm:$0xff] }
   0x7   :  { %226 = vmatprep.subr.bf16.mxu0 %v256_v2  ;;  %v212_v37 = vld [vmem:[%s337_s2] ss:$0 sm:$0xff] }
   0xa   :  { %227 = vmatpush3.bf16.msra.mxu0 %v246_v13 }
   0xb   :  { %228 = vmatprep.subr.bf16.mxu0 %v256_v2 }
   0xe   :  { %229 = vmatpush3.bf16.msra.mxu0 %v247_v14 }
   0xf   :  { %230 = vmatprep.subr.bf16.mxu0 %v256_v2 }
  0x12   :  { %231 = vmatpush3.bf16.msra.mxu0 %v248_v15 }
  0x13   :  { %232 = vmatprep.subr.bf16.mxu0 %v256_v2 }
  0x16   :  { %233 = vmatpush3.bf16.msra.mxu0 %v249_v16 }
  0x17   :  { %234 = vmatprep.subr.bf16.mxu0 %v256_v2 }
  0x1a   :  { %235 = vmatpush3.bf16.msra.mxu0 %v250_v17 }
  0x1b   :  { %236 = vmatprep.subr.bf16.mxu0 %v256_v2 }
  0x1e   :  { %237 = vmatpush3.bf16.msra.mxu0 %v251_v18 }
  0x8b   :  { %v32_v4 = vpop.xlane.xlu0 %31 }
  0x8c   :  { %v36_v5 = vmul.f32 0.0078125, %v32_v4 }
  0x8e   :  { %v38_v6 = vsub.f32 %v27_v0, %v36_v5 }
  0x8f   :  { %v34_v7 = vpop.xlane.xlu0 %33 }
  0x90   :  { %v37_v8 = vmul.f32 0.0078125, %v34_v7  ;;  %v40_v9 = vmul.f32 %v38_v6, %v38_v6 }
  0x92   :  { %v39_v10 = vsub.f32 %v28_v1, %v37_v8  ;;  %42 = vadd.xlane.f32.xlu1 %v40_v9 }
  0x94   :  { %v41_v11 = vmul.f32 %v39_v10, %v39_v10 }
  0x96   :  { %44 = vadd.xlane.f32.xlu1 %v41_v11 }
 0x11b   :  { %v43_v19 = vpop.xlane.xlu1 %42 }
 0x11c   :  { %v46_v20 = vmul.f32 0.0078125, %v43_v19 }
 0x11e   :  { %v48_v21 = vadd.f32 1e-05, %v46_v20 }
 0x11f   :  { %v45_v22 = vpop.xlane.xlu1 %44 }
 0x120   :  { %252 = vrsqrt.f32 %v48_v21  ;;  %v47_v23 = vmul.f32 0.0078125, %v45_v22 }
 0x122   :  { %v49_v24 = vadd.f32 1e-05, %v47_v23 }
 0x124   :  { %254 = vrsqrt.f32 %v49_v24 }
 0x12d   :  { %v253_v25 = vpop.eup %252 }
 0x12e   :  { %v52_v26 = vmul.f32 %v253_v25, %v38_v6 }
 0x130   :  { %v60_v30 = vmul.f32 %v202_v27, %v52_v26 }
 0x131   :  { %v255_v28 = vpop.eup %254 }
 0x132   :  { %v53_v29 = vmul.f32 %v255_v28, %v39_v10  ;;  %v68_v33 = vadd.f32 %v203_v31, %v60_v30 }
 0x134   :  { %v61_v32 = vmul.f32 %v202_v27, %v53_v29 }
 0x136   :  { %v69_v34 = vadd.f32 %v203_v31, %v61_v32 }
 0x138   :  { %v72_v35 = vpack.c.bf16 %v69_v34, %v68_v33 }
 0x13a   :  { %239 = vmatmul.mubr.bf16.vlgmr.msra.gmra.mxu0 %v72_v35 }
 0x1fa   :  { %v171_v36 = vpop.f32.mrf.mxu0 }
 0x1fb   :  { %v194_v39 = vadd.f32 %v212_v37, %v171_v36 }
 0x1fc   :  { %v240_v38 = vpop.f32.mrf.mxu0 }
 0x1fd   :  { %196 = vst [vmem:[%s338_s5] sm:$0xff] %v194_v39 }
 0x1fe   :  { %v174_v40 = vpop.f32.mrf.mxu0 }
 0x1ff   :  { %v195_v42 = vadd.f32 %v212_v37, %v174_v40 }
 0x200   :  { %v241_v41 = vpop.f32.mrf.mxu0 }
 0x201   :  { %197 = vst [vmem:[%s338_s5 + $0x8] sm:$0xff] %v195_v42 }

// kernel: layer_forward.12
= control target key start
LH: loop header
LB: loop body
LE: loop exit
PB: predicated region body
PF: predicated region fallthrough
CT: control target
= control target key end

     0   :  { %13 = vsyncpa [#allocation3], 0  ;;  %s2489_s0 = inlined_call_operand.vmem [shape: f32[2,8,128], index: 0, kind: input, shape index: {}]   ;;  %s2490_s1 = inlined_call_operand.vmem [shape: f32[2,8,256], index: 1, kind: input, shape index: {}, may-alias: {1,2}]   ;;  %s2491_s2 = inlined_call_operand.vmem [shape: f32[2,8,256], index: 2, kind: input, shape index: {}, may-alias: {1,2}]   ;;  %s2492_s3 = inlined_call_operand.vmem [shape: bf16[128,128], index: 3, kind: input, shape index: {}]   ;;  %s2493_s4 = inlined_call_operand.vmem [shape: f32[1,128], index: 4, kind: input, shape index: {}]   ;;  %s2494_s5 = inlined_call_operand.vmem [shape: f32[2,8,128], index: 5, kind: input, shape index: {}]   ;;  %s2495_s6 = inlined_call_operand.vmem [shape: f32[2,8,128], index: 6, kind: output, shape index: {0}]   ;;  %s2496_s7 = inlined_call_operand.hbm [shape: f32[2,4,8,8], index: 7, kind: output, shape index: {1}]  }
   0x1   :  { %15 = vsyncpa [#allocation3 + $0x1], 0  ;;  %s2141_s24 = smov 0   ;;  %s2143_s25 = smov 0  }
   0x2   :  { %s2145_s26 = smov 0   ;;  %s2147_s27 = smov 0  }
   0x3   :  { %s2149_s28 = smov 0   ;;  %s2151_s29 = smov 0  }
   0x4 LB: > { %s1791_s30 = sadd.s32 4294967295, %s2088_s29   ;;  %s1792_s8 = sadd.s32 4294967294, %s2088_s29   ;;  %s2088_s29 = sphi %s2151_s29, %s21_s29   ;;  %s2084_s28 = sphi %s2149_s28, %s2505_s28   ;;  %s2080_s27 = sphi %s2147_s27, %s2504_s27   ;;  %s2076_s26 = sphi %s2145_s26, %s2503_s26   ;;  %s2072_s25 = sphi %s2143_s25, %s2502_s25   ;;  %s2068_s24 = sphi %s2141_s24, %s2501_s24  }
   0x5   : > { %s33_s9 = sadd.s32 1, %s2084_s28  ;;  %s220_s10 = sadd.s32 1, %s2076_s26 }
   0x6   : > { %p35_p0 = scmp.ge.s32.totalorder %s33_s9, 2  ;;  %p230_p1 = scmp.ne.s32.totalorder %s2076_s26, %s2072_s25 }
   0x7   : > { %p231_p2 = scmp.eq.s32.totalorder %s1791_s30, 1  ;;  %p236_p3 = scmp.ne.s32.totalorder %s2072_s25, %s2068_s24 }
   0x8   : > { %s2507_s9 = smov (%p35_p0, %s33_s9), 0  ;;  %p237_p5 = scmp.eq.s32.totalorder %s1792_s8, 1 }
   0x9   : > { %p2181_p4 = por %p231_p2, %p230_p1  ;;  %s215_s12 = ssub.s32 %s2084_s28, %s2507_s9 }
   0xa   : > { %p1795_p6 = scmp.ge.s32.totalorder %s2088_s29, 1  ;;  %p218_p7 = scmp.eq.s32.totalorder %s215_s12, 0 }
   0xb   : > { %p2188_p8 = por %p237_p5, %p236_p3  ;;  %p298_p9 = scmp.lt.s32.totalorder %s2088_s29, 3 }
   0xc   : > { %s2194_s14 = scalar_select %p218_p7, %s2076_s26, %s220_s10  }
   0xd   : > { %p299_p10 = pnand %p1795_p6, %p298_p9 }
   0xe   : > { %p357_p11 = scmp.lt.s32.totalorder (!%p299_p10), %s2080_s27, 1  ;;  %s2090_s30 = smov (!%p299_p10), 32  }
   0xf   : > { %302 = sbr.rel (%p299_p10) target bundleno = 1288 (0x508), region = 44  ;;  %s2091_s8 = smov (!%p299_p10), 96  }
  0x10   : > { %s2092_s10 = smov (!%p299_p10), 64   ;;  %s1829_s21 = sshll.u32 (!%p299_p10), %s2080_s27, 9 }
  0x14   : > { %s2198_s15 = scalar_select %p357_p11, %s2080_s27, 1  ;;  %v2093_v4 = vmov 0.0   ;;  %vm2094_vm0 = vmmov 0   ;;  %v2095_v5 = vmov 1983009808   ;;  %v402_v7 = vlaneseq }
  0x15   : > { %1855 = vmatprep.subr.bf16.mxu1 %v2093_v4  ;;  %1879 = vmatprep.subr.bf16.mxu0 %v2093_v4  ;;  %v400_v6 = vunpack.c.l.s4 %v2095_v5  ;;  %v2096_v10 = vmov 1934713408   ;;  %v2097_v33 = vmov 0   ;;  %vm900_vm1 = vcmask 261120   ;;  %s2098_s27 = smov [#allocation2]  }
  0x16   : > { %s1827_s16 = sshll.u32 %s2198_s15, 4  ;;  %s2202_s17 = sshll.u32 %s2198_s15, 3  ;;  %1857 = vmatprep.mubr.msk.bf16.mxu1 %vm2094_vm0, %v2093_v4  ;;  %1881 = vmatprep.mubr.msk.bf16.mxu0 %vm2094_vm0, %v2093_v4  ;;  %v403_v9 = vshrl.u32 %v402_v7, 7  ;;  %v417_v11 = vunpack.c.l.s4 %v2096_v10  ;;  %vm1085_vm2 = vcmask 64512   ;;  %vm1141_vm3 = vcmask 1043456  }
  0x17   : > { %s368_s20 = scalar_lea.vmem %s2490_s1, %s1827_s16  ;;  %s363_s23 = scalar_lea.vmem %s2489_s0, %s2202_s17  ;;  %v401_v8 = vunpack.c.0.s8 %v400_v6  ;;  %vm1494_vm4 = vcmask 523264   ;;  %vm1497_vm5 = vcmask 785408  }
  0x18   : > { %v498_v0 = vld [vmem:[%s368_s20] sm:$0xff]  ;;  %v418_v13 = vunpack.c.0.s8 %v417_v11  ;;  %s1711_s19 = scalar_lea.vmem %s2491_s2, %s1827_s16  ;;  %s2497_s15 = sand.u32 1, %s2072_s25  }
  0x19   : > { %v390_v1 = vld [vmem:[%s363_s23] sm:$0xff]  ;;  %v499_v2 = vpack.c.bf16 %v498_v0, %v498_v0  ;;  %v2225_v12 = vsub.s32 %v401_v8, %v403_v9  ;;  %s1796_s16 = sshll.u32 %s2497_s15, 5  ;;  %s2427_s23 = scalar_lea.hbm %s2496_s7, %s1829_s21 }
  0x1a   : > { %v391_v3 = vpack.c.bf16 %v390_v1, %v390_v1  ;;  %v2228_v17 = vsub.s32 %v418_v13, %v403_v9  ;;  %s2326_s20 = scalar_lea.vmem [#allocation2], %s1796_s16 }
  0x1b   : > { %505 = vrot.lane.b32.xlu1 %v499_v2, %s2090_s30  ;;  %501 = vrot.lane.b32.xlu0 %v499_v2, %s2091_s8  ;;  %v513_v22 = vrot.slane %v499_v2, %v2225_v12 }
  0x1c   : > { %v405_v28 = vrot.slane %v391_v3, %v2225_v12 }
  0x1f   : > { %503 = vrot.lane.b32.xlu0 %v499_v2, %s2092_s10  ;;  %393 = vrot.lane.b32.xlu1 %v391_v3, %s2091_s8 }
  0x23   : > { %395 = vrot.lane.b32.xlu0 %v391_v3, %s2092_s10  ;;  %397 = vrot.lane.b32.xlu1 %v391_v3, %s2090_s30 }
  0x8d   : > { %v506_v14 = vpop.permute.xlu1 %505  ;;  %v502_v15 = vpop.permute.xlu0 %501 }
  0x8e   : > { %v555_v16 = vrot.slane %v506_v14, %v2225_v12  ;;  %v547_v18 = vrot.slane %v502_v15, %v2225_v12 }
  0x90   : > { %v556_v19 = vcombine.low %v547_v18, %v555_v16  ;;  %v557_v20 = vcombine.high %v547_v18, %v555_v16 }
  0x91   : > { %v504_v21 = vpop.permute.xlu0 %503  ;;  %v394_v23 = vpop.permute.xlu1 %393 }
  0x92   : > { %v564_v24 = vrot.slane %v556_v19, %v2228_v17  ;;  %v521_v25 = vrot.slane %v504_v21, %v2225_v12  ;;  %v571_v26 = vrot.slane %v557_v20, %v2228_v17  ;;  %v439_v27 = vrot.slane %v394_v23, %v2225_v12 }
  0x94   : > { %v522_v29 = vcombine.low %v513_v22, %v521_v25  ;;  %v523_v30 = vcombine.high %v513_v22, %v521_v25  ;;  %v572_v34 = vcombine.high %v564_v24, %v2097_v33  ;;  %v573_v37 = vcombine.high %v571_v26, %v2097_v33 }
  0x95   : > { %v396_v31 = vpop.permute.xlu0 %395  ;;  %v398_v32 = vpop.permute.xlu1 %397  ;;  %v579_v38 = vshrl.u32 %v564_v24, 16  ;;  %v595_v53 = vshrl.u32 %v571_v26, 16 }
  0x96   : > { %v413_v35 = vrot.slane %v396_v31, %v2225_v12  ;;  %v447_v36 = vrot.slane %v398_v32, %v2225_v12  ;;  %v530_v39 = vrot.slane %v522_v29, %v2228_v17  ;;  %v537_v40 = vrot.slane %v523_v30, %v2228_v17 }
  0x97   : > { %v587_v57 = vshrl.u32 %v572_v34, 16  ;;  %v603_v60 = vshrl.u32 %v573_v37, 16 }
  0x98   : > { %v414_v41 = vcombine.low %v405_v28, %v413_v35  ;;  %v415_v42 = vcombine.high %v405_v28, %v413_v35  ;;  %v448_v43 = vcombine.low %v439_v27, %v447_v36  ;;  %v449_v44 = vcombine.high %v439_v27, %v447_v36 }
  0x99   : > { %v538_v45 = vcombine.high %v530_v39, %v2097_v33  ;;  %v539_v46 = vcombine.high %v537_v40, %v2097_v33  ;;  %v576_v47 = vpack.i.b16 %v564_v24, %v530_v39  ;;  %v578_v48 = vshrl.u32 %v530_v39, 16 }
  0x9a   : > { %v592_v49 = vpack.i.b16 %v571_v26, %v537_v40  ;;  %v594_v50 = vshrl.u32 %v537_v40, 16  ;;  %v422_v51 = vrot.slane %v414_v41, %v2228_v17  ;;  %v429_v52 = vrot.slane %v415_v42, %v2228_v17 }
  0x9b   : > { %v584_v54 = vpack.i.b16 %v572_v34, %v538_v45  ;;  %v586_v55 = vshrl.u32 %v538_v45, 16  ;;  %v600_v56 = vpack.i.b16 %v573_v37, %v539_v46  ;;  %v602_v58 = vshrl.u32 %v539_v46, 16 }
  0x9c   : > { %v430_v59 = vcombine.high %v422_v51, %v2097_v33  ;;  %v580_v61 = vpack.i.b16 %v579_v38, %v578_v48  ;;  %v596_v62 = vpack.i.b16 %v595_v53, %v594_v50  ;;  %v431_v63 = vcombine.high %v429_v52, %v2097_v33 }
  0x9d   : > { %v776_v0 = vcombine.low %v576_v47, %v592_v49  ;;  %v470_v1 = vshrl.u32 %v422_v51, 16  ;;  %v456_v2 = vrot.slane %v448_v43, %v2228_v17  ;;  %v463_v3 = vrot.slane %v449_v44, %v2228_v17 }
  0x9e   : > { %v588_v5 = vpack.i.b16 %v587_v57, %v586_v55  ;;  %v604_v6 = vpack.i.b16 %v603_v60, %v602_v58  ;;  %v486_v7 = vshrl.u32 %v429_v52, 16  ;;  %v784_v8 = vcombine.low %v584_v54, %v600_v56 }
  0x9f   : > { %v478_v9 = vshrl.u32 %v430_v59, 16  ;;  %v464_v10 = vcombine.high %v456_v2, %v2097_v33  ;;  %v465_v11 = vcombine.high %v463_v3, %v2097_v33  ;;  %v471_v13 = vshrl.u32 %v456_v2, 16 }
  0xa0   : > { %v494_v14 = vshrl.u32 %v431_v63, 16  ;;  %v487_v15 = vshrl.u32 %v463_v3, 16  ;;  %v791_v16 = vrot.slane %v784_v8, %v2225_v12  ;;  %v801_v18 = vcombine.low %v580_v61, %v596_v62 }
  0xa1   : > { %v472_v19 = vpack.i.b16 %v471_v13, %v470_v1  ;;  %v476_v20 = vpack.i.b16 %v464_v10, %v430_v59  ;;  %v479_v21 = vshrl.u32 %v464_v10, 16  ;;  %v492_v22 = vpack.i.b16 %v465_v11, %v431_v63 }
  0xa2   : > { %v488_v23 = vpack.i.b16 %v487_v15, %v486_v7  ;;  %v495_v24 = vshrl.u32 %v465_v11, 16  ;;  %v783_v25 = vrot.slane %v776_v0, %v2225_v12  ;;  %v468_v26 = vpack.i.b16 %v456_v2, %v422_v51 }
  0xa3   : > { %v480_v27 = vpack.i.b16 %v479_v21, %v478_v9  ;;  %v484_v28 = vpack.i.b16 %v463_v3, %v429_v52  ;;  %v809_v29 = vcombine.low %v588_v5, %v604_v6  ;;  %v808_v31 = vrot.slane %v801_v18, %v2225_v12 }
  0xa4   : > { %v496_v30 = vpack.i.b16 %v495_v24, %v494_v14  ;;  %v722_v32 = vcombine.low %v476_v20, %v492_v22  ;;  %v739_v34 = vcombine.low %v472_v19, %v488_v23  ;;  %v792_v35 = vcombine.low %v783_v25, %v791_v16 }
  0xa5   : > { %v816_v36 = vrot.slane %v809_v29, %v2225_v12  ;;  %v714_v38 = vcombine.low %v468_v26, %v484_v28 }
  0xa6   : > { %v747_v37 = vcombine.low %v480_v27, %v496_v30  ;;  %v729_v41 = vrot.slane %v722_v32, %v2225_v12  ;;  %v746_v42 = vrot.slane %v739_v34, %v2225_v12  ;;  %v799_v43 = vrot.slane %v792_v35, %v2228_v17  ;;  %v1804_v27 = vld [vmem:[%s1711_s19 + $0x8] sm:$0xff] }
  0xa7   : > { %v817_v39 = vcombine.low %v808_v31, %v816_v36  ;;  %v721_v45 = vrot.slane %v714_v38, %v2225_v12  ;;  %v607_v29 = vpack.c.bf16 %v1804_v27, %v1804_v27 }
  0xa8   : > { %v754_v40 = vrot.slane %v747_v37, %v2225_v12  ;;  %v829_v52 = vshrl.u32 %v799_v43, 16  ;;  %v800_v59 = vcombine.high %v799_v43, %v2097_v33 }
  0xa9   : > { %v824_v44 = vrot.slane %v817_v39, %v2228_v17  ;;  %v730_v49 = vcombine.low %v721_v45, %v729_v41 }
  0xaa   : > { %v755_v47 = vcombine.low %v746_v42, %v754_v40  ;;  %v835_v2 = vshrl.u32 %v800_v59, 16 }
  0xab   : > { %v828_v46 = vpack.i.b16 %v824_v44, %v799_v43  ;;  %v830_v50 = vshrl.u32 %v824_v44, 16  ;;  %v737_v53 = vrot.slane %v730_v49, %v2228_v17  ;;  %v825_v57 = vcombine.high %v824_v44, %v2097_v33 }
  0xac   : > { %v762_v51 = vrot.slane %v755_v47, %v2228_v17 }
  0xad   : > { %v905_v48 = vsel %vm900_vm1, %v828_v46, 0  ;;  %v831_v54 = vpack.i.b16 %v830_v50, %v829_v52  ;;  %v767_v60 = vshrl.u32 %v737_v53, 16  ;;  %v834_v61 = vpack.i.b16 %v825_v57, %v800_v59 }
  0xae   : > { %1856 = vmatpush3.bf16.xpose.msra.mxu1 %v905_v48  ;;  %v766_v55 = vpack.i.b16 %v762_v51, %v737_v53  ;;  %v768_v58 = vshrl.u32 %v762_v51, 16  ;;  %v836_v0 = vshrl.u32 %v825_v57, 16  ;;  %v763_v1 = vcombine.high %v762_v51, %v2097_v33 }
  0xaf   : > { %1861 = vmatprep.subr.bf16.mxu1 %v2093_v4  ;;  %v951_v56 = vsel %vm900_vm1, %v831_v54, 0  ;;  %v997_v63 = vsel %vm900_vm1, %v834_v61, 0  ;;  %v738_v3 = vcombine.high %v737_v53, %v2097_v33 }
  0xb0   : > { %v769_v62 = vpack.i.b16 %v768_v58, %v767_v60  ;;  %v837_v5 = vpack.i.b16 %v836_v0, %v835_v2  ;;  %v774_v8 = vshrl.u32 %v763_v1, 16  ;;  %v621_v0 = vrot.slane %v607_v29, %v2225_v12 }
  0xb1   : > { %v772_v6 = vpack.i.b16 %v763_v1, %v738_v3  ;;  %v773_v9 = vshrl.u32 %v738_v3, 16 }
  0xb2   : > { %v1043_v7 = vsel %vm900_vm1, %v837_v5, 0 }
  0xb3   : > { %v775_v10 = vpack.i.b16 %v774_v8, %v773_v9 }
  0xb5   : > { %1858 = vmatmul.mubr.msk.bf16.vlgmr.msra.gmra.mxu1 %vm900_vm1, %v766_v55 }
  0xb6   : > { %1862 = vmatpush3.bf16.xpose.msra.mxu1 %v951_v56  ;;  %1863 = vmatprep.mubr.msk.bf16.mxu1 %vm2094_vm0, %v2093_v4 }
  0xb7   : > { %1867 = vmatprep.subr.bf16.mxu1 %v2093_v4 }
  0xbd   : > { %1864 = vmatmul.mubr.msk.bf16.vlgmr.msra.gmra.mxu1 %vm900_vm1, %v769_v62 }
  0xbe   : > { %1868 = vmatpush3.bf16.xpose.msra.mxu1 %v997_v63  ;;  %1869 = vmatprep.mubr.msk.bf16.mxu1 %vm2094_vm0, %v2093_v4 }
  0xbf   : > { %1873 = vmatprep.subr.bf16.mxu1 %v2093_v4 }
  0xc5   : > { %1870 = vmatmul.mubr.msk.bf16.vlgmr.msra.gmra.mxu1 %vm900_vm1, %v772_v6 }
  0xc6   : > { %1874 = vmatpush3.bf16.xpose.msra.mxu1 %v1043_v7  ;;  %1875 = vmatprep.mubr.msk.bf16.mxu1 %vm2094_vm0, %v2093_v4 }
  0xc7   : > { %1885 = vmatprep.subr.bf16.mxu1 %v2093_v4 }
  0xcd   : > { %1876 = vmatmul.mubr.msk.bf16.vlgmr.msra.gmra.mxu1 %vm900_vm1, %v775_v10 }
  0xce   : > { %1887 = vmatprep.mubr.msk.bf16.mxu1 %vm2094_vm0, %v2093_v4 }
 0x175   : > { %v941_v11 = vpop.f32.mrf.mxu1 }
 0x176   : > { %v1086_v13 = vsel %vm1085_vm2, %v941_v11, -inf }
 0x177   : > { %1087 = vmax.xlane.f32.xlu0 %v1086_v13  ;;  %v1859_v14 = vpop.f32.mrf.mxu1 }
 0x179   : > { %v944_v15 = vpop.f32.mrf.mxu1 }
 0x17b   : > { %v1860_v16 = vpop.f32.mrf.mxu1 }
 0x17d   : > { %v987_v18 = vpop.f32.mrf.mxu1 }
 0x17e   : > { %v1089_v19 = vsel %vm1085_vm2, %v987_v18, -inf }
 0x17f   : > { %1090 = vmax.xlane.f32.xlu1 %v1089_v19  ;;  %v1865_v20 = vpop.f32.mrf.mxu1 }
 0x181   : > { %v990_v21 = vpop.f32.mrf.mxu1 }
 0x183   : > { %v1866_v22 = vpop.f32.mrf.mxu1 }
 0x185   : > { %v1033_v23 = vpop.f32.mrf.mxu1 }
 0x186   : > { %v1092_v24 = vsel %vm1085_vm2, %v1033_v23, -inf }
 0x187   : > { %1093 = vmax.xlane.f32.xlu0 %v1092_v24  ;;  %v1871_v25 = vpop.f32.mrf.mxu1 }
 0x189   : > { %v1036_v26 = vpop.f32.mrf.mxu1 }
 0x18b   : > { %v1872_v28 = vpop.f32.mrf.mxu1 }
 0x18d   : > { %v1079_v30 = vpop.f32.mrf.mxu1 }
 0x18e   : > { %v1095_v31 = vsel %vm1085_vm2, %v1079_v30, -inf }
 0x18f   : > { %1096 = vmax.xlane.f32.xlu0 %v1095_v31  ;;  %v1877_v32 = vpop.f32.mrf.mxu1 }
 0x190   : > { %609 = vrot.lane.b32.xlu1 %v607_v29, %s2091_s8 }
 0x191   : > { %v1082_v34 = vpop.f32.mrf.mxu1 }
 0x193   : > { %v1878_v35 = vpop.f32.mrf.mxu1 }
 0x200   : > { %v1088_v36 = vpop.xlane.xlu0 %1087 }
 0x201   : > { %v1098_v37 = vsub.f32 %v941_v11, %v1088_v36 }
 0x203   : > { %v1102_v38 = vmul.f32 1.442695, %v1098_v37 }
 0x205   : > { %1996 = vpow2.f32 %v1102_v38 }
 0x208   : > { %v1091_v39 = vpop.xlane.xlu1 %1090 }
 0x209   : > { %v1099_v40 = vsub.f32 %v987_v18, %v1091_v39 }
 0x20b   : > { %v1104_v41 = vmul.f32 1.442695, %v1099_v40 }
 0x20c   : > { %v610_v56 = vpop.permute.xlu1 %609 }
 0x20d   : > { %1998 = vpow2.f32 %v1104_v41  ;;  %v655_v60 = vrot.slane %v610_v56, %v2225_v12 }
 0x210   : > { %v1094_v46 = vpop.xlane.xlu0 %1093 }
 0x211   : > { %v1100_v47 = vsub.f32 %v1033_v23, %v1094_v46 }
 0x212   : > { %v1997_v42 = vpop.eup %1996 }
 0x213   : > { %v1110_v43 = vsel %vm1085_vm2, %v1997_v42, 0.0  ;;  %v1106_v48 = vmul.f32 1.442695, %v1100_v47 }
 0x214   : > { %1111 = vadd.xlane.f32.xlu1 %v1110_v43 }
 0x215   : > { %2000 = vpow2.f32 %v1106_v48 }
 0x218   : > { %v1097_v49 = vpop.xlane.xlu0 %1096 }
 0x219   : > { %v1101_v50 = vsub.f32 %v1079_v30, %v1097_v49 }
 0x21a   : > { %v2300_v44 = vpop.eup %1998 }
 0x21b   : > { %v1113_v45 = vsel %vm1085_vm2, %v2300_v44, 0.0  ;;  %v1108_v51 = vmul.f32 1.442695, %v1101_v50 }
 0x21c   : > { %1114 = vadd.xlane.f32.xlu0 %v1113_v45 }
 0x21d   : > { %2002 = vpow2.f32 %v1108_v51 }
 0x222   : > { %v2306_v52 = vpop.eup %2000 }
 0x223   : > { %v1116_v53 = vsel %vm1085_vm2, %v2306_v52, 0.0 }
 0x225   : > { %613 = vrot.lane.b32.xlu1 %v607_v29, %s2090_s30 }
 0x22a   : > { %v2310_v54 = vpop.eup %2002 }
 0x22b   : > { %v1119_v55 = vsel %vm1085_vm2, %v2310_v54, 0.0 }
 0x232   : > { %611 = vrot.lane.b32.xlu0 %v607_v29, %s2092_s10 }
 0x249   : > { %1117 = vadd.xlane.f32.xlu1 %v1116_v53 }
 0x251   : > { %1120 = vadd.xlane.f32.xlu0 %v1119_v55 }
 0x29d   : > { %v1112_v57 = vpop.xlane.xlu1 %1111 }
 0x29e   : > { %2004 = vrcp.f32 %v1112_v57 }
 0x2a1   : > { %v614_v58 = vpop.permute.xlu1 %613 }
 0x2a2   : > { %v663_v59 = vrot.slane %v614_v58, %v2225_v12 }
 0x2a4   : > { %v664_v61 = vcombine.low %v655_v60, %v663_v59  ;;  %v665_v63 = vcombine.high %v655_v60, %v663_v59 }
 0x2a5   : > { %v1115_v62 = vpop.xlane.xlu0 %1114 }
 0x2a6   : > { %2006 = vrcp.f32 %v1115_v62  ;;  %v672_v1 = vrot.slane %v664_v61, %v2228_v17  ;;  %v679_v6 = vrot.slane %v665_v63, %v2228_v17 }
 0x2a8   : > { %v680_v10 = vcombine.high %v672_v1, %v2097_v33  ;;  %v681_v14 = vcombine.high %v679_v6, %v2097_v33  ;;  %v687_v15 = vshrl.u32 %v672_v1, 16  ;;  %v703_v22 = vshrl.u32 %v679_v6, 16 }
 0x2a9   : > { %v612_v2 = vpop.permute.xlu0 %611 }
 0x2aa   : > { %v629_v3 = vrot.slane %v612_v2, %v2225_v12  ;;  %v695_v21 = vshrl.u32 %v680_v10, 16  ;;  %v711_v30 = vshrl.u32 %v681_v14, 16 }
 0x2ab   : > { %v2005_v5 = vpop.eup %2004 }
 0x2ac   : > { %v630_v7 = vcombine.low %v621_v0, %v629_v3  ;;  %v631_v8 = vcombine.high %v621_v0, %v629_v3  ;;  %v1123_v9 = vmul.f32 %v2005_v5, %v1997_v42 }
 0x2ae   : > { %v638_v11 = vrot.slane %v630_v7, %v2228_v17  ;;  %v645_v13 = vrot.slane %v631_v8, %v2228_v17  ;;  %1130 = vst.msk [vmem:[%s2326_s20] sm:$0xff] %vm1085_vm2, %v1123_v9  ;;  %v1134_v62 = vpack.c.bf16 %v1123_v9, %v1123_v9 }
 0x2b0   : > { %v646_v16 = vcombine.high %v638_v11, %v2097_v33  ;;  %v647_v18 = vcombine.high %v645_v13, %v2097_v33  ;;  %v684_v19 = vpack.i.b16 %v672_v1, %v638_v11  ;;  %v686_v20 = vshrl.u32 %v638_v11, 16 }
 0x2b1   : > { %v700_v23 = vpack.i.b16 %v679_v6, %v645_v13  ;;  %v702_v24 = vshrl.u32 %v645_v13, 16  ;;  %v1989_v13 = vld [vmem:[%s2492_s3 + $0x30] sm:$0xff]  }
 0x2b2   : > { %v688_v25 = vpack.i.b16 %v687_v15, %v686_v20  ;;  %v692_v26 = vpack.i.b16 %v680_v10, %v646_v16  ;;  %v694_v27 = vshrl.u32 %v646_v16, 16  ;;  %v708_v28 = vpack.i.b16 %v681_v14, %v647_v18  ;;  %v1991_v14 = vld [vmem:[%s2492_s3 + $0x20] sm:$0xff]   ;;  %v1992_v15 = vld [vmem:[%s2492_s3 + $0x18] sm:$0xff]   ;;  %v1993_v16 = vld [vmem:[%s2492_s3 + $0x10] sm:$0xff]  }
 0x2b3   : > { %v2007_v29 = vpop.eup %2006  ;;  %v704_v31 = vpack.i.b16 %v703_v22, %v702_v24  ;;  %v710_v32 = vshrl.u32 %v647_v18, 16  ;;  %v838_v34 = vcombine.low %v684_v19, %v700_v23  ;;  %v1994_v18 = vld [vmem:[%s2492_s3 + $0x8] sm:$0xff]  }
 0x2b4   : > { %v696_v35 = vpack.i.b16 %v695_v21, %v694_v27  ;;  %v846_v36 = vcombine.low %v692_v26, %v708_v28  ;;  %v1125_v37 = vmul.f32 %v2007_v29, %v2300_v44 }
 0x2b5   : > { %v712_v38 = vpack.i.b16 %v711_v30, %v710_v32  ;;  %v863_v39 = vcombine.low %v688_v25, %v704_v31  ;;  %v845_v40 = vrot.slane %v838_v34, %v2225_v12 }
 0x2b6   : > { %v853_v41 = vrot.slane %v846_v36, %v2225_v12  ;;  %1131 = vst.msk [vmem:[%s2326_s20 + $0x8] sm:$0xff] %vm1085_vm2, %v1125_v37  ;;  %v1135_v1 = vpack.c.bf16 %v1125_v37, %v1125_v37 }
 0x2b7   : > { %v871_v42 = vcombine.low %v696_v35, %v712_v38  ;;  %v870_v45 = vrot.slane %v863_v39, %v2225_v12 }
 0x2b8   : > { %v854_v43 = vcombine.low %v845_v40, %v853_v41 }
 0x2b9   : > { %v878_v46 = vrot.slane %v871_v42, %v2225_v12 }
 0x2ba   : > { %v861_v47 = vrot.slane %v854_v43, %v2228_v17 }
 0x2bb   : > { %v879_v48 = vcombine.low %v870_v45, %v878_v46 }
 0x2bc   : > { %v862_v49 = vcombine.high %v861_v47, %v2097_v33  ;;  %v891_v51 = vshrl.u32 %v861_v47, 16 }
 0x2bd   : > { %v886_v44 = vrot.slane %v879_v48, %v2228_v17 }
 0x2be   : > { %v897_v56 = vshrl.u32 %v862_v49, 16 }
 0x2bf   : > { %v890_v50 = vpack.i.b16 %v886_v44, %v861_v47  ;;  %v892_v53 = vshrl.u32 %v886_v44, 16  ;;  %v887_v55 = vcombine.high %v886_v44, %v2097_v33 }
 0x2c1   : > { %v1143_v57 = vsel %vm1141_vm3, %v890_v50, 0  ;;  %v893_v58 = vpack.i.b16 %v892_v53, %v891_v51  ;;  %v896_v59 = vpack.i.b16 %v887_v55, %v862_v49  ;;  %v898_v60 = vshrl.u32 %v887_v55, 16 }
 0x2c2   : > { %1880 = vmatpush3.bf16.msra.mxu0 %v1143_v57 }
 0x2c3   : > { %v1189_v61 = vsel %vm1141_vm3, %v893_v58, 0  ;;  %1891 = vmatprep.subr.bf16.mxu0 %v2093_v4  ;;  %v899_v63 = vpack.i.b16 %v898_v60, %v897_v56  ;;  %v1235_v0 = vsel %vm1141_vm3, %v896_v59, 0 }
 0x2c4   : > { %1886 = vmatpush3.bf16.msra.mxu1 %v1189_v61 }
 0x2c5   : > { %1882 = vmatmul.mubr.msk.bf16.vlgmr.msra.gmra.mxu0 %vm1085_vm2, %v1134_v62  ;;  %1897 = vmatprep.subr.bf16.mxu1 %v2093_v4  ;;  %v1281_v2 = vsel %vm1141_vm3, %v899_v63, 0 }
 0x2c6   : > { %1892 = vmatpush3.bf16.msra.mxu0 %v1235_v0  ;;  %1893 = vmatprep.mubr.msk.bf16.mxu0 %vm2094_vm0, %v2093_v4 }
 0x2c7   : > { %1888 = vmatmul.mubr.msk.bf16.vlgmr.msra.gmra.mxu1 %vm1085_vm2, %v1135_v1  ;;  %1903 = vmatprep.subr.bf16.mxu0 %v2093_v4 }
 0x2c8   : > { %1898 = vmatpush3.bf16.msra.mxu1 %v1281_v2  ;;  %1899 = vmatprep.mubr.msk.bf16.mxu1 %vm2094_vm0, %v2093_v4 }
 0x2d2   : > { %v1118_v3 = vpop.xlane.xlu1 %1117 }
 0x2d3   : > { %2008 = vrcp.f32 %v1118_v3 }
 0x2da   : > { %v1121_v5 = vpop.xlane.xlu0 %1120 }
 0x2db   : > { %2010 = vrcp.f32 %v1121_v5 }
 0x2e0   : > { %v2009_v6 = vpop.eup %2008 }
 0x2e1   : > { %v1127_v7 = vmul.f32 %v2009_v6, %v2306_v52  ;;  %v1988_v52 = vld [vmem:[%s2492_s3 + $0x38] sm:$0xff]  }
 0x2e3   : > { %1132 = vst.msk [vmem:[%s2326_s20 + $0x10] sm:$0xff] %vm1085_vm2, %v1127_v7  ;;  %v1136_v8 = vpack.c.bf16 %v1127_v7, %v1127_v7 }
 0x2e5   : > { %1894 = vmatmul.mubr.msk.bf16.vlgmr.msra.gmra.mxu0 %vm1085_vm2, %v1136_v8 }
 0x2e6   : > { %1919 = vmatprep.mubr.msk.bf16.mxu0 %vm2094_vm0, %v2093_v4  ;;  %1904 = vmatpush3.bf16.msra.mxu0 %v1988_v52 }
 0x2e7   : > { %1905 = vmatprep.subr.bf16.mxu0 %v2093_v4 }
 0x2e8   : > { %v2011_v9 = vpop.eup %2010 }
 0x2e9   : > { %v1129_v10 = vmul.f32 %v2011_v9, %v2310_v54  ;;  %v1990_v54 = vld [vmem:[%s2492_s3 + $0x28] sm:$0xff]  }
 0x2ea   : > { %1906 = vmatpush3.bf16.msra.mxu0 %v1989_v13 }
 0x2eb   : > { %1133 = vst.msk [vmem:[%s2326_s20 + $0x18] sm:$0xff] %vm1085_vm2, %v1129_v10  ;;  %v1137_v11 = vpack.c.bf16 %v1129_v10, %v1129_v10  ;;  %1907 = vmatprep.subr.bf16.mxu0 %v2093_v4 }
 0x2ed   : > { %1900 = vmatmul.mubr.msk.bf16.vlgmr.msra.gmra.mxu1 %vm1085_vm2, %v1137_v11 }
 0x2ee   : > { %1908 = vmatpush3.bf16.msra.mxu0 %v1990_v54 }
 0x2ef   : > { %1909 = vmatprep.subr.bf16.mxu0 %v2093_v4 }
 0x2f2   : > { %1910 = vmatpush3.bf16.msra.mxu0 %v1991_v14  ;;  %v1995_v14 = vld [vmem:[%s2492_s3] sm:$0xff]  }
 0x2f3   : > { %1911 = vmatprep.subr.bf16.mxu0 %v2093_v4 }
 0x2f6   : > { %1912 = vmatpush3.bf16.msra.mxu0 %v1992_v15 }
 0x2f7   : > { %1913 = vmatprep.subr.bf16.mxu0 %v2093_v4 }
 0x2fa   : > { %1914 = vmatpush3.bf16.msra.mxu0 %v1993_v16 }
 0x2fb   : > { %1915 = vmatprep.subr.bf16.mxu0 %v2093_v4 }
 0x2fe   : > { %1916 = vmatpush3.bf16.msra.mxu0 %v1994_v18 }
 0x2ff   : > { %1917 = vmatprep.subr.bf16.mxu0 %v2093_v4 }
 0x302   : > { %1918 = vmatpush3.bf16.msra.mxu0 %v1995_v14 }
 0x385   : > { %v1179_v19 = vpop.f32.mrf.mxu0 }
 0x386   : > { %v1323_v28 = vpack.c.bf16 %v1179_v19, %v1179_v19 }
 0x387   : > { %v1883_v20 = vpop.f32.mrf.mxu0  ;;  %v1225_v21 = vpop.f32.mrf.mxu1 }
 0x388   : > { %v1330_v34 = vrot.slane %v1323_v28, %v2225_v12  ;;  %v1357_v4 = vpack.c.bf16 %v1225_v21, %v1225_v21 }
 0x389   : > { %v1182_v22 = vpop.f32.mrf.mxu0  ;;  %v1889_v23 = vpop.f32.mrf.mxu1 }
 0x38a   : > { %v1364_v42 = vrot.slane %v1357_v4, %v2225_v12 }
 0x38b   : > { %v1884_v24 = vpop.f32.mrf.mxu0  ;;  %v1228_v25 = vpop.f32.mrf.mxu1 }
 0x38d   : > { %v1890_v26 = vpop.f32.mrf.mxu1 }
 0x3a5   : > { %v1271_v27 = vpop.f32.mrf.mxu0 }
 0x3a6   : > { %v1331_v29 = vpack.c.bf16 %v1271_v27, %v1271_v27 }
 0x3a7   : > { %v1895_v30 = vpop.f32.mrf.mxu0 }
 0x3a8   : > { %v1338_v31 = vrot.slane %v1331_v29, %v2225_v12 }
 0x3a9   : > { %v1274_v32 = vpop.f32.mrf.mxu0 }
 0x3aa   : > { %v1339_v36 = vcombine.low %v1330_v34, %v1338_v31  ;;  %v1340_v38 = vcombine.high %v1330_v34, %v1338_v31 }
 0x3ab   : > { %v1896_v35 = vpop.f32.mrf.mxu0 }
 0x3ac   : > { %v1347_v41 = vrot.slane %v1339_v36, %v2228_v17  ;;  %v1354_v46 = vrot.slane %v1340_v38, %v2228_v17 }
 0x3ad   : > { %v1317_v37 = vpop.f32.mrf.mxu1 }
 0x3ae   : > { %v1365_v39 = vpack.c.bf16 %v1317_v37, %v1317_v37  ;;  %v1355_v44 = vcombine.high %v1347_v41, %v2097_v33  ;;  %v1356_v53 = vcombine.high %v1354_v46, %v2097_v33  ;;  %v1395_v55 = vshrl.u32 %v1347_v41, 16 }
 0x3af   : > { %v1901_v40 = vpop.f32.mrf.mxu1  ;;  %v1411_v61 = vshrl.u32 %v1354_v46, 16 }
 0x3b0   : > { %v1372_v43 = vrot.slane %v1365_v39, %v2225_v12  ;;  %v1403_v60 = vshrl.u32 %v1355_v44, 16  ;;  %v1419_v5 = vshrl.u32 %v1356_v53, 16 }
 0x3b1   : > { %v1320_v45 = vpop.f32.mrf.mxu1 }
 0x3b2   : > { %v1373_v47 = vcombine.low %v1364_v42, %v1372_v43  ;;  %v1374_v48 = vcombine.high %v1364_v42, %v1372_v43 }
 0x3b3   : > { %v1902_v49 = vpop.f32.mrf.mxu1 }
 0x3b4   : > { %v1381_v50 = vrot.slane %v1373_v47, %v2228_v17  ;;  %v1388_v51 = vrot.slane %v1374_v48, %v2228_v17 }
 0x3b6   : > { %v1389_v56 = vcombine.high %v1381_v50, %v2097_v33  ;;  %v1390_v57 = vcombine.high %v1388_v51, %v2097_v33  ;;  %v1393_v58 = vpack.i.b16 %v1381_v50, %v1347_v41  ;;  %v1396_v59 = vshrl.u32 %v1381_v50, 16 }
 0x3b7   : > { %v1409_v62 = vpack.i.b16 %v1388_v51, %v1354_v46  ;;  %v1412_v63 = vshrl.u32 %v1388_v51, 16 }
 0x3b8   : > { %v1397_v0 = vpack.i.b16 %v1396_v59, %v1395_v55  ;;  %v1401_v1 = vpack.i.b16 %v1389_v56, %v1355_v44  ;;  %v1404_v2 = vshrl.u32 %v1389_v56, 16  ;;  %v1417_v3 = vpack.i.b16 %v1390_v57, %v1356_v53 }
 0x3b9   : > { %v1413_v6 = vpack.i.b16 %v1412_v63, %v1411_v61  ;;  %v1420_v7 = vshrl.u32 %v1390_v57, 16  ;;  %v1423_v8 = vcombine.low %v1393_v58, %v1409_v62 }
 0x3ba   : > { %v1405_v9 = vpack.i.b16 %v1404_v2, %v1403_v60  ;;  %v1431_v10 = vcombine.low %v1401_v1, %v1417_v3 }
 0x3bb   : > { %v1421_v11 = vpack.i.b16 %v1420_v7, %v1419_v5  ;;  %v1448_v52 = vcombine.low %v1397_v0, %v1413_v6  ;;  %v1430_v13 = vrot.slane %v1423_v8, %v2225_v12 }
 0x3bc   : > { %v1438_v54 = vrot.slane %v1431_v10, %v2225_v12 }
 0x3bd   : > { %v1456_v15 = vcombine.low %v1405_v9, %v1421_v11  ;;  %v1455_v18 = vrot.slane %v1448_v52, %v2225_v12 }
 0x3be   : > { %v1439_v16 = vcombine.low %v1430_v13, %v1438_v54 }
 0x3bf   : > { %v1463_v19 = vrot.slane %v1456_v15, %v2225_v12 }
 0x3c0   : > { %v1446_v20 = vrot.slane %v1439_v16, %v2228_v17 }
 0x3c1   : > { %v1464_v21 = vcombine.low %v1455_v18, %v1463_v19 }
 0x3c2   : > { %v1476_v23 = vshrl.u32 %v1446_v20, 16  ;;  %v1447_v25 = vcombine.high %v1446_v20, %v2097_v33 }
 0x3c3   : > { %v1471_v22 = vrot.slane %v1464_v21, %v2228_v17 }
 0x3c4   : > { %v1482_v12 = vshrl.u32 %v1447_v25, 16 }
 0x3c5   : > { %v1477_v24 = vshrl.u32 %v1471_v22, 16  ;;  %v1472_v26 = vcombine.high %v1471_v22, %v2097_v33  ;;  %v1475_v27 = vpack.i.b16 %v1471_v22, %v1446_v20 }
 0x3c7   : > { %v1478_v28 = vpack.i.b16 %v1477_v24, %v1476_v23  ;;  %v1481_v29 = vpack.i.b16 %v1472_v26, %v1447_v25  ;;  %v1483_v30 = vshrl.u32 %v1472_v26, 16 }
 0x3c9   : > { %1485 = vrot.lane.b32.xlu0 %v1478_v28, %s2090_s30  ;;  %1487 = vrot.lane.b32.xlu1 %v1481_v29, %s2092_s10  ;;  %v1484_v31 = vpack.i.b16 %v1483_v30, %v1482_v12  ;;  %s1640_s30 = sshll.u32 %s2326_s20, 4  ;;  %s2016_s20 = sshll.u32 %s2098_s27, 4  ;;  %s2429_s30 = int_to_ptr.vmem [resolvable:$true] %s1640_s30  ;;  %s2017_s20 = int_to_ptr.vmem [resolvable:$false] %s2016_s20 }
 0x3ca   : > { %s2012_s18 = scalar_lea.vmem %s2429_s30, 512  ;;  %s2018_s15 = scalar_lea.vmem %s2017_s20, 1024 }
 0x3cb   : > { %p2013_p12 = scmp.ne.s32.totalorder %s2429_s30, %s2012_s18  ;;  %p2019_p1 = scmp.lt.s32.totalorder %s2429_s30, %s2017_s20 }
 0x3cc   : > { %p2020_p2 = scmp.lt.s32.totalorder %s2018_s15, %s2012_s18 }
 0x3cd   : > { %1489 = vrot.lane.b32.xlu1 %v1484_v31, %s2091_s8  ;;  %s2500_s8 = sand.u32 1, %s2072_s25   ;;  %p2014_p13 = pnand %p2013_p12, %p2181_p4 }
 0x3ce   : > { %s2433_s12 = scalar_lea.sflag [#allocation3], %s2500_s8  ;;  %p2021_p3 = por %p2020_p2, %p2019_p1 }
 0x3cf   : > { %p2015_p0 = pneg %p2014_p13 }
 0x3d1   : > { %p2022_p5 = pnand %p2021_p3, %p2015_p0 }
 0x43b   : > { %v1486_v17 = vpop.permute.xlu0 %1485  ;;  %v1488_v32 = vpop.permute.xlu1 %1487 }
 0x43c   : > { %v1493_v33 = vsel %vm900_vm1, %v1475_v27, %v1486_v17 }
 0x43d   : > { %v1496_v34 = vsel %vm1494_vm4, %v1493_v33, %v1488_v32 }
 0x43f   : > { %v1490_v35 = vpop.permute.xlu1 %1489 }
 0x440   : > { %v1499_v36 = vsel %vm1497_vm5, %v1496_v34, %v1490_v35 }
 0x441   : > { %1920 = vmatmul.mubr.bf16.vlgmr.msra.gmra.mxu0 %v1499_v36 }
 0x442   : > { %2025 = shalt.err (!%p2022_p5)
}
 0x443   : > { %s2026_s19 = scalar_lea.hbm %s2427_s23, 512  ;;  %s2030_s22 = scalar_lea.hbm %s2496_s7, 1024 }
 0x444   : > { %p2027_p6 = scmp.ne.s32.totalorder %s2427_s23, %s2026_s19  ;;  %p2031_p10 = scmp.lt.s32.totalorder %s2427_s23, %s2496_s7 }
 0x445   : > { %p2032_p11 = scmp.lt.s32.totalorder %s2030_s22, %s2026_s19 }
 0x446   : > { %p2028_p7 = pnand %p2027_p6, %p2181_p4 }
 0x447   : > { %p2033_p12 = por %p2032_p11, %p2031_p10 }
 0x448   : > { %p2029_p9 = pneg %p2028_p7 }
 0x44a   : > { %p2034_p13 = pnand %p2033_p12, %p2029_p9 }
 0x44c   : > { %2037 = shalt.err (!%p2034_p13)
}
 0x44d   : > { %s2099_s18 = smov 128   ;;  %s2100_s27 = smov 8   ;;  %v1813_v4 = vld [vmem:[%s2493_s4] ss:$0 sm:$0xff] }
 0x44e   : > { %1923 = dma.vmem_to_hbm [thread:$0]  (%p2181_p4), %s2429_s30, 512, %s2427_s23, %s2433_s12, %s2099_s18, %s2099_s18, %s2100_s27  }
 0x44f   : > { %s381_s16 = scalar_lea.vmem %s2494_s5, %s2202_s17  ;;  %s388_s8 = scalar_lea.vmem %s2495_s6, %s2202_s17 }
 0x450   : > { %v1612_v38 = vld [vmem:[%s381_s16] sm:$0xff] }
 0x501   : > { %v1606_v37 = vpop.f32.mrf.mxu0 }
 0x502   : > { %v1607_v39 = vadd.f32 %v1813_v4, %v1606_v37 }
 0x503   : > { %v1921_v40 = vpop.f32.mrf.mxu0 }
 0x504   : > { %v1613_v41 = vadd.f32 %v1612_v38, %v1607_v39 }
 0x505   : > { %v1609_v42 = vpop.f32.mrf.mxu0 }
 0x506   : > { %1614 = vst [vmem:[%s388_s8] sm:$0xff] %v1613_v41 }
 0x507   : > { %v1922_v43 = vpop.f32.mrf.mxu0 }
 0x508 PF: > { %p1929_p4 = scmp.ge.s32.totalorder %s2088_s29, 2  ;;  %s1665_s11 = sand.u32 1, %s2068_s24  }
 0x509   : > { %s1666_s30 = scalar_lea.sflag [#allocation3], %s1665_s11 }
 0x50a   : > { %p1926_p0 = pnand %p1929_p4, %p2188_p8 }
 0x50c   : > { %p1927_p1 = pneg %p1926_p0 }
 0x50e   : > { %2063 = dma.done.wait (%p1927_p1), %s1666_s30, 512  }
 0x50f   : > { %2065 = vsyncadd (%p1927_p1), %s1666_s30, 4294966784  ;;  %s21_s29 = sadd.s32 1, %s2088_s29   ;;  %s2501_s24 = smov %s2072_s25 }
 0x510   : > { %p18_p2 = scmp.ge.s32.totalorder %s21_s29, 4   ;;  %s2502_s25 = smov %s2076_s26 }
 0x511   : > { %s2503_s26 = smov %s2194_s14  ;;  %s2504_s27 = smov %s2084_s28 }
 0x512   : > { %s2505_s28 = smov %s2507_s9  ;;  %20 = sbr.rel (!%p18_p2) target bundleno = 4 (0x4), region = 100 }
 0x517   :  { %1671 = vsyncpa [#allocation3], 1 }
 0x518   :  { %1673 = vsyncpa [#allocation3 + $0x1], 1 }

// kernel: layer_forward.13
= control target key start
LH: loop header
LB: loop body
LE: loop exit
PB: predicated region body
PF: predicated region fallthrough
CT: control target
= control target key end

     0   :  { %s1273_s0 = inlined_call_operand.vmem [shape: f32[16,128], index: 0, kind: input, shape index: {}]   ;;  %s1274_s1 = inlined_call_operand.vmem [shape: f32[1,128], index: 1, kind: input, shape index: {}]   ;;  %s1275_s2 = inlined_call_operand.vmem [shape: f32[1,128], index: 2, kind: input, shape index: {}]   ;;  %s1276_s3 = inlined_call_operand.vmem [shape: bf16[128,512], index: 3, kind: input, shape index: {}]   ;;  %s1277_s4 = inlined_call_operand.vmem [shape: f32[1,512], index: 4, kind: input, shape index: {}]   ;;  %s1278_s5 = inlined_call_operand.vmem [shape: bf16[512,128], index: 5, kind: input, shape index: {}]   ;;  %s1279_s6 = inlined_call_operand.vmem [shape: f32[1,128], index: 6, kind: input, shape index: {}]   ;;  %s1280_s7 = inlined_call_operand.hbm [shape: f32[16,128], index: 7, kind: output, shape index: {}]  }
   0x1   :  { %v1043_v0 = vld [vmem:[%s1273_s0] sm:$0xff]  ;;  %v1048_v1 = vld [vmem:[%s1273_s0 + $0x8] sm:$0xff] }
   0x2   :  { %38 = vadd.xlane.f32.xlu0 %v1043_v0  ;;  %v890_v2 = vld [vmem:[%s1276_s3 + $0xe4] ss:$16 sps:$4 sm:$0xff]   ;;  %v892_v3 = vld [vmem:[%s1276_s3 + $0xec] ss:$16 sps:$4 sm:$0xff]   ;;  %v894_v4 = vld [vmem:[%s1276_s3 + $0xe0] ss:$16 sps:$4 sm:$0xff]  }
   0x3   :  { %v895_v5 = vld [vmem:[%s1276_s3 + $0xe8] ss:$16 sps:$4 sm:$0xff]   ;;  %296 = vmatprep.subr.bf16.mxu0 %v890_v2  ;;  %339 = vmatprep.subr.bf16.mxu1 %v892_v3 }
   0x4   :  { %297 = vmatpush1.bf16.msra.mxu0 %v894_v4  ;;  %340 = vmatpush1.bf16.msra.mxu1 %v895_v5 }
   0x6   :  { %40 = vadd.xlane.f32.xlu0 %v1048_v1 }
   0x7   :  { %12 = vsyncpa [#allocation4], 0  ;;  %v896_v14 = vld [vmem:[%s1276_s3 + $0xc4] ss:$16 sps:$4 sm:$0xff]   ;;  %v898_v15 = vld [vmem:[%s1276_s3 + $0xcc] ss:$16 sps:$4 sm:$0xff]  }
   0x8   :  { %v900_v16 = vld [vmem:[%s1276_s3 + $0xc0] ss:$16 sps:$4 sm:$0xff]   ;;  %v901_v17 = vld [vmem:[%s1276_s3 + $0xc8] ss:$16 sps:$4 sm:$0xff]   ;;  %298 = vmatprep.subr.bf16.mxu0 %v896_v14  ;;  %341 = vmatprep.subr.bf16.mxu1 %v898_v15  ;;  %v902_v18 = vld [vmem:[%s1276_s3 + $0xa4] ss:$16 sps:$4 sm:$0xff]  }
   0x9   :  { %299 = vmatpush1.bf16.msra.mxu0 %v900_v16  ;;  %342 = vmatpush1.bf16.msra.mxu1 %v901_v17  ;;  %v904_v19 = vld [vmem:[%s1276_s3 + $0xac] ss:$16 sps:$4 sm:$0xff]   ;;  %v906_v20 = vld [vmem:[%s1276_s3 + $0xa0] ss:$16 sps:$4 sm:$0xff]   ;;  %v907_v21 = vld [vmem:[%s1276_s3 + $0xa8] ss:$16 sps:$4 sm:$0xff]  }
   0xa   :  { %300 = vmatprep.subr.bf16.mxu0 %v902_v18  ;;  %343 = vmatprep.subr.bf16.mxu1 %v904_v19  ;;  %v908_v22 = vld [vmem:[%s1276_s3 + $0x84] ss:$16 sps:$4 sm:$0xff]   ;;  %v910_v23 = vld [vmem:[%s1276_s3 + $0x8c] ss:$16 sps:$4 sm:$0xff]   ;;  %v912_v24 = vld [vmem:[%s1276_s3 + $0x80] ss:$16 sps:$4 sm:$0xff]  }
   0xb   :  { %v913_v25 = vld [vmem:[%s1276_s3 + $0x88] ss:$16 sps:$4 sm:$0xff]   ;;  %v914_v26 = vld [vmem:[%s1276_s3 + $0x64] ss:$16 sps:$4 sm:$0xff]   ;;  %v916_v27 = vld [vmem:[%s1276_s3 + $0x6c] ss:$16 sps:$4 sm:$0xff]  }
   0xc   :  { %v918_v28 = vld [vmem:[%s1276_s3 + $0x60] ss:$16 sps:$4 sm:$0xff]   ;;  %v919_v29 = vld [vmem:[%s1276_s3 + $0x68] ss:$16 sps:$4 sm:$0xff]   ;;  %v920_v30 = vld [vmem:[%s1276_s3 + $0x44] ss:$16 sps:$4 sm:$0xff]  }
   0xd   :  { %301 = vmatpush1.bf16.msra.mxu0 %v906_v20  ;;  %344 = vmatpush1.bf16.msra.mxu1 %v907_v21  ;;  %v922_v31 = vld [vmem:[%s1276_s3 + $0x4c] ss:$16 sps:$4 sm:$0xff]   ;;  %v924_v32 = vld [vmem:[%s1276_s3 + $0x40] ss:$16 sps:$4 sm:$0xff]   ;;  %v925_v33 = vld [vmem:[%s1276_s3 + $0x48] ss:$16 sps:$4 sm:$0xff]  }
   0xe   :  { %302 = vmatprep.subr.bf16.mxu0 %v908_v22  ;;  %345 = vmatprep.subr.bf16.mxu1 %v910_v23  ;;  %v926_v34 = vld [vmem:[%s1276_s3 + $0x24] ss:$16 sps:$4 sm:$0xff]   ;;  %v928_v35 = vld [vmem:[%s1276_s3 + $0x2c] ss:$16 sps:$4 sm:$0xff]   ;;  %v996_v36 = vmov 0  }
   0xf   :  { %328 = vmatprep.mubr.bf16.mxu0 %v996_v36  ;;  %371 = vmatprep.mubr.bf16.mxu1 %v996_v36  ;;  %v930_v37 = vld [vmem:[%s1276_s3 + $0x20] ss:$16 sps:$4 sm:$0xff]   ;;  %v931_v38 = vld [vmem:[%s1276_s3 + $0x28] ss:$16 sps:$4 sm:$0xff]   ;;  %v932_v39 = vld [vmem:[%s1276_s3 + $0x4] ss:$16 sps:$4 sm:$0xff]  }
  0x10   :  { %v934_v40 = vld [vmem:[%s1276_s3 + $0xc] ss:$16 sps:$4 sm:$0xff]   ;;  %v936_v41 = vld [vmem:[%s1276_s3] ss:$16 sps:$4 sm:$0xff]   ;;  %v937_v42 = vld [vmem:[%s1276_s3 + $0x8] ss:$16 sps:$4 sm:$0xff]  }
  0x11   :  { %303 = vmatpush1.bf16.msra.mxu0 %v912_v24  ;;  %346 = vmatpush1.bf16.msra.mxu1 %v913_v25  ;;  %v938_v43 = vld [vmem:[%s1278_s5 + $0x78] sm:$0xff]   ;;  %v774_v53 = vld [vmem:[%s1274_s1] ss:$0 sm:$0xff]  ;;  %v942_v2 = vld [vmem:[%s1278_s5 + $0x70] sm:$0xff]  }
  0x12   :  { %304 = vmatprep.subr.bf16.mxu0 %v914_v26  ;;  %347 = vmatprep.subr.bf16.mxu1 %v916_v27  ;;  %v939_v44 = vld [vmem:[%s1278_s5 + $0xf8] sm:$0xff]   ;;  %v775_v57 = vld [vmem:[%s1275_s2] ss:$0 sm:$0xff]  ;;  %v943_v3 = vld [vmem:[%s1278_s5 + $0xf0] sm:$0xff]   ;;  %s997_s2 = smov [#allocation3]  }
  0x13   :  { %v940_v61 = vld [vmem:[%s1278_s5 + $0x38] sm:$0xff]   ;;  %v944_v4 = vld [vmem:[%s1278_s5 + $0x30] sm:$0xff]   ;;  %v962_v22 = vld [vmem:[%s1278_s5 + $0x48] sm:$0xff]   ;;  %s763_s11 = sshll.u32 %s997_s2, 4  ;;  %s764_s11 = int_to_ptr.vmem [resolvable:$true] %s763_s11 }
  0x14   :  { %v941_v62 = vld [vmem:[%s1278_s5 + $0xb8] sm:$0xff]   ;;  %v945_v5 = vld [vmem:[%s1278_s5 + $0xb0] sm:$0xff]   ;;  %v963_v23 = vld [vmem:[%s1278_s5 + $0xc8] sm:$0xff]   ;;  %s974_s12 = scalar_lea.vmem %s764_s11, 256  ;;  %p979_p1 = scmp.lt.s32.totalorder %s764_s11, %s764_s11 }
  0x15   :  { %305 = vmatpush1.bf16.msra.mxu0 %v918_v28  ;;  %348 = vmatpush1.bf16.msra.mxu1 %v919_v29  ;;  %v954_v14 = vld [vmem:[%s1278_s5 + $0x58] sm:$0xff]   ;;  %v958_v18 = vld [vmem:[%s1278_s5 + $0x50] sm:$0xff]   ;;  %v964_v24 = vld [vmem:[%s1278_s5 + $0x8] sm:$0xff]   ;;  %p975_p0 = scmp.ne.s32.totalorder %s764_s11, %s974_s12  ;;  %p980_p2 = scmp.lt.s32.totalorder %s974_s12, %s974_s12 }
  0x16   :  { %306 = vmatprep.subr.bf16.mxu0 %v920_v30  ;;  %349 = vmatprep.subr.bf16.mxu1 %v922_v31  ;;  %v955_v15 = vld [vmem:[%s1278_s5 + $0xd8] sm:$0xff]   ;;  %v959_v19 = vld [vmem:[%s1278_s5 + $0xd0] sm:$0xff]   ;;  %v965_v25 = vld [vmem:[%s1278_s5 + $0x88] sm:$0xff]   ;;  %v116_v30 = vlaneseq }
  0x17   :  { %v956_v16 = vld [vmem:[%s1278_s5 + $0x18] sm:$0xff]   ;;  %v960_v20 = vld [vmem:[%s1278_s5 + $0x10] sm:$0xff]   ;;  %v966_v26 = vld [vmem:[%s1278_s5 + $0x40] sm:$0xff]   ;;  %p981_p3 = por %p980_p2, %p979_p1 }
  0x18   :  { %v957_v17 = vld [vmem:[%s1278_s5 + $0x98] sm:$0xff]   ;;  %v961_v21 = vld [vmem:[%s1278_s5 + $0x90] sm:$0xff]   ;;  %v967_v27 = vld [vmem:[%s1278_s5 + $0xc0] sm:$0xff]   ;;  %v117_v31 = vshrl.u32 %v116_v30, 7 }
  0x19   :  { %307 = vmatpush1.bf16.msra.mxu0 %v924_v32  ;;  %350 = vmatpush1.bf16.msra.mxu1 %v925_v33  ;;  %v968_v28 = vld [vmem:[%s1278_s5] sm:$0xff]   ;;  %p982_p4 = pnand %p981_p3, %p975_p0 }
  0x1a   :  { %308 = vmatprep.subr.bf16.mxu0 %v926_v34  ;;  %351 = vmatprep.subr.bf16.mxu1 %v928_v35  ;;  %v969_v29 = vld [vmem:[%s1278_s5 + $0x80] sm:$0xff]   ;;  %v122_v32 = vsub.s32 1, %v117_v31  ;;  %v130_v33 = vsub.s32 3, %v117_v31  ;;  %v118_v34 = vsub.s32 0, %v117_v31  ;;  %v126_v35 = vsub.s32 2, %v117_v31 }
  0x1b   :  { %v114_v36 = vld [vmem:[%s1277_s4] sm:$0xf] }
  0x1d   :  { %309 = vmatpush1.bf16.msra.mxu0 %v930_v37  ;;  %352 = vmatpush1.bf16.msra.mxu1 %v931_v38 }
  0x1e   :  { %310 = vmatprep.subr.bf16.mxu0 %v932_v39  ;;  %353 = vmatprep.subr.bf16.mxu1 %v934_v40  ;;  %v123_v39 = vrot.slane %v114_v36, %v122_v32  ;;  %v131_v40 = vrot.slane %v114_v36, %v130_v33 }
  0x21   :  { %311 = vmatpush1.bf16.msra.mxu0 %v936_v41  ;;  %354 = vmatpush1.bf16.msra.mxu1 %v937_v42  ;;  %v119_v41 = vrot.slane %v114_v36, %v118_v34  ;;  %v127_v42 = vrot.slane %v114_v36, %v126_v35 }
  0x22   :  { %841 = vmatprep.subr.bf16.mxu0 %v938_v43  ;;  %863 = vmatprep.subr.bf16.mxu1 %v939_v44 }
  0x8b   :  { %v39_v6 = vpop.xlane.xlu0 %38 }
  0x8c   :  { %v43_v7 = vmul.f32 0.0078125, %v39_v6  ;;  %v946_v6 = vld [vmem:[%s1278_s5 + $0x68] sm:$0xff]  }
  0x8e   :  { %v1065_v8 = vsub.f32 %v1043_v0, %v43_v7  ;;  %v947_v7 = vld [vmem:[%s1278_s5 + $0xe8] sm:$0xff]  }
  0x8f   :  { %v41_v9 = vpop.xlane.xlu0 %40 }
  0x90   :  { %v44_v10 = vmul.f32 0.0078125, %v41_v9  ;;  %v47_v11 = vmul.f32 %v1065_v8, %v1065_v8  ;;  %v949_v9 = vld [vmem:[%s1278_s5 + $0xa8] sm:$0xff]  }
  0x92   :  { %v1070_v12 = vsub.f32 %v1048_v1, %v44_v10  ;;  %49 = vadd.xlane.f32.xlu1 %v47_v11  ;;  %v950_v10 = vld [vmem:[%s1278_s5 + $0x60] sm:$0xff]  }
  0x93   :  { %v951_v11 = vld [vmem:[%s1278_s5 + $0xe0] sm:$0xff]  }
  0x94   :  { %v48_v13 = vmul.f32 %v1070_v12, %v1070_v12 }
  0x96   :  { %51 = vadd.xlane.f32.xlu1 %v48_v13  ;;  %v953_v13 = vld [vmem:[%s1278_s5 + $0xa0] sm:$0xff]  }
 0x11b   :  { %v50_v45 = vpop.xlane.xlu1 %49 }
 0x11c   :  { %v53_v46 = vmul.f32 0.0078125, %v50_v45 }
 0x11e   :  { %v55_v47 = vadd.f32 1e-05, %v53_v46 }
 0x11f   :  { %v52_v48 = vpop.xlane.xlu1 %51 }
 0x120   :  { %970 = vrsqrt.f32 %v55_v47  ;;  %v54_v49 = vmul.f32 0.0078125, %v52_v48 }
 0x122   :  { %v56_v50 = vadd.f32 1e-05, %v54_v49 }
 0x124   :  { %972 = vrsqrt.f32 %v56_v50 }
 0x12d   :  { %v971_v51 = vpop.eup %970 }
 0x12e   :  { %v59_v52 = vmul.f32 %v971_v51, %v1065_v8  ;;  %v948_v8 = vld [vmem:[%s1278_s5 + $0x28] sm:$0xff]  }
 0x130   :  { %v67_v56 = vmul.f32 %v774_v53, %v59_v52 }
 0x131   :  { %v973_v54 = vpop.eup %972 }
 0x132   :  { %v60_v55 = vmul.f32 %v973_v54, %v1070_v12  ;;  %v75_v59 = vadd.f32 %v775_v57, %v67_v56  ;;  %v952_v12 = vld [vmem:[%s1278_s5 + $0x20] sm:$0xff]  }
 0x134   :  { %v68_v58 = vmul.f32 %v774_v53, %v60_v55 }
 0x136   :  { %v76_v60 = vadd.f32 %v775_v57, %v68_v58 }
 0x138   :  { %v81_v63 = vpack.c.bf16 %v76_v60, %v75_v59 }
 0x13a   :  { %329 = vmatmul.mubr.bf16.vlgmr.msra.gmra.mxu0 %v81_v63  ;;  %372 = vmatmul.mubr.bf16.vlgmr.msra.gmra.mxu1 %v81_v63 }
 0x13b   :  { %842 = vmatpush3.bf16.msra.mxu0 %v940_v61  ;;  %864 = vmatpush3.bf16.msra.mxu1 %v941_v62 }
 0x13c   :  { %843 = vmatprep.subr.bf16.mxu0 %v942_v2  ;;  %865 = vmatprep.subr.bf16.mxu1 %v943_v3 }
 0x13f   :  { %844 = vmatpush3.bf16.msra.mxu0 %v944_v4  ;;  %866 = vmatpush3.bf16.msra.mxu1 %v945_v5 }
 0x140   :  { %845 = vmatprep.subr.bf16.mxu0 %v946_v6  ;;  %867 = vmatprep.subr.bf16.mxu1 %v947_v7 }
 0x143   :  { %846 = vmatpush3.bf16.msra.mxu0 %v948_v8  ;;  %868 = vmatpush3.bf16.msra.mxu1 %v949_v9 }
 0x144   :  { %847 = vmatprep.subr.bf16.mxu0 %v950_v10  ;;  %869 = vmatprep.subr.bf16.mxu1 %v951_v11 }
 0x147   :  { %848 = vmatpush3.bf16.msra.mxu0 %v952_v12  ;;  %870 = vmatpush3.bf16.msra.mxu1 %v953_v13 }
 0x148   :  { %849 = vmatprep.subr.bf16.mxu0 %v954_v14  ;;  %871 = vmatprep.subr.bf16.mxu1 %v955_v15 }
 0x14b   :  { %850 = vmatpush3.bf16.msra.mxu0 %v956_v16  ;;  %872 = vmatpush3.bf16.msra.mxu1 %v957_v17 }
 0x14c   :  { %851 = vmatprep.subr.bf16.mxu0 %v958_v18  ;;  %873 = vmatprep.subr.bf16.mxu1 %v959_v19  ;;  %v840_v18 = vld [vmem:[%s1279_s6] ss:$0 sm:$0xff] }
 0x14f   :  { %852 = vmatpush3.bf16.msra.mxu0 %v960_v20  ;;  %874 = vmatpush3.bf16.msra.mxu1 %v961_v21 }
 0x150   :  { %853 = vmatprep.subr.bf16.mxu0 %v962_v22  ;;  %875 = vmatprep.subr.bf16.mxu1 %v963_v23 }
 0x153   :  { %854 = vmatpush3.bf16.msra.mxu0 %v964_v24  ;;  %876 = vmatpush3.bf16.msra.mxu1 %v965_v25 }
 0x154   :  { %855 = vmatprep.subr.bf16.mxu0 %v966_v26  ;;  %877 = vmatprep.subr.bf16.mxu1 %v967_v27 }
 0x157   :  { %856 = vmatpush3.bf16.msra.mxu0 %v968_v28  ;;  %878 = vmatpush3.bf16.msra.mxu1 %v969_v29 }
 0x1fa   :  { %v330_v37 = vpop.f32.mrf.mxu0  ;;  %v373_v38 = vpop.f32.mrf.mxu1 }
 0x1fb   :  { %v331_v51 = vadd.f32 %v330_v37, %v119_v41  ;;  %v374_v52 = vadd.f32 %v373_v38, %v127_v42 }
 0x1fc   :  { %v332_v43 = vpop.f32.mrf.mxu0  ;;  %v375_v44 = vpop.f32.mrf.mxu1 }
 0x1fd   :  { %v333_v47 = vadd.f32 %v332_v43, %v123_v39  ;;  %v376_v48 = vadd.f32 %v375_v44, %v131_v40  ;;  %v382_v63 = vmax.f32 %v331_v51, 0.0  ;;  %v384_v2 = vmax.f32 %v374_v52, 0.0 }
 0x1fe   :  { %v334_v45 = vpop.f32.mrf.mxu0  ;;  %v377_v46 = vpop.f32.mrf.mxu1 }
 0x1ff   :  { %v335_v49 = vadd.f32 %v334_v45, %v119_v41  ;;  %v378_v50 = vadd.f32 %v377_v46, %v127_v42  ;;  %v383_v59 = vmax.f32 %v333_v47, 0.0  ;;  %v385_v60 = vmax.f32 %v376_v48, 0.0 }
 0x200   :  { %v336_v53 = vpop.f32.mrf.mxu0  ;;  %v379_v54 = vpop.f32.mrf.mxu1 }
 0x201   :  { %v337_v55 = vadd.f32 %v336_v53, %v123_v39  ;;  %v380_v56 = vadd.f32 %v379_v54, %v131_v40  ;;  %v386_v57 = vmax.f32 %v335_v49, 0.0  ;;  %v388_v58 = vmax.f32 %v378_v50, 0.0 }
 0x203   :  { %v387_v61 = vmax.f32 %v337_v55, 0.0  ;;  %v389_v62 = vmax.f32 %v380_v56, 0.0  ;;  %v392_v5 = vpack.c.bf16 %v386_v57, %v382_v63  ;;  %v394_v6 = vpack.c.bf16 %v388_v58, %v384_v2 }
 0x205   :  { %v393_v3 = vpack.c.bf16 %v387_v61, %v383_v59  ;;  %v395_v4 = vpack.c.bf16 %v389_v62, %v385_v60 }
 0x207   :  { %684 = vmatprep.mubr.bf16.mxu0 %v393_v3  ;;  %725 = vmatprep.mubr.bf16.mxu1 %v395_v4 }
 0x208   :  { %685 = vmatmul.mubr.bf16.vlgmr.msra.gmra.mxu0 %v392_v5  ;;  %726 = vmatmul.mubr.bf16.vlgmr.msra.gmra.mxu1 %v394_v6 }
 0x2c8   :  { %v857_v7 = vpop.f32.mrf.mxu0  ;;  %v879_v8 = vpop.f32.mrf.mxu1 }
 0x2ca   :  { %v858_v9 = vpop.f32.mrf.mxu0  ;;  %v880_v10 = vpop.f32.mrf.mxu1 }
 0x2cb   :  { %v859_v11 = vadd.f32 %v858_v9, %v857_v7  ;;  %v881_v12 = vadd.f32 %v880_v10, %v879_v8 }
 0x2cc   :  { %v860_v13 = vpop.f32.mrf.mxu0  ;;  %v882_v14 = vpop.f32.mrf.mxu1 }
 0x2cd   :  { %v728_v15 = vadd.f32 %v881_v12, %v859_v11 }
 0x2ce   :  { %v861_v16 = vpop.f32.mrf.mxu0  ;;  %v883_v17 = vpop.f32.mrf.mxu1 }
 0x2cf   :  { %v862_v19 = vadd.f32 %v861_v16, %v860_v13  ;;  %v884_v20 = vadd.f32 %v883_v17, %v882_v14  ;;  %v750_v22 = vadd.f32 %v840_v18, %v728_v15 }
 0x2d1   :  { %v731_v21 = vadd.f32 %v884_v20, %v862_v19  ;;  %v754_v23 = vadd.f32 %v750_v22, %v1043_v0 }
 0x2d3   :  { %v751_v24 = vadd.f32 %v840_v18, %v731_v21  ;;  %756 = vst [vmem:[#allocation3] sm:$0xff] %v754_v23 }
 0x2d5   :  { %v755_v25 = vadd.f32 %v751_v24, %v1048_v1 }
 0x2d7   :  { %757 = vst [vmem:[#allocation3 + $0x8] sm:$0xff] %v755_v25 }
 0x2d8   :  { %985 = shalt.err (!%p982_p4)
}
 0x2d9   :  { %s998_s6 = smov 128   ;;  %s999_s0 = smov 8  }
 0x2da   :  { %769 = dma.vmem_to_hbm [thread:$0]  %s764_s11, 256, %s1280_s7, [#allocation4], %s998_s6, %s998_s6, %s999_s0  }
 0x2db   :  { %994 = dma.done.wait [#allocation4], 256  }
 0x2dc   :  { %995 = vsyncadd [#allocation4], 4294967040 }
 0x2dd   :  { %773 = vsyncpa [#allocation4], 1 }

</bundles_post_ra>
